<compile_context>
chip_gen: v6e
topology: v6e:2x2x1
jax: 0.10.0
libtpu: 0.0.40
codegen_flags: <defaults>
</compile_context>

<pallas_src>
import functools

import jax
import jax.numpy as jnp
import numpy as np
from jax import lax
from jax.experimental import pallas as pl
from jax.experimental.pallas import tpu as pltpu

EPS = 1e-5


# ------------------------------- tiling helpers --------------------------------


def _pick_th(H, W):
    """Row-tile height: divisor of H, prefer multiples of 8, TH*W ~ 256..1024."""
    target = max(256, W)
    cap = max(1024, W)
    cands = [t for t in range(1, H + 1) if H % t == 0 and t * W <= cap]
    good = [t for t in cands if t * W >= target and (t % 8 == 0 or t == H)]
    if good:
        return min(good)
    aligned = [t for t in cands if t % 8 == 0 or t == H]
    if aligned:
        return max(aligned)
    return max(cands) if cands else H


def _pick_tm(NH, WC, budget_bytes=12 * 2**20):
    """Pass-3 row tile: byte-capped (bf16 in + f32 out, double buffered)."""
    cap_rows = max(8, budget_bytes // (WC * 12))
    cands = [t for t in range(1, NH + 1)
             if NH % t == 0 and t <= cap_rows and (t % 8 == 0 or t == NH)]
    if not cands:
        cands = [t for t in range(1, NH + 1) if NH % t == 0 and t <= cap_rows]
    return max(cands) if cands else NH


def _vmem_limit_bytes(in_blocks, out_blocks, scratch_blocks):
    """Rough per-call VMEM need (inputs/outputs double-buffered) with 2x headroom."""
    total = 0
    for shape, dt in list(in_blocks) + list(out_blocks):
        total += 2 * int(np.prod(shape)) * np.dtype(dt).itemsize
    for shape, dt in scratch_blocks:
        total += int(np.prod(shape)) * np.dtype(dt).itemsize
    return int(min(64 * 2**20, max(32 * 2**20, 2 * total)))


# ------------------------------- conv helpers ----------------------------------


def _conv3x3_im2col(xt, w_flat, b, TH, W, Cin):
    """Single K=9*Cin matmul (only used when Cin is tiny). xt: (TH+2, W+2, Cin)."""
    cols = [xt[dy:dy + TH, dx:dx + W, :].reshape(TH * W, Cin)
            for dy in range(3) for dx in range(3)]
    slab = jnp.concatenate(cols, axis=1)                      # (TH*W, 9*Cin)
    return jnp.dot(slab, w_flat, preferred_element_type=jnp.float32) + b


def _conv3x3_taps(xt, w_taps, b, TH, W, Cin):
    """Nine tap matmuls accumulated in f32 (no im2col slab). xt: (TH+2, W+2, Cin)."""
    C = w_taps.shape[-1]
    acc = jnp.zeros((TH * W, C), jnp.float32)
    for dy in range(3):
        rows = xt[dy:dy + TH, :, :]                           # (TH, W+2, Cin)
        for dx in range(3):
            xs = rows[:, dx:dx + W, :].reshape(TH * W, Cin)
            acc = acc + jnp.dot(xs, w_taps[dy * 3 + dx],
                                preferred_element_type=jnp.float32)
    return acc + b


# --------------------------------- kernels --------------------------------------


def conv1_stats_kernel(x_ref, w_ref, b_ref, y_ref, stats_ref, xpad_ref,
                       *, H, W, TH, im2col):
    """Pad in VMEM, conv3x3+bias over one image (row-tiled), per-image sum / sum-sq."""
    Cin = x_ref.shape[3]
    C = w_ref.shape[-1]
    pdt = xpad_ref.dtype

    # Zero only the 1-pixel halo border; copy the interior (cast to matmul dtype).
    xpad_ref[0, 0:1, :, :] = jnp.zeros((1, W + 2, Cin), pdt)
    xpad_ref[0, H + 1:H + 2, :, :] = jnp.zeros((1, W + 2, Cin), pdt)
    xpad_ref[0, :, 0:1, :] = jnp.zeros((H + 2, 1, Cin), pdt)
    xpad_ref[0, :, W + 1:W + 2, :] = jnp.zeros((H + 2, 1, Cin), pdt)
    xpad_ref[0, 1:H + 1, 1:W + 1, :] = x_ref[0, :, :, :].astype(pdt)

    w = w_ref[...]
    b = b_ref[...].astype(jnp.float32)

    def body(i, carry):
        s, ss = carry
        r0 = pl.multiple_of(i * TH, TH)
        xt = xpad_ref[0, pl.ds(r0, TH + 2), :, :]             # (TH+2, W+2, Cin)
        if im2col:
            y = _conv3x3_im2col(xt, w, b, TH, W, Cin)         # (TH*W, C) f32
        else:
            y = _conv3x3_taps(xt, w, b, TH, W, Cin)
        y_ref[0, pl.ds(r0, TH), :, :] = y.reshape(TH, W, C).astype(y_ref.dtype)
        return (s + jnp.sum(y, axis=0, keepdims=True),
                ss + jnp.sum(y * y, axis=0, keepdims=True))

    z = jnp.zeros((1, C), jnp.float32)
    s, ss = lax.fori_loop(0, H // TH, body, (z, z))
    stats_ref[...] = jnp.concatenate([s, ss], axis=0).reshape(1, 2, C)


def bn_relu_conv2_stats_kernel(y1_ref, s1_ref, t1_ref, w_ref, b_ref,
                               y2_ref, stats_ref, hpad_ref, *, H, W, TH):
    """Folded BN1 + ReLU -> padded VMEM scratch -> tap-accumulated conv3x3 + stats."""
    C = w_ref.shape[-1]
    pdt = hpad_ref.dtype

    # Zero only the halo border; the interior is fully written by the BN loop below.
    hpad_ref[0, 0:1, :, :] = jnp.zeros((1, W + 2, C), pdt)
    hpad_ref[0, H + 1:H + 2, :, :] = jnp.zeros((1, W + 2, C), pdt)
    hpad_ref[0, :, 0:1, :] = jnp.zeros((H + 2, 1, C), pdt)
    hpad_ref[0, :, W + 1:W + 2, :] = jnp.zeros((H + 2, 1, C), pdt)

    s1 = s1_ref[...].reshape(1, 1, C)
    t1 = t1_ref[...].reshape(1, 1, C)

    def bn_body(i, carry):
        r0 = pl.multiple_of(i * TH, TH)
        h = jnp.maximum(
            y1_ref[0, pl.ds(r0, TH), :, :].astype(jnp.float32) * s1 + t1, 0.0)
        hpad_ref[0, pl.ds(r0 + 1, TH), 1:W + 1, :] = h.astype(pdt)
        return carry

    lax.fori_loop(0, H // TH, bn_body, 0)

    w = w_ref[...]                                            # (9, C, C)
    b = b_ref[...].astype(jnp.float32)

    def conv_body(i, carry):
        s, ss = carry
        r0 = pl.multiple_of(i * TH, TH)
        xt = hpad_ref[0, pl.ds(r0, TH + 2), :, :]             # (TH+2, W+2, C)
        y = _conv3x3_taps(xt, w, b, TH, W, C)                 # (TH*W, C) f32
        y2_ref[0, pl.ds(r0, TH), :, :] = y.reshape(TH, W, C).astype(y2_ref.dtype)
        return (s + jnp.sum(y, axis=0, keepdims=True),
                ss + jnp.sum(y * y, axis=0, keepdims=True))

    z = jnp.zeros((1, C), jnp.float32)
    s, ss = lax.fori_loop(0, H // TH, conv_body, (z, z))
    stats_ref[...] = jnp.concatenate([s, ss], axis=0).reshape(1, 2, C)


def bn_relu_kernel(y_ref, s_ref, t_ref, o_ref):
    """Folded BN + ReLU on a lane-dense (rows, W*C) view."""
    o_ref[...] = jnp.maximum(
        y_ref[...].astype(jnp.float32) * s_ref[...] + t_ref[...], 0.0)


# --------------------------------- wrapper ---------------------------------------


def _fold_bn(stats, g, be, m_total):
    """stats: (N, 2, C) per-image [sum; sum_sq] -> folded per-channel scale/shift."""
    ssum = jnp.sum(stats[:, 0, :], axis=0)
    ssq = jnp.sum(stats[:, 1, :], axis=0)
    mean = ssum / m_total
    var = jnp.maximum(ssq / m_total - mean * mean, 0.0)
    s = g.reshape(-1) * lax.rsqrt(var + EPS)
    t = be.reshape(-1) - s * mean
    C = s.shape[0]
    return s.reshape(1, C), t.reshape(1, C)


def double_conv(x_nchw, params, *, use_bf16=True):
    """params = (w1, b1, g1, be1, w2, b2, g2, be2); w* are HWIO (3,3,Cin,C)/(3,3,C,C)."""
    w1, b1, g1, be1, w2, b2, g2, be2 = params
    N, Cin, H, W = x_nchw.shape
    C = w1.shape[-1]
    mm_dtype = jnp.bfloat16 if use_bf16 else jnp.float32
    inter_dtype = jnp.bfloat16 if use_bf16 else jnp.float32
    TH = _pick_th(H, W)
    conv1_im2col = Cin <= 16        # K=9*Cin im2col only while Cin is tiny

    if conv1_im2col:
        w1k = w1.reshape(9 * Cin, C).astype(mm_dtype)
        w1_blk, w1_map = (9 * Cin, C), (lambda n: (0, 0))
    else:
        w1k = w1.reshape(9, Cin, C).astype(mm_dtype)
        w1_blk, w1_map = (9, Cin, C), (lambda n: (0, 0, 0))
    w2k = w2.reshape(9, C, C).astype(mm_dtype)
    b1f = b1.reshape(1, C).astype(jnp.float32)
    b2f = b2.reshape(1, C).astype(jnp.float32)

    x = jnp.transpose(x_nchw, (0, 2, 3, 1)).astype(jnp.float32)   # NCHW -> NHWC, no pad

    # ---- pass 1: in-VMEM halo pad + conv1 + bias + per-image BN1 stats ----------
    par1 = pltpu.CompilerParams(
        dimension_semantics=("parallel",),
        vmem_limit_bytes=_vmem_limit_bytes(
            [((1, H, W, Cin), jnp.float32), (w1_blk, mm_dtype), ((1, C), jnp.float32)],
            [((1, H, W, C), inter_dtype), ((1, 2, C), jnp.float32)],
            [((1, H + 2, W + 2, Cin), mm_dtype)]))

    y1, stats1 = pl.pallas_call(
        functools.partial(conv1_stats_kernel, H=H, W=W, TH=TH, im2col=conv1_im2col),
        grid=(N,),
        in_specs=[
            pl.BlockSpec((1, H, W, Cin), lambda n: (n, 0, 0, 0)),
            pl.BlockSpec(w1_blk, w1_map),
            pl.BlockSpec((1, C), lambda n: (0, 0)),
        ],
        out_specs=[
            pl.BlockSpec((1, H, W, C), lambda n: (n, 0, 0, 0)),
            pl.BlockSpec((1, 2, C), lambda n: (n, 0, 0)),
        ],
        out_shape=[
            jax.ShapeDtypeStruct((N, H, W, C), inter_dtype),
            jax.ShapeDtypeStruct((N, 2, C), jnp.float32),
        ],
        scratch_shapes=[pltpu.VMEM((1, H + 2, W + 2, Cin), mm_dtype)],
        compiler_params=par1,
    )(x, w1k, b1f)

    s1, t1 = _fold_bn(stats1, g1, be1, N * H * W)

    # ---- pass 2: BN1 + ReLU + conv2 (tap-accumulated) + per-image BN2 stats -----
    par2 = pltpu.CompilerParams(
        dimension_semantics=("parallel",),
        vmem_limit_bytes=_vmem_limit_bytes(
            [((1, H, W, C), inter_dtype), ((1, C), jnp.float32), ((1, C), jnp.float32),
             ((9, C, C), mm_dtype), ((1, C), jnp.float32)],
            [((1, H, W, C), inter_dtype), ((1, 2, C), jnp.float32)],
            [((1, H + 2, W + 2, C), mm_dtype)]))

    y2, stats2 = pl.pallas_call(
        functools.partial(bn_relu_conv2_stats_kernel, H=H, W=W, TH=TH),
        grid=(N,),
        in_specs=[
            pl.BlockSpec((1, H, W, C), lambda n: (n, 0, 0, 0)),
            pl.BlockSpec((1, C), lambda n: (0, 0)),
            pl.BlockSpec((1, C), lambda n: (0, 0)),
            pl.BlockSpec((9, C, C), lambda n: (0, 0, 0)),
            pl.BlockSpec((1, C), lambda n: (0, 0)),
        ],
        out_specs=[
            pl.BlockSpec((1, H, W, C), lambda n: (n, 0, 0, 0)),
            pl.BlockSpec((1, 2, C), lambda n: (n, 0, 0)),
        ],
        out_shape=[
            jax.ShapeDtypeStruct((N, H, W, C), inter_dtype),
            jax.ShapeDtypeStruct((N, 2, C), jnp.float32),
        ],
        scratch_shapes=[pltpu.VMEM((1, H + 2, W + 2, C), mm_dtype)],
        compiler_params=par2,
    )(y1, s1, t1, w2k, b2f)

    s2, t2 = _fold_bn(stats2, g2, be2, N * H * W)

    # ---- pass 3: BN2 + ReLU on a lane-dense (N*H, W*C) view ---------------------
    NH, WC = N * H, W * C
    TM = _pick_tm(NH, WC)
    s2r = jnp.tile(s2, (1, W))        # (1, W*C): matches (W, C) row-major flatten
    t2r = jnp.tile(t2, (1, W))
    par3 = pltpu.CompilerParams(
        dimension_semantics=("parallel",),
        vmem_limit_bytes=_vmem_limit_bytes(
            [((TM, WC), inter_dtype), ((1, WC), jnp.float32), ((1, WC), jnp.float32)],
            [((TM, WC), jnp.float32)], []))

    h2 = pl.pallas_call(
        bn_relu_kernel,
        grid=(NH // TM,),
        in_specs=[
            pl.BlockSpec((TM, WC), lambda i: (i, 0)),
            pl.BlockSpec((1, WC), lambda i: (0, 0)),
            pl.BlockSpec((1, WC), lambda i: (0, 0)),
        ],
        out_specs=pl.BlockSpec((TM, WC), lambda i: (i, 0)),
        out_shape=jax.ShapeDtypeStruct((NH, WC), jnp.float32),
        compiler_params=par3,
    )(y2.reshape(NH, WC), s2r, t2r)

    return jnp.transpose(h2.reshape(N, H, W, C), (0, 3, 1, 2))       # NHWC -> NCHW


# ------------------------------ reference & test ---------------------------------


def ref_double_conv(x_nchw, params):
    """Pure-JAX f32 reference mirroring PyTorch DoubleConv in training mode."""
    w1, b1, g1, be1, w2, b2, g2, be2 = params

    def conv_bn_relu(x, w, b, g, be):
        C = w.shape[-1]
        y = lax.conv_general_dilated(
            x, w, window_strides=(1, 1), padding="SAME",
            dimension_numbers=("NHWC", "HWIO", "NHWC")) + b.reshape(1, 1, 1, C)
        mu = y.mean(axis=(0, 1, 2))
        var = ((y - mu) ** 2).mean(axis=(0, 1, 2))
        y = g.reshape(1, 1, 1, C) * (y - mu) / jnp.sqrt(var + EPS) + be.reshape(1, 1, 1, C)
        return jnp.maximum(y, 0.0)

    x = jnp.transpose(x_nchw, (0, 2, 3, 1)).astype(jnp.float32)
    h = conv_bn_relu(x, w1, b1, g1, be1)
    h = conv_bn_relu(h, w2, b2, g2, be2)
    return jnp.transpose(h, (0, 3, 1, 2))


def init_params(key, in_channels, out_channels):
    k1, k2, k3, k4 = jax.random.split(key, 4)
    w1 = 0.1 * jax.random.normal(k1, (3, 3, in_channels, out_channels), jnp.float32)
    b1 = 0.02 * jax.random.normal(k2, (1, out_channels), jnp.float32)
    w2 = 0.1 * jax.random.normal(k3, (3, 3, out_channels, out_channels), jnp.float32)
    b2 = 0.02 * jax.random.normal(k4, (1, out_channels), jnp.float32)
    g1 = 1.0 + 0.05 * jnp.arange(out_channels, dtype=jnp.float32).reshape(1, -1)
    be1 = 0.03 * jnp.arange(out_channels, dtype=jnp.float32).reshape(1, -1)
    g2 = 1.0 - 0.02 * jnp.arange(out_channels, dtype=jnp.float32).reshape(1, -1)
    be2 = -0.01 * jnp.arange(out_channels, dtype=jnp.float32).reshape(1, -1)
    return (w1, b1, g1, be1, w2, b2, g2, be2)


if __name__ == "__main__":
    key = jax.random.PRNGKey(0)
    kx, kp = jax.random.split(key)

    N, Cin, H, W = 2, 4, 16, 16
    Cout = 8
    x = jax.random.normal(kx, (N, Cin, H, W), jnp.float32)   # NCHW, like PyTorch
    params = init_params(kp, Cin, Cout)

    ref = jax.block_until_ready(ref_double_conv(x, params))

    # exact-semantics path (f32 matmuls + f32 intermediates): tight tolerance
    out_f32 = jax.block_until_ready(double_conv(x, params, use_bf16=False))
    np.testing.assert_allclose(np.asarray(out_f32), np.asarray(ref), rtol=2e-3, atol=2e-3)

    # fast path (bf16 MXU operands + bf16 intermediates, f32 stats): looser tolerance
    out_bf16 = jax.block_until_ready(double_conv(x, params, use_bf16=True))
    np.testing.assert_allclose(np.asarray(out_bf16), np.asarray(ref), rtol=5e-2, atol=5e-2)

    assert out_bf16.shape == (N, Cout, H, W)
    print("KERNEL_OK")
</pallas_src>

<mosaic_0001>
module attributes {stable_mosaic.version = 11 : i64} {
  func.func @conv1_stats_kernel(%arg0: i32, %arg1: memref<1x16x16x4xf32, #tpu.memory_space<vmem>>, %arg2: memref<36x8xf32, #tpu.memory_space<vmem>>, %arg3: memref<1x8xf32, #tpu.memory_space<vmem>>, %arg4: memref<1x16x16x8xf32, #tpu.memory_space<vmem>>, %arg5: memref<1x2x8xf32, #tpu.memory_space<vmem>>, %arg6: memref<1x18x18x4xf32, #tpu.memory_space<vmem>>) attributes {dimension_semantics = [#tpu.dimension_semantics<parallel>], iteration_bounds = array<i64: 2>, scalar_prefetch = 0 : i64, scratch_operands = 1 : i64, tpu.core_type = #tpu.core_type<tc>, window_params = [{transform_indices = @transform_0, window_bounds = array<i64: 1, 16, 16, 4>}, {pipeline_mode = #tpu.pipeline_mode<synchronous>, transform_indices = @transform_1, window_bounds = array<i64: 36, 8>}, {pipeline_mode = #tpu.pipeline_mode<synchronous>, transform_indices = @transform_2, window_bounds = array<i64: 1, 8>}, {transform_indices = @transform_3, window_bounds = array<i64: 1, 16, 16, 8>}, {transform_indices = @transform_4, window_bounds = array<i64: 1, 2, 8>}]} {
    %cst = arith.constant 0.000000e+00 : f32
    %0 = vector.broadcast %cst : f32 to vector<1x18x4xf32>
    %c0 = arith.constant 0 : index
    %c0_0 = arith.constant 0 : index
    %c0_1 = arith.constant 0 : index
    %c0_2 = arith.constant 0 : index
    %1 = vector.load %arg6[%c0, %c0_0, %c0_1, %c0_2] : memref<1x18x18x4xf32, #tpu.memory_space<vmem>>, vector<1x1x18x4xf32>
    %2 = vector.shape_cast %1 : vector<1x1x18x4xf32> to vector<1x18x4xf32>
    %3 = vector.shape_cast %0 : vector<1x18x4xf32> to vector<1x1x18x4xf32>
    tpu.vector_store %arg6[%c0, %c0_0, %c0_1, %c0_2], %3 {strides = array<i32>} : memref<1x18x18x4xf32, #tpu.memory_space<vmem>>, vector<1x1x18x4xf32>,
    %cst_3 = arith.constant 0.000000e+00 : f32
    %4 = vector.broadcast %cst_3 : f32 to vector<1x18x4xf32>
    %c0_4 = arith.constant 0 : index
    %c17 = arith.constant 17 : index
    %c0_5 = arith.constant 0 : index
    %c0_6 = arith.constant 0 : index
    %5 = vector.load %arg6[%c0_4, %c17, %c0_5, %c0_6] : memref<1x18x18x4xf32, #tpu.memory_space<vmem>>, vector<1x1x18x4xf32>
    %6 = vector.shape_cast %5 : vector<1x1x18x4xf32> to vector<1x18x4xf32>
    %7 = vector.shape_cast %4 : vector<1x18x4xf32> to vector<1x1x18x4xf32>
    tpu.vector_store %arg6[%c0_4, %c17, %c0_5, %c0_6], %7 {strides = array<i32>} : memref<1x18x18x4xf32, #tpu.memory_space<vmem>>, vector<1x1x18x4xf32>,
    %cst_7 = arith.constant 0.000000e+00 : f32
    %8 = vector.broadcast %cst_7 : f32 to vector<18x1x4xf32>
    %c0_8 = arith.constant 0 : index
    %c0_9 = arith.constant 0 : index
    %c0_10 = arith.constant 0 : index
    %c0_11 = arith.constant 0 : index
    %9 = vector.load %arg6[%c0_8, %c0_9, %c0_10, %c0_11] : memref<1x18x18x4xf32, #tpu.memory_space<vmem>>, vector<1x18x1x4xf32>
    %10 = vector.shape_cast %9 : vector<1x18x1x4xf32> to vector<18x1x4xf32>
    %11 = vector.shape_cast %8 : vector<18x1x4xf32> to vector<1x18x1x4xf32>
    tpu.vector_store %arg6[%c0_8, %c0_9, %c0_10, %c0_11], %11 {strides = array<i32>} : memref<1x18x18x4xf32, #tpu.memory_space<vmem>>, vector<1x18x1x4xf32>,
    %cst_12 = arith.constant 0.000000e+00 : f32
    %12 = vector.broadcast %cst_12 : f32 to vector<18x1x4xf32>
    %c0_13 = arith.constant 0 : index
    %c0_14 = arith.constant 0 : index
    %c17_15 = arith.constant 17 : index
    %c0_16 = arith.constant 0 : index
    %13 = vector.load %arg6[%c0_13, %c0_14, %c17_15, %c0_16] : memref<1x18x18x4xf32, #tpu.memory_space<vmem>>, vector<1x18x1x4xf32>
    %14 = vector.shape_cast %13 : vector<1x18x1x4xf32> to vector<18x1x4xf32>
    %15 = vector.shape_cast %12 : vector<18x1x4xf32> to vector<1x18x1x4xf32>
    tpu.vector_store %arg6[%c0_13, %c0_14, %c17_15, %c0_16], %15 {strides = array<i32>} : memref<1x18x18x4xf32, #tpu.memory_space<vmem>>, vector<1x18x1x4xf32>,
    %c0_17 = arith.constant 0 : index
    %c0_18 = arith.constant 0 : index
    %c0_19 = arith.constant 0 : index
    %c0_20 = arith.constant 0 : index
    %16 = vector.load %arg1[%c0_17, %c0_18, %c0_19, %c0_20] : memref<1x16x16x4xf32, #tpu.memory_space<vmem>>, vector<1x16x16x4xf32>
    %17 = vector.shape_cast %16 : vector<1x16x16x4xf32> to vector<16x16x4xf32>
    %c0_21 = arith.constant 0 : index
    %c1 = arith.constant 1 : index
    %c1_22 = arith.constant 1 : index
    %c0_23 = arith.constant 0 : index
    %18 = vector.load %arg6[%c0_21, %c1, %c1_22, %c0_23] : memref<1x18x18x4xf32, #tpu.memory_space<vmem>>, vector<1x16x16x4xf32>
    %19 = vector.shape_cast %18 : vector<1x16x16x4xf32> to vector<16x16x4xf32>
    %20 = vector.shape_cast %17 : vector<16x16x4xf32> to vector<1x16x16x4xf32>
    tpu.vector_store %arg6[%c0_21, %c1, %c1_22, %c0_23], %20 {strides = array<i32>} : memref<1x18x18x4xf32, #tpu.memory_space<vmem>>, vector<1x16x16x4xf32>,
    %c0_24 = arith.constant 0 : index
    %c0_25 = arith.constant 0 : index
    %21 = vector.load %arg2[%c0_24, %c0_25] : memref<36x8xf32, #tpu.memory_space<vmem>>, vector<36x8xf32>
    %c0_26 = arith.constant 0 : index
    %c0_27 = arith.constant 0 : index
    %22 = vector.load %arg3[%c0_26, %c0_27] : memref<1x8xf32, #tpu.memory_space<vmem>>, vector<1x8xf32>
    %cst_28 = arith.constant 0.000000e+00 : f32
    %23 = vector.broadcast %cst_28 : f32 to vector<1x8xf32>
    %c0_i32 = arith.constant 0 : i32
    %c16_i32 = arith.constant 16 : i32
    %24 = arith.muli %c0_i32, %c16_i32 : i32
    %25 = tpu.assume_multiple %24, 16 : i32
    %c0_29 = arith.constant 0 : index
    %26 = arith.index_cast %25 : i32 to index
    %c0_30 = arith.constant 0 : index
    %c0_31 = arith.constant 0 : index
    %27 = vector.load %arg6[%c0_29, %26, %c0_30, %c0_31] : memref<1x18x18x4xf32, #tpu.memory_space<vmem>>, vector<1x18x18x4xf32>
    %28 = vector.shape_cast %27 : vector<1x18x18x4xf32> to vector<18x18x4xf32>
    %29 = vector.extract_strided_slice %28 {offsets = [0, 0, 0], sizes = [16, 16, 4], strides = [1, 1, 1]} : vector<18x18x4xf32> to vector<16x16x4xf32>
    %30 = vector.shape_cast %29 : vector<16x16x4xf32> to vector<256x4xf32>
    %31 = vector.extract_strided_slice %28 {offsets = [0, 1, 0], sizes = [16, 16, 4], strides = [1, 1, 1]} : vector<18x18x4xf32> to vector<16x16x4xf32>
    %32 = vector.shape_cast %31 : vector<16x16x4xf32> to vector<256x4xf32>
    %33 = vector.extract_strided_slice %28 {offsets = [0, 2, 0], sizes = [16, 16, 4], strides = [1, 1, 1]} : vector<18x18x4xf32> to vector<16x16x4xf32>
    %34 = vector.shape_cast %33 : vector<16x16x4xf32> to vector<256x4xf32>
    %35 = vector.extract_strided_slice %28 {offsets = [1, 0, 0], sizes = [16, 16, 4], strides = [1, 1, 1]} : vector<18x18x4xf32> to vector<16x16x4xf32>
    %36 = vector.shape_cast %35 : vector<16x16x4xf32> to vector<256x4xf32>
    %37 = vector.extract_strided_slice %28 {offsets = [1, 1, 0], sizes = [16, 16, 4], strides = [1, 1, 1]} : vector<18x18x4xf32> to vector<16x16x4xf32>
    %38 = vector.shape_cast %37 : vector<16x16x4xf32> to vector<256x4xf32>
    %39 = vector.extract_strided_slice %28 {offsets = [1, 2, 0], sizes = [16, 16, 4], strides = [1, 1, 1]} : vector<18x18x4xf32> to vector<16x16x4xf32>
    %40 = vector.shape_cast %39 : vector<16x16x4xf32> to vector<256x4xf32>
    %41 = vector.extract_strided_slice %28 {offsets = [2, 0, 0], sizes = [16, 16, 4], strides = [1, 1, 1]} : vector<18x18x4xf32> to vector<16x16x4xf32>
    %42 = vector.shape_cast %41 : vector<16x16x4xf32> to vector<256x4xf32>
    %43 = vector.extract_strided_slice %28 {offsets = [2, 1, 0], sizes = [16, 16, 4], strides = [1, 1, 1]} : vector<18x18x4xf32> to vector<16x16x4xf32>
    %44 = vector.shape_cast %43 : vector<16x16x4xf32> to vector<256x4xf32>
    %45 = vector.extract_strided_slice %28 {offsets = [2, 2, 0], sizes = [16, 16, 4], strides = [1, 1, 1]} : vector<18x18x4xf32> to vector<16x16x4xf32>
    %46 = vector.shape_cast %45 : vector<16x16x4xf32> to vector<256x4xf32>
    %47 = tpu.concatenate %30, %32, %34, %36, %38, %40, %42, %44, %46 in 1 : vector<256x4xf32>, vector<256x4xf32>, vector<256x4xf32>, vector<256x4xf32>, vector<256x4xf32>, vector<256x4xf32>, vector<256x4xf32>, vector<256x4xf32>, vector<256x4xf32> -> vector<256x36xf32>
    %cst_32 = arith.constant dense<0.000000e+00> : vector<256x8xf32>
    %48 = tpu.matmul %47, %21, %cst_32 {dimension_numbers = #tpu.dot_dimension_numbers<[1], [0], [0], [1], [0, 0, 1, 1], [], []>} : vector<256x36xf32>, vector<36x8xf32>, vector<256x8xf32> -> vector<256x8xf32>
    %49 = vector.broadcast %22 : vector<1x8xf32> to vector<256x8xf32>
    %50 = arith.addf %48, %49 : vector<256x8xf32>
    %51 = vector.shape_cast %50 : vector<256x8xf32> to vector<16x16x8xf32>
    %c0_33 = arith.constant 0 : index
    %52 = arith.index_cast %25 : i32 to index
    %c0_34 = arith.constant 0 : index
    %c0_35 = arith.constant 0 : index
    %53 = vector.load %arg4[%c0_33, %52, %c0_34, %c0_35] : memref<1x16x16x8xf32, #tpu.memory_space<vmem>>, vector<1x16x16x8xf32>
    %54 = vector.shape_cast %53 : vector<1x16x16x8xf32> to vector<16x16x8xf32>
    %55 = vector.shape_cast %51 : vector<16x16x8xf32> to vector<1x16x16x8xf32>
    tpu.vector_store %arg4[%c0_33, %52, %c0_34, %c0_35], %55 {strides = array<i32>} : memref<1x16x16x8xf32, #tpu.memory_space<vmem>>, vector<1x16x16x8xf32>,
    %cst_36 = arith.constant dense<0.000000e+00> : vector<8xf32>
    %56 = vector.multi_reduction <add>, %50, %cst_36 [0] : vector<256x8xf32> to vector<8xf32>
    %57 = vector.shape_cast %56 : vector<8xf32> to vector<1x8xf32>
    %58 = arith.addf %23, %57 : vector<1x8xf32>
    %59 = arith.mulf %50, %50 : vector<256x8xf32>
    %cst_37 = arith.constant dense<0.000000e+00> : vector<8xf32>
    %60 = vector.multi_reduction <add>, %59, %cst_37 [0] : vector<256x8xf32> to vector<8xf32>
    %61 = vector.shape_cast %60 : vector<8xf32> to vector<1x8xf32>
    %62 = arith.addf %23, %61 : vector<1x8xf32>
    %c1_i32 = arith.constant 1 : i32
    %63 = tpu.concatenate %58, %62 in 0 : vector<1x8xf32>, vector<1x8xf32> -> vector<2x8xf32>
    %64 = vector.shape_cast %63 : vector<2x8xf32> to vector<1x2x8xf32>
    %c0_38 = arith.constant 0 : index
    %c0_39 = arith.constant 0 : index
    %c0_40 = arith.constant 0 : index
    %65 = vector.load %arg5[%c0_38, %c0_39, %c0_40] : memref<1x2x8xf32, #tpu.memory_space<vmem>>, vector<1x2x8xf32>
    tpu.vector_store %arg5[%c0_38, %c0_39, %c0_40], %64 {strides = array<i32>} : memref<1x2x8xf32, #tpu.memory_space<vmem>>, vector<1x2x8xf32>,
    return
  }
  func.func @transform_0(%arg0: i32) -> (i32, i32, i32, i32) {
    %c0_i32 = arith.constant 0 : i32
    %c0_i32_0 = arith.constant 0 : i32
    %c0_i32_1 = arith.constant 0 : i32
    %c0_i32_2 = arith.constant 0 : i32
    return %arg0, %c0_i32, %c0_i32_0, %c0_i32_1 : i32, i32, i32, i32
  }
  func.func @transform_1(%arg0: i32) -> (i32, i32) {
    %c0_i32 = arith.constant 0 : i32
    %c0_i32_0 = arith.constant 0 : i32
    %c0_i32_1 = arith.constant 0 : i32
    return %c0_i32, %c0_i32_0 : i32, i32
  }
  func.func @transform_2(%arg0: i32) -> (i32, i32) {
    %c0_i32 = arith.constant 0 : i32
    %c0_i32_0 = arith.constant 0 : i32
    %c0_i32_1 = arith.constant 0 : i32
    return %c0_i32, %c0_i32_0 : i32, i32
  }
  func.func @transform_3(%arg0: i32) -> (i32, i32, i32, i32) {
    %c0_i32 = arith.constant 0 : i32
    %c0_i32_0 = arith.constant 0 : i32
    %c0_i32_1 = arith.constant 0 : i32
    %c0_i32_2 = arith.constant 0 : i32
    return %arg0, %c0_i32, %c0_i32_0, %c0_i32_1 : i32, i32, i32, i32
  }
  func.func @transform_4(%arg0: i32) -> (i32, i32, i32) {
    %c0_i32 = arith.constant 0 : i32
    %c0_i32_0 = arith.constant 0 : i32
    %c0_i32_1 = arith.constant 0 : i32
    return %arg0, %c0_i32, %c0_i32_0 : i32, i32, i32
  }
}

</mosaic_0001>

<bundles_post_ra>
// kernel: tpu_custom_call.1
= control target key start
LH: loop header
LB: loop body
LE: loop exit
PB: predicated region body
PF: predicated region fallthrough
CT: control target
= control target key end

     0   :  { %10 = vsyncpa [#allocation4], 0  ;;  %s4495_s0 = inlined_call_operand.vmem [shape: f32[2,16,16,4], index: 0, kind: input, shape index: {}]   ;;  %s4496_s1 = inlined_call_operand.vmem [shape: f32[36,8], index: 1, kind: input, shape index: {}]   ;;  %s4497_s2 = inlined_call_operand.vmem [shape: f32[1,8], index: 2, kind: input, shape index: {}]   ;;  %s4498_s3 = inlined_call_operand.vmem [shape: f32[2,16,16,8], index: 3, kind: output, shape index: {0}]   ;;  %s4499_s4 = inlined_call_operand.hbm [shape: f32[2,2,8], index: 4, kind: output, shape index: {1}]  }
   0x1   :  { %12 = vsyncpa [#allocation4 + $0x1], 0  ;;  %s2628_s15 = smov 0   ;;  %s2630_s16 = smov 0  }
   0x2   :  { %s2632_s17 = smov 0   ;;  %s2634_s18 = smov 0  }
   0x3 LB: > { %s2649_s19 = sadd.s32 4294967295, %s2591_s18   ;;  %s2297_s20 = sadd.s32 4294967294, %s2591_s18   ;;  %s2591_s18 = sphi %s2634_s18, %s4747_s18   ;;  %s2587_s17 = sphi %s2632_s17, %s4746_s17   ;;  %s2583_s16 = sphi %s2630_s16, %s4745_s16   ;;  %s2579_s15 = sphi %s2628_s15, %s4744_s15  }
   0x4   : > { %s2653_s21 = sadd.s32 1, %s2591_s18   ;;  %s119_s22 = sadd.s32 1, %s2587_s17 }
   0x5   : > { %s116_s23 = ssub.s32 %s2591_s18, %s2653_s21  ;;  %p129_p0 = scmp.ne.s32.totalorder %s2587_s17, %s2583_s16 }
   0x6   : > { %p117_p1 = scmp.eq.s32.totalorder %s116_s23, 0  ;;  %p130_p2 = scmp.eq.s32.totalorder %s2649_s19, 1 }
   0x7   : > { %p135_p3 = scmp.ne.s32.totalorder %s2583_s16, %s2579_s15  ;;  %p136_p4 = scmp.eq.s32.totalorder %s2297_s20, 1 }
   0x8   : > { %s2664_s24 = scalar_select %p117_p1, %s2587_s17, %s119_s22  }
   0x9   : > { %p2666_p5 = por %p130_p2, %p129_p0  ;;  %p2670_p6 = por %p136_p4, %p135_p3 }
   0xa   : > { %p2300_p7 = scmp.ge.s32.totalorder %s2591_s18, 1  ;;  %p168_p8 = scmp.lt.s32.totalorder %s2591_s18, 3 }
   0xc   : > { %p169_p9 = pnand %p2300_p7, %p168_p8 }
   0xe   : > { %172 = sbr.rel (%p169_p9) target bundleno = 906 (0x38a), region = 32 }
  0x13   : > { %vm209_vm0 = vcmask 31744   ;;  %vm218_vm1 = vcmask 24576   ;;  %p199_p10 = scmp.lt.s32.totalorder %s2649_s19, 1  ;;  %v2593_v0 = vmov 0.0   ;;  %vm212_vm2 = vcmask 25600   ;;  %s2594_s6 = smov 4  }
  0x14   : > { %210 = vst.msk [vmem:[#allocation2] sm:$0xff] %vm209_vm0, %v2593_v0  ;;  %211 = vst.msk [vmem:[#allocation2 + $0x8] sm:$0xff] %vm209_vm0, %v2593_v0  ;;  %vm430_vm3 = vcmask 1046528   ;;  %vm511_vm4 = vcmask 1045504   ;;  %s2595_s7 = smov 8   ;;  %s2596_s8 = smov 12  }
  0x15   : > { %215 = vst.msk [vmem:[#allocation2 + $0x198] sm:$0xff] %vm209_vm0, %v2593_v0  ;;  %216 = vst.msk [vmem:[#allocation2 + $0x1a0] sm:$0xff] %vm209_vm0, %v2593_v0  ;;  %s2718_s27 = scalar_select %p199_p10, %s2649_s19, 1  ;;  %vm1752_vm5 = vcmask 1043456   ;;  %vm1418_vm6 = vcmask 64512   ;;  %vm1451_vm7 = vcmask 97280  }
  0x16   : > { %220 = vst.msk [vmem:[#allocation2 + $0x18] sm:$0x1] %vm218_vm1, %v2593_v0  ;;  %221 = vst.msk [vmem:[#allocation2 + $0x30] sm:$0x1] %vm218_vm1, %v2593_v0  ;;  %s2597_s9 = smov 16   ;;  %s2598_s12 = smov 20  }
  0x17   : > { %222 = vst.msk [vmem:[#allocation2 + $0x48] sm:$0x1] %vm218_vm1, %v2593_v0  ;;  %223 = vst.msk [vmem:[#allocation2 + $0x60] sm:$0x1] %vm218_vm1, %v2593_v0  ;;  %s2344_s28 = sshll.u32 %s2718_s27, 8  ;;  %s2599_s23 = smov 24  }
  0x18   : > { %224 = vst.msk [vmem:[#allocation2 + $0x78] sm:$0x1] %vm218_vm1, %v2593_v0  ;;  %225 = vst.msk [vmem:[#allocation2 + $0x90] sm:$0x1] %vm218_vm1, %v2593_v0  ;;  %s2728_s5 = scalar_lea.vmem %s4495_s0, %s2344_s28  ;;  %s2600_s10 = smov 28   ;;  %vm1484_vm8 = vcmask 130048  }
  0x19   : > { %226 = vst.msk [vmem:[#allocation2 + $0xa8] sm:$0x1] %vm218_vm1, %v2593_v0  ;;  %227 = vst.msk [vmem:[#allocation2 + $0xc0] sm:$0x1] %vm218_vm1, %v2593_v0  ;;  %v255_v1 = vld [vmem:[%s2728_s5] sm:$0xff]  ;;  %v256_v2 = vld [vmem:[%s2728_s5 + $0x8] sm:$0xff]  ;;  %s4128_s13 = scalar_lea.vmem %s4498_s3, %s2344_s28 }
  0x1a   : > { %228 = vst.msk [vmem:[#allocation2 + $0xd8] sm:$0x1] %vm218_vm1, %v2593_v0  ;;  %229 = vst.msk [vmem:[#allocation2 + $0xf0] sm:$0x1] %vm218_vm1, %v2593_v0  ;;  %v257_v3 = vld [vmem:[%s2728_s5 + $0x10] sm:$0xff]  ;;  %v258_v4 = vld [vmem:[%s2728_s5 + $0x18] sm:$0xff] }
  0x1b   : > { %230 = vst.msk [vmem:[#allocation2 + $0x108] sm:$0x1] %vm218_vm1, %v2593_v0  ;;  %231 = vst.msk [vmem:[#allocation2 + $0x120] sm:$0x1] %vm218_vm1, %v2593_v0  ;;  %v259_v5 = vld [vmem:[%s2728_s5 + $0x20] sm:$0xff]  ;;  %v260_v6 = vld [vmem:[%s2728_s5 + $0x28] sm:$0xff] }
  0x1c   : > { %232 = vst.msk [vmem:[#allocation2 + $0x138] sm:$0x1] %vm218_vm1, %v2593_v0  ;;  %233 = vst.msk [vmem:[#allocation2 + $0x150] sm:$0x1] %vm218_vm1, %v2593_v0  ;;  %v2739_v7 = vld [vmem:[#allocation2 + $0x8] sm:$0xff]  ;;  %v261_v8 = vld [vmem:[%s2728_s5 + $0x30] sm:$0xff] }
  0x1d   : > { %234 = vst.msk [vmem:[#allocation2 + $0x168] sm:$0x1] %vm218_vm1, %v2593_v0  ;;  %235 = vst.msk [vmem:[#allocation2 + $0x180] sm:$0x1] %vm218_vm1, %v2593_v0  ;;  %v262_v9 = vld [vmem:[%s2728_s5 + $0x38] sm:$0xff]  ;;  %v432_v11 = vrot.slane %v2739_v7, 1 }
  0x1e   : > { %238 = vst.msk [vmem:[#allocation2 + $0x29] sm:$0x1] %vm218_vm1, %v2593_v0  ;;  %239 = vst.msk [vmem:[#allocation2 + $0x41] sm:$0x1] %vm218_vm1, %v2593_v0  ;;  %v263_v12 = vld [vmem:[%s2728_s5 + $0x40] sm:$0xff]  ;;  %v264_v13 = vld [vmem:[%s2728_s5 + $0x48] sm:$0xff] }
  0x1f   : > { %240 = vst.msk [vmem:[#allocation2 + $0x59] sm:$0x1] %vm218_vm1, %v2593_v0  ;;  %241 = vst.msk [vmem:[#allocation2 + $0x71] sm:$0x1] %vm218_vm1, %v2593_v0  ;;  %v265_v16 = vld [vmem:[%s2728_s5 + $0x50] sm:$0xff]  ;;  %v266_v17 = vld [vmem:[%s2728_s5 + $0x58] sm:$0xff] }
  0x20   : > { %242 = vst.msk [vmem:[#allocation2 + $0x89] sm:$0x1] %vm218_vm1, %v2593_v0  ;;  %243 = vst.msk [vmem:[#allocation2 + $0xa1] sm:$0x1] %vm218_vm1, %v2593_v0  ;;  %v267_v19 = vld [vmem:[%s2728_s5 + $0x60] sm:$0xff]  ;;  %v268_v20 = vld [vmem:[%s2728_s5 + $0x68] sm:$0xff] }
  0x21   : > { %244 = vst.msk [vmem:[#allocation2 + $0xb9] sm:$0x1] %vm218_vm1, %v2593_v0  ;;  %245 = vst.msk [vmem:[#allocation2 + $0xd1] sm:$0x1] %vm218_vm1, %v2593_v0  ;;  %v269_v21 = vld [vmem:[%s2728_s5 + $0x70] sm:$0xff]  ;;  %v270_v23 = vld [vmem:[%s2728_s5 + $0x78] sm:$0xff] }
  0x22   : > { %246 = vst.msk [vmem:[#allocation2 + $0xe9] sm:$0x1] %vm218_vm1, %v2593_v0  ;;  %247 = vst.msk [vmem:[#allocation2 + $0x101] sm:$0x1] %vm218_vm1, %v2593_v0  ;;  %v271_v24 = vld [vmem:[%s2728_s5 + $0x80] sm:$0xff]  ;;  %v272_v25 = vld [vmem:[%s2728_s5 + $0x88] sm:$0xff] }
  0x23   : > { %248 = vst.msk [vmem:[#allocation2 + $0x119] sm:$0x1] %vm218_vm1, %v2593_v0  ;;  %249 = vst.msk [vmem:[#allocation2 + $0x131] sm:$0x1] %vm218_vm1, %v2593_v0  ;;  %v273_v26 = vld [vmem:[%s2728_s5 + $0x90] sm:$0xff]  ;;  %v274_v27 = vld [vmem:[%s2728_s5 + $0x98] sm:$0xff] }
  0x24   : > { %250 = vst.msk [vmem:[#allocation2 + $0x149] sm:$0x1] %vm218_vm1, %v2593_v0  ;;  %251 = vst.msk [vmem:[#allocation2 + $0x161] sm:$0x1] %vm218_vm1, %v2593_v0  ;;  %v275_v28 = vld [vmem:[%s2728_s5 + $0xa0] sm:$0xff]  ;;  %v276_v60 = vld [vmem:[%s2728_s5 + $0xa8] sm:$0xff] }
  0x25   : > { %252 = vst.msk [vmem:[#allocation2 + $0x179] sm:$0x1] %vm218_vm1, %v2593_v0  ;;  %253 = vst.msk [vmem:[#allocation2 + $0x191] sm:$0x1] %vm218_vm1, %v2593_v0  ;;  %s2601_s11 = smov 32   ;;  %vm1517_vm9 = vcmask 162816  }
  0x26   : > { %219 = vst.msk [vmem:[#allocation2] sm:$0x1] %vm218_vm1, %v2593_v0  ;;  %236 = vst.msk [vmem:[#allocation2 + $0x198] sm:$0x1] %vm218_vm1, %v2593_v0  ;;  %vm1550_vm10 = vcmask 195584   ;;  %vm1583_vm11 = vcmask 228352  }
  0x27   : > { %213 = vst.msk [vmem:[#allocation2 + $0x10] sm:$0x3] %vm212_vm2, %v2593_v0  ;;  %217 = vst.msk [vmem:[#allocation2 + $0x1a8] sm:$0x3] %vm212_vm2, %v2593_v0  ;;  %vm1616_vm12 = vcmask 261120   ;;  %vm1655_vm13 = vcmask 293888  }
  0x28   : > { %237 = vst.msk [vmem:[#allocation2 + $0x11] sm:$0x1] %vm218_vm1, %v2593_v0  ;;  %254 = vst.msk [vmem:[#allocation2 + $0x1a9] sm:$0x1] %vm218_vm1, %v2593_v0  ;;  %s196_s27 = sand.u32 1, %s2583_s16   ;;  %s2341_s14 = sshll.u32 %s2649_s19, 5 }
  0x29   : > { %288 = vst.msk [vmem:[#allocation2 + $0x19] sm:$0xff] %vm209_vm0, %v255_v1  ;;  %289 = vst.msk [vmem:[#allocation2 + $0x21] sm:$0xff] %vm209_vm0, %v256_v2  ;;  %v277_v2 = vld [vmem:[%s2728_s5 + $0xb0] sm:$0xff]  ;;  %s2301_s28 = sshll.u32 %s196_s27, 1  ;;  %vm2187_vm14 = vcmask 1040384   ;;  %vm2189_vm15 = vcmask 58368   ;;  %s4460_s30 = scalar_lea.hbm %s4499_s4, %s2341_s14 }
  0x2a   : > { %290 = vst.msk [vmem:[#allocation2 + $0x31] sm:$0xff] %vm209_vm0, %v257_v3  ;;  %291 = vst.msk [vmem:[#allocation2 + $0x39] sm:$0xff] %vm209_vm0, %v258_v4  ;;  %v278_v3 = vld [vmem:[%s2728_s5 + $0xb8] sm:$0xff]  ;;  %v279_v4 = vld [vmem:[%s2728_s5 + $0xc0] sm:$0xff]  ;;  %s198_s20 = scalar_lea.vmem [#allocation3], %s2301_s28  ;;  %s2602_s19 = smov [#allocation3]  }
  0x2b   : > { %292 = vst.msk [vmem:[#allocation2 + $0x49] sm:$0xff] %vm209_vm0, %v259_v5  ;;  %293 = vst.msk [vmem:[#allocation2 + $0x51] sm:$0xff] %vm209_vm0, %v260_v6  ;;  %s2213_s22 = sshll.u32 %s198_s20, 4  ;;  %s2214_s22 = int_to_ptr.vmem [resolvable:$true] %s2213_s22 }
  0x2c   : > { %294 = vst.msk [vmem:[#allocation2 + $0x61] sm:$0xff] %vm209_vm0, %v261_v8  ;;  %295 = vst.msk [vmem:[#allocation2 + $0x69] sm:$0xff] %vm209_vm0, %v262_v9  ;;  %v280_v8 = vld [vmem:[%s2728_s5 + $0xc8] sm:$0xff]  ;;  %v281_v9 = vld [vmem:[%s2728_s5 + $0xd0] sm:$0xff] }
  0x2d   : > { %v2746_v10 = vld [vmem:[#allocation2] sm:$0xff]  ;;  %296 = vst.msk [vmem:[#allocation2 + $0x79] sm:$0xff] %vm209_vm0, %v263_v12  ;;  %297 = vst.msk [vmem:[#allocation2 + $0x81] sm:$0xff] %vm209_vm0, %v264_v13 }
  0x2e   : > { %v431_v14 = vrot.slane %v2746_v10, 1  ;;  %298 = vst.msk [vmem:[#allocation2 + $0x91] sm:$0xff] %vm209_vm0, %v265_v16  ;;  %299 = vst.msk [vmem:[#allocation2 + $0x99] sm:$0xff] %vm209_vm0, %v266_v17  ;;  %v283_v13 = vld [vmem:[%s2728_s5 + $0xe0] sm:$0xff] }
  0x2f   : > { %v2754_v15 = vld [vmem:[#allocation2 + $0x10] sm:$0x3]  ;;  %300 = vst.msk [vmem:[#allocation2 + $0xa9] sm:$0xff] %vm209_vm0, %v267_v19  ;;  %301 = vst.msk [vmem:[#allocation2 + $0xb1] sm:$0xff] %vm209_vm0, %v268_v20 }
  0x30   : > { %v434_v18 = vrot.slane %v2754_v15, 1  ;;  %v433_v22 = vsel %vm430_vm3, %v431_v14, %v432_v11  ;;  %302 = vst.msk [vmem:[#allocation2 + $0xc1] sm:$0xff] %vm209_vm0, %v269_v21  ;;  %303 = vst.msk [vmem:[#allocation2 + $0xc9] sm:$0xff] %vm209_vm0, %v270_v23  ;;  %v2781_v30 = vld [vmem:[#allocation2 + $0x18] sm:$0xff]  ;;  %v2783_v31 = vld [vmem:[#allocation2 + $0x20] sm:$0xff] }
  0x31   : > { %618 = vrot.lane.b32.xlu0 %v433_v22, %s2594_s6  ;;  %304 = vst.msk [vmem:[#allocation2 + $0xd9] sm:$0xff] %vm209_vm0, %v271_v24  ;;  %305 = vst.msk [vmem:[#allocation2 + $0xe1] sm:$0xff] %vm209_vm0, %v272_v25  ;;  %v2785_v32 = vld [vmem:[#allocation2 + $0x30] sm:$0xff]  ;;  %v436_v33 = vrot.slane %v2781_v30, 1  ;;  %v437_v34 = vrot.slane %v2783_v31, 1  ;;  %v2792_v35 = vld [vmem:[#allocation2 + $0x38] sm:$0xff] }
  0x32   : > { %v435_v29 = vsel %vm430_vm3, %v432_v11, %v434_v18  ;;  %306 = vst.msk [vmem:[#allocation2 + $0xf1] sm:$0xff] %vm209_vm0, %v273_v26  ;;  %307 = vst.msk [vmem:[#allocation2 + $0xf9] sm:$0xff] %vm209_vm0, %v274_v27  ;;  %v441_v36 = vrot.slane %v2785_v32, 1  ;;  %v2795_v37 = vld [vmem:[#allocation2 + $0x28] sm:$0x3]  ;;  %v442_v38 = vrot.slane %v2792_v35, 1 }
  0x33   : > { %308 = vst.msk [vmem:[#allocation2 + $0x109] sm:$0xff] %vm209_vm0, %v275_v28  ;;  %v439_v39 = vrot.slane %v2795_v37, 1  ;;  %v2799_v40 = vld [vmem:[#allocation2 + $0x48] sm:$0xff]  ;;  %v2801_v41 = vld [vmem:[#allocation2 + $0x50] sm:$0xff]  ;;  %v2803_v42 = vld [vmem:[#allocation2 + $0x40] sm:$0x3]  ;;  %v2807_v43 = vsel %vm430_vm3, %v436_v33, %v437_v34 }
  0x34   : > { %622 = vrot.lane.b32.xlu1 %v2807_v43, %s2594_s6  ;;  %v2812_v44 = vsel %vm430_vm3, %v441_v36, %v442_v38  ;;  %v446_v45 = vrot.slane %v2799_v40, 1  ;;  %v447_v46 = vrot.slane %v2801_v41, 1  ;;  %v444_v48 = vrot.slane %v2803_v42, 1  ;;  %v2820_v49 = vld [vmem:[#allocation2 + $0x60] sm:$0xff]  ;;  %v2822_v50 = vld [vmem:[#allocation2 + $0x68] sm:$0xff]  ;;  %v2839_v57 = vld [vmem:[#allocation2 + $0x78] sm:$0xff] }
  0x35   : > { %620 = vrot.lane.b32.xlu0 %v435_v29, %s2594_s6  ;;  %v2817_v47 = vsel %vm430_vm3, %v437_v34, %v439_v39  ;;  %v2824_v51 = vld [vmem:[#allocation2 + $0x58] sm:$0x3]  ;;  %v451_v53 = vrot.slane %v2820_v49, 1  ;;  %v452_v54 = vrot.slane %v2822_v50, 1  ;;  %v2841_v58 = vld [vmem:[#allocation2 + $0x80] sm:$0xff]  ;;  %v2848_v61 = vld [vmem:[#allocation2 + $0x90] sm:$0xff] }
  0x36   : > { %v2831_v52 = vsel %vm430_vm3, %v446_v45, %v447_v46  ;;  %v2836_v55 = vsel %vm430_vm3, %v442_v38, %v444_v48  ;;  %v449_v56 = vrot.slane %v2824_v51, 1  ;;  %v2843_v59 = vld [vmem:[#allocation2 + $0x70] sm:$0x3]  ;;  %v2850_v62 = vld [vmem:[#allocation2 + $0x98] sm:$0xff]  ;;  %309 = vst.msk [vmem:[#allocation2 + $0x111] sm:$0xff] %vm209_vm0, %v276_v60  ;;  %v456_v0 = vrot.slane %v2839_v57, 1 }
  0x37   : > { %v2856_v63 = vsel %vm430_vm3, %v451_v53, %v452_v54  ;;  %v457_v1 = vrot.slane %v2841_v58, 1  ;;  %v454_v6 = vrot.slane %v2843_v59, 1  ;;  %310 = vst.msk [vmem:[#allocation2 + $0x121] sm:$0xff] %vm209_vm0, %v277_v2  ;;  %311 = vst.msk [vmem:[#allocation2 + $0x129] sm:$0xff] %vm209_vm0, %v278_v3  ;;  %v282_v11 = vld [vmem:[%s2728_s5 + $0xd8] sm:$0xff]  ;;  %v284_v14 = vld [vmem:[%s2728_s5 + $0xe8] sm:$0xff] }
  0x38   : > { %624 = vrot.lane.b32.xlu1 %v2817_v47, %s2594_s6  ;;  %4574 = vst [vmem:[#allocation6_spill] sm:$0xff] %v2856_v63  ;;  %v2864_v5 = vsel %vm430_vm3, %v447_v46, %v449_v56  ;;  %312 = vst.msk [vmem:[#allocation2 + $0x139] sm:$0xff] %vm209_vm0, %v279_v4  ;;  %v2873_v12 = vld [vmem:[#allocation2 + $0x88] sm:$0x3]  ;;  %v461_v17 = vrot.slane %v2848_v61, 1  ;;  %v462_v18 = vrot.slane %v2850_v62, 1 }
  0x39   : > { %626 = vrot.lane.b32.xlu0 %v2812_v44, %s2594_s6  ;;  %4575 = vst [vmem:[#allocation7_spill] sm:$0xff] %v2864_v5  ;;  %313 = vst.msk [vmem:[#allocation2 + $0x141] sm:$0xff] %vm209_vm0, %v280_v8  ;;  %v2887_v16 = vsel %vm430_vm3, %v456_v0, %v457_v1  ;;  %v2892_v19 = vsel %vm430_vm3, %v452_v54, %v454_v6  ;;  %v459_v20 = vrot.slane %v2873_v12, 1  ;;  %v2895_v21 = vld [vmem:[#allocation2 + $0xa8] sm:$0xff]  ;;  %v2897_v22 = vld [vmem:[#allocation2 + $0xb0] sm:$0xff] }
  0x3a   : > { %314 = vst.msk [vmem:[#allocation2 + $0x151] sm:$0xff] %vm209_vm0, %v281_v9  ;;  %315 = vst.msk [vmem:[#allocation2 + $0x159] sm:$0xff] %vm209_vm0, %v282_v11  ;;  %v2899_v23 = vld [vmem:[#allocation2 + $0xa0] sm:$0x3]  ;;  %v2906_v24 = vsel %vm430_vm3, %v461_v17, %v462_v18  ;;  %v466_v25 = vrot.slane %v2895_v21, 1  ;;  %v467_v26 = vrot.slane %v2897_v22, 1 }
  0x3b   : > { %316 = vst.msk [vmem:[#allocation2 + $0x169] sm:$0xff] %vm209_vm0, %v283_v13  ;;  %317 = vst.msk [vmem:[#allocation2 + $0x171] sm:$0xff] %vm209_vm0, %v284_v14  ;;  %v2911_v27 = vsel %vm430_vm3, %v457_v1, %v459_v20  ;;  %v464_v28 = vrot.slane %v2899_v23, 1  ;;  %v2914_v29 = vld [vmem:[#allocation2 + $0xc0] sm:$0xff]  ;;  %v2916_v33 = vld [vmem:[#allocation2 + $0xc8] sm:$0xff] }
  0x3c   : > { %628 = vrot.lane.b32.xlu1 %v2836_v55, %s2594_s6  ;;  %4576 = vst [vmem:[#allocation8_spill] sm:$0xff] %v2887_v16  ;;  %4577 = vst [vmem:[#allocation9_spill] sm:$0xff] %v2892_v19  ;;  %v2918_v34 = vld [vmem:[#allocation2 + $0xb8] sm:$0x3]  ;;  %v2925_v36 = vsel %vm430_vm3, %v466_v25, %v467_v26  ;;  %v471_v38 = vrot.slane %v2914_v29, 1  ;;  %v472_v39 = vrot.slane %v2916_v33, 1 }
  0x3d   : > { %630 = vrot.lane.b32.xlu0 %v2831_v52, %s2594_s6  ;;  %4578 = vst [vmem:[#allocation10_spill] sm:$0xff] %v2906_v24  ;;  %4579 = vst [vmem:[#allocation11_spill] sm:$0xff] %v2911_v27  ;;  %v2930_v45 = vsel %vm430_vm3, %v462_v18, %v464_v28  ;;  %v469_v46 = vrot.slane %v2918_v34, 1  ;;  %v2933_v48 = vld [vmem:[#allocation2 + $0xd8] sm:$0xff]  ;;  %v2935_v53 = vld [vmem:[#allocation2 + $0xe0] sm:$0xff] }
  0x3e   : > { %4580 = vst [vmem:[#allocation12_spill] sm:$0xff] %v2925_v36  ;;  %4581 = vst [vmem:[#allocation13_spill] sm:$0xff] %v2930_v45  ;;  %v2937_v54 = vld [vmem:[#allocation2 + $0xd0] sm:$0x3]  ;;  %v2944_v56 = vsel %vm430_vm3, %v471_v38, %v472_v39  ;;  %v476_v60 = vrot.slane %v2933_v48, 1  ;;  %v477_v0 = vrot.slane %v2935_v53, 1 }
  0x3f   : > { %4582 = vst [vmem:[#allocation14_spill] sm:$0xff] %v2944_v56  ;;  %v2949_v1 = vsel %vm430_vm3, %v467_v26, %v469_v46  ;;  %v474_v2 = vrot.slane %v2937_v54, 1  ;;  %v2952_v3 = vld [vmem:[#allocation2 + $0xf0] sm:$0xff]  ;;  %v2954_v4 = vld [vmem:[#allocation2 + $0xf8] sm:$0xff]  ;;  %v2956_v6 = vld [vmem:[#allocation2 + $0xe8] sm:$0x3] }
  0x40   : > { %632 = vrot.lane.b32.xlu1 %v2864_v5, %s2594_s6  ;;  %4583 = vst [vmem:[#allocation15_spill] sm:$0xff] %v2949_v1  ;;  %v2963_v8 = vsel %vm430_vm3, %v476_v60, %v477_v0  ;;  %v481_v9 = vrot.slane %v2952_v3, 1  ;;  %v482_v11 = vrot.slane %v2954_v4, 1  ;;  %v479_v14 = vrot.slane %v2956_v6, 1  ;;  %v2971_v17 = vld [vmem:[#allocation2 + $0x108] sm:$0xff]  ;;  %v2973_v18 = vld [vmem:[#allocation2 + $0x110] sm:$0xff] }
  0x41   : > { %634 = vrot.lane.b32.xlu0 %v2856_v63, %s2594_s6  ;;  %4584 = vst [vmem:[#allocation16_spill] sm:$0xff] %v2963_v8  ;;  %v2968_v13 = vsel %vm430_vm3, %v472_v39, %v474_v2  ;;  %v2975_v20 = vld [vmem:[#allocation2 + $0x100] sm:$0x3]  ;;  %v486_v26 = vrot.slane %v2971_v17, 1  ;;  %v487_v28 = vrot.slane %v2973_v18, 1  ;;  %v2992_v60 = vld [vmem:[#allocation2 + $0x128] sm:$0xff] }
  0x42   : > { %4585 = vst [vmem:[#allocation17_spill] sm:$0xff] %v2968_v13  ;;  %v2982_v25 = vsel %vm430_vm3, %v481_v9, %v482_v11  ;;  %v2987_v38 = vsel %vm430_vm3, %v477_v0, %v479_v14  ;;  %v484_v39 = vrot.slane %v2975_v20, 1  ;;  %v2990_v46 = vld [vmem:[#allocation2 + $0x120] sm:$0xff]  ;;  %v2994_v2 = vld [vmem:[#allocation2 + $0x118] sm:$0x3]  ;;  %v492_v14 = vrot.slane %v2992_v60, 1 }
  0x43   : > { %4586 = vst [vmem:[#allocation18_spill] sm:$0xff] %v2982_v25  ;;  %4587 = vst [vmem:[#allocation19_spill] sm:$0xff] %v2987_v38  ;;  %v3001_v9 = vsel %vm430_vm3, %v486_v26, %v487_v28  ;;  %v491_v0 = vrot.slane %v2990_v46, 1  ;;  %v3066_v5 = vld [vmem:[#allocation2 + $0x178] sm:$0x3] }
  0x44   : > { %636 = vrot.lane.b32.xlu1 %v2892_v19, %s2594_s6  ;;  %4588 = vst [vmem:[#allocation20_spill] sm:$0xff] %v3001_v9  ;;  %v3049_v19 = vld [vmem:[#allocation2 + $0x170] sm:$0xff] }
  0x45   : > { %638 = vrot.lane.b32.xlu0 %v2887_v16, %s2594_s6  ;;  %v3020_v26 = vsel %vm430_vm3, %v491_v0, %v492_v14  ;;  %v3047_v16 = vld [vmem:[#allocation2 + $0x168] sm:$0xff] }
  0x46   : > { %4590 = vst [vmem:[#allocation22_spill] sm:$0xff] %v3020_v26 }
  0x48   : > { %640 = vrot.lane.b32.xlu1 %v2911_v27, %s2594_s6 }
  0x49   : > { %642 = vrot.lane.b32.xlu0 %v2906_v24, %s2594_s6  ;;  %v3030_v24 = vld [vmem:[#allocation2 + $0x158] sm:$0xff] }
  0x4c   : > { %644 = vrot.lane.b32.xlu1 %v2930_v45, %s2594_s6  ;;  %v3028_v45 = vld [vmem:[#allocation2 + $0x150] sm:$0xff] }
  0x4d   : > { %646 = vrot.lane.b32.xlu0 %v2925_v36, %s2594_s6 }
  0x50   : > { %648 = vrot.lane.b32.xlu1 %v2949_v1, %s2594_s6  ;;  %v3011_v1 = vld [vmem:[#allocation2 + $0x140] sm:$0xff] }
  0x51   : > { %650 = vrot.lane.b32.xlu0 %v2944_v56, %s2594_s6  ;;  %v3009_v56 = vld [vmem:[#allocation2 + $0x138] sm:$0xff] }
  0x54   : > { %652 = vrot.lane.b32.xlu1 %v2968_v13, %s2594_s6  ;;  %v489_v13 = vrot.slane %v2994_v2, 1 }
  0x55   : > { %654 = vrot.lane.b32.xlu0 %v2963_v8, %s2594_s6  ;;  %v3006_v8 = vsel %vm430_vm3, %v482_v11, %v484_v39  ;;  %v496_v11 = vrot.slane %v3009_v56, 1  ;;  %v497_v39 = vrot.slane %v3011_v1, 1 }
  0x56   : > { %4589 = vst [vmem:[#allocation21_spill] sm:$0xff] %v3006_v8 }
  0x57   : > { %v3039_v0 = vsel %vm430_vm3, %v496_v11, %v497_v39 }
  0x58   : > { %656 = vrot.lane.b32.xlu1 %v2987_v38, %s2594_s6  ;;  %v3025_v38 = vsel %vm430_vm3, %v487_v28, %v489_v13  ;;  %4592 = vst [vmem:[#allocation24_spill] sm:$0xff] %v3039_v0  ;;  %v501_v13 = vrot.slane %v3028_v45, 1  ;;  %v502_v28 = vrot.slane %v3030_v24, 1 }
  0x59   : > { %658 = vrot.lane.b32.xlu0 %v2982_v25, %s2594_s6  ;;  %v3013_v25 = vld [vmem:[#allocation2 + $0x130] sm:$0x3]  ;;  %4591 = vst [vmem:[#allocation23_spill] sm:$0xff] %v3025_v38 }
  0x5a   : > { %v494_v36 = vrot.slane %v3013_v25, 1  ;;  %v3058_v11 = vsel %vm430_vm3, %v501_v13, %v502_v28 }
  0x5b   : > { %4594 = vst [vmem:[#allocation26_spill] sm:$0xff] %v3058_v11 }
  0x5c   : > { %660 = vrot.lane.b32.xlu1 %v3006_v8, %s2594_s6  ;;  %v3044_v8 = vsel %vm430_vm3, %v492_v14, %v494_v36  ;;  %v506_v36 = vrot.slane %v3047_v16, 1  ;;  %v507_v14 = vrot.slane %v3049_v19, 1 }
  0x5d   : > { %662 = vrot.lane.b32.xlu0 %v3001_v9, %s2594_s6  ;;  %v3032_v9 = vld [vmem:[#allocation2 + $0x148] sm:$0x3]  ;;  %4593 = vst [vmem:[#allocation25_spill] sm:$0xff] %v3044_v8 }
  0x5e   : > { %v499_v27 = vrot.slane %v3032_v9, 1  ;;  %v3073_v13 = vsel %vm430_vm3, %v506_v36, %v507_v14  ;;  %v517_v36 = vrot.slane %v2781_v30, 2 }
  0x5f   : > { %4596 = vst [vmem:[#allocation28_spill] sm:$0xff] %v3073_v13 }
  0x60   : > { %664 = vrot.lane.b32.xlu1 %v3025_v38, %s2594_s6  ;;  %v3063_v38 = vsel %vm430_vm3, %v497_v39, %v499_v27  ;;  %v509_v39 = vrot.slane %v3066_v5, 1 }
  0x61   : > { %666 = vrot.lane.b32.xlu0 %v3020_v26, %s2594_s6  ;;  %v3051_v26 = vld [vmem:[#allocation2 + $0x160] sm:$0x3]  ;;  %4595 = vst [vmem:[#allocation27_spill] sm:$0xff] %v3063_v38 }
  0x62   : > { %v504_v63 = vrot.slane %v3051_v26, 1 }
  0x64   : > { %668 = vrot.lane.b32.xlu1 %v3044_v8, %s2594_s6  ;;  %v513_v8 = vrot.slane %v2739_v7, 2  ;;  %v3078_v27 = vsel %vm430_vm3, %v502_v28, %v504_v63  ;;  %v3089_v7 = vsel %vm430_vm3, %v507_v14, %v509_v39  ;;  %v515_v63 = vrot.slane %v2754_v15, 2 }
  0x65   : > { %670 = vrot.lane.b32.xlu0 %v3039_v0, %s2594_s6  ;;  %v512_v0 = vrot.slane %v2746_v10, 2  ;;  %4597 = vst [vmem:[#allocation29_spill] sm:$0xff] %v3078_v27  ;;  %v518_v10 = vrot.slane %v2783_v31, 2  ;;  %4598 = vst [vmem:[#allocation30_spill] sm:$0xff] %v3089_v7  ;;  %v520_v14 = vrot.slane %v2795_v37, 2  ;;  %v528_v39 = vrot.slane %v2801_v41, 2 }
  0x67   : > { %v3096_v28 = vsel %vm511_vm4, %v517_v36, %v518_v10  ;;  %v3111_v36 = vsel %vm511_vm4, %v518_v10, %v520_v14  ;;  %v530_v10 = vrot.slane %v2824_v51, 2  ;;  %v538_v14 = vrot.slane %v2841_v58, 2 }
  0x68   : > { %672 = vrot.lane.b32.xlu1 %v3063_v38, %s2594_s6 }
  0x69   : > { %674 = vrot.lane.b32.xlu0 %v3058_v11, %s2594_s6  ;;  %v514_v11 = vsel %vm511_vm4, %v512_v0, %v513_v8  ;;  %v522_v0 = vrot.slane %v2785_v32, 2 }
  0x6c   : > { %676 = vrot.lane.b32.xlu1 %v3078_v27, %s2594_s6  ;;  %v516_v27 = vsel %vm511_vm4, %v513_v8, %v515_v63  ;;  %v532_v8 = vrot.slane %v2820_v49, 2 }
  0x6d   : > { %678 = vrot.lane.b32.xlu0 %v3073_v13, %s2594_s6  ;;  %v523_v13 = vrot.slane %v2792_v35, 2 }
  0x6f   : > { %v3106_v15 = vsel %vm511_vm4, %v522_v0, %v523_v13  ;;  %v537_v0 = vrot.slane %v2839_v57, 2 }
  0x70   : > { %680 = vrot.lane.b32.xlu1 %v3089_v7, %s2594_s6  ;;  %v525_v7 = vrot.slane %v2803_v42, 2  ;;  %s2197_s6 = scalar_lea.sflag [#allocation4], %s196_s27 }
  0x71   : > { %714 = vrot.lane.b32.xlu0 %v514_v11, %s2595_s7  ;;  %v527_v11 = vrot.slane %v2799_v40, 2  ;;  %v3145_v51 = vsel %vm511_vm4, %v537_v0, %v538_v14  ;;  %v548_v0 = vrot.slane %v2897_v22, 2 }
  0x72   : > { %v3124_v63 = vsel %vm511_vm4, %v523_v13, %v525_v7  ;;  %v535_v13 = vrot.slane %v2843_v59, 2  ;;  %4600 = vst [vmem:[#allocation32_spill] sm:$0xff] %v3145_v51  ;;  %v542_v7 = vrot.slane %v2848_v61, 2 }
  0x73   : > { %v3119_v37 = vsel %vm511_vm4, %v527_v11, %v528_v39  ;;  %v3137_v11 = vsel %vm511_vm4, %v528_v39, %v530_v10  ;;  %v540_v39 = vrot.slane %v2873_v12, 2  ;;  %v547_v10 = vrot.slane %v2895_v21, 2 }
  0x74   : > { %716 = vrot.lane.b32.xlu1 %v516_v27, %s2595_s7  ;;  %v533_v27 = vrot.slane %v2822_v50, 2 }
  0x75   : > { %718 = vrot.lane.b32.xlu0 %v3096_v28, %s2595_s7  ;;  %v3171_v12 = vsel %vm511_vm4, %v547_v10, %v548_v0  ;;  %v558_v10 = vrot.slane %v2935_v53, 2 }
  0x76   : > { %v3132_v42 = vsel %vm511_vm4, %v532_v8, %v533_v27  ;;  %v543_v8 = vrot.slane %v2850_v62, 2  ;;  %v3150_v38 = vsel %vm511_vm4, %v533_v27, %v535_v13  ;;  %v545_v27 = vrot.slane %v2899_v23, 2  ;;  %4602 = vst [vmem:[#allocation34_spill] sm:$0xff] %v3171_v12 }
  0x77   : > { %4599 = vst [vmem:[#allocation31_spill] sm:$0xff] %v3132_v42  ;;  %v552_v13 = vrot.slane %v2914_v29, 2 }
  0x78   : > { %720 = vrot.lane.b32.xlu1 %v3111_v36, %s2595_s7  ;;  %v3158_v59 = vsel %vm511_vm4, %v542_v7, %v543_v8  ;;  %v553_v7 = vrot.slane %v2916_v33, 2 }
  0x79   : > { %722 = vrot.lane.b32.xlu0 %v3106_v15, %s2595_s7  ;;  %4601 = vst [vmem:[#allocation33_spill] sm:$0xff] %v3158_v59 }
  0x7a   : > { %v3184_v23 = vsel %vm511_vm4, %v552_v13, %v553_v7  ;;  %v563_v13 = vrot.slane %v2954_v4, 2 }
  0x7b   : > { %4603 = vst [vmem:[#allocation35_spill] sm:$0xff] %v3184_v23 }
  0x7c   : > { %724 = vrot.lane.b32.xlu1 %v3124_v63, %s2595_s7 }
  0x7d   : > { %726 = vrot.lane.b32.xlu0 %v3119_v37, %s2595_s7 }
  0x80   : > { %728 = vrot.lane.b32.xlu1 %v3137_v11, %s2595_s7 }
  0x81   : > { %730 = vrot.lane.b32.xlu0 %v3132_v42, %s2595_s7  ;;  %v3163_v42 = vsel %vm511_vm4, %v538_v14, %v540_v39  ;;  %v550_v14 = vrot.slane %v2918_v34, 2  ;;  %v557_v39 = vrot.slane %v2933_v48, 2 }
  0x83   : > { %v3197_v34 = vsel %vm511_vm4, %v557_v39, %v558_v10  ;;  %v568_v39 = vrot.slane %v2973_v18, 2 }
  0x84   : > { %732 = vrot.lane.b32.xlu1 %v3150_v38, %s2595_s7 }
  0x85   : > { %734 = vrot.lane.b32.xlu0 %v3145_v51, %s2595_s7  ;;  %v3176_v51 = vsel %vm511_vm4, %v543_v8, %v545_v27  ;;  %v555_v8 = vrot.slane %v2937_v54, 2  ;;  %v562_v27 = vrot.slane %v2952_v3, 2 }
  0x87   : > { %v3210_v54 = vsel %vm511_vm4, %v562_v27, %v563_v13  ;;  %v573_v27 = vrot.slane %v2992_v60, 2 }
  0x88   : > { %736 = vrot.lane.b32.xlu1 %v3163_v42, %s2595_s7 }
  0x89   : > { %738 = vrot.lane.b32.xlu0 %v3158_v59, %s2595_s7  ;;  %v3189_v59 = vsel %vm511_vm4, %v548_v0, %v550_v14  ;;  %v560_v0 = vrot.slane %v2956_v6, 2  ;;  %v567_v14 = vrot.slane %v2971_v17, 2 }
  0x8b   : > { %v3223_v6 = vsel %vm511_vm4, %v567_v14, %v568_v39  ;;  %v582_v14 = vrot.slane %v3028_v45, 2  ;;  %v587_v45 = vrot.slane %v3047_v16, 2 }
  0x8c   : > { %740 = vrot.lane.b32.xlu1 %v3176_v51, %s2595_s7 }
  0x8d   : > { %742 = vrot.lane.b32.xlu0 %v3171_v12, %s2595_s7  ;;  %v3202_v12 = vsel %vm511_vm4, %v553_v7, %v555_v8  ;;  %v565_v7 = vrot.slane %v2975_v20, 2  ;;  %v572_v8 = vrot.slane %v2990_v46, 2  ;;  %v578_v46 = vrot.slane %v3011_v1, 2 }
  0x8f   : > { %v3228_v18 = vsel %vm511_vm4, %v563_v13, %v565_v7  ;;  %v3236_v20 = vsel %vm511_vm4, %v572_v8, %v573_v27  ;;  %v575_v13 = vrot.slane %v3013_v25, 2  ;;  %v580_v25 = vrot.slane %v3032_v9, 2 }
  0x90   : > { %744 = vrot.lane.b32.xlu1 %v3189_v59, %s2595_s7  ;;  %v585_v9 = vrot.slane %v3051_v26, 2 }
  0x91   : > { %746 = vrot.lane.b32.xlu0 %v3184_v23, %s2595_s7  ;;  %v3215_v23 = vsel %vm511_vm4, %v558_v10, %v560_v0  ;;  %v570_v10 = vrot.slane %v2994_v2, 2  ;;  %v577_v0 = vrot.slane %v3009_v56, 2  ;;  %v583_v56 = vrot.slane %v3030_v24, 2 }
  0x92   : > { %v3256_v1 = vsel %vm511_vm4, %v573_v27, %v575_v13  ;;  %v588_v24 = vrot.slane %v3049_v19, 2  ;;  %v3271_v27 = vsel %vm511_vm4, %v578_v46, %v580_v25 }
  0x93   : > { %v3241_v60 = vsel %vm511_vm4, %v568_v39, %v570_v10  ;;  %v3249_v2 = vsel %vm511_vm4, %v577_v0, %v578_v46  ;;  %v3264_v39 = vsel %vm511_vm4, %v582_v14, %v583_v56  ;;  %4606 = vst [vmem:[#allocation38_spill] sm:$0xff] %v3271_v27  ;;  %v3286_v19 = vsel %vm511_vm4, %v583_v56, %v585_v9 }
  0x94   : > { %748 = vrot.lane.b32.xlu1 %v3202_v12, %s2595_s7  ;;  %4604 = vst [vmem:[#allocation36_spill] sm:$0xff] %v3249_v2  ;;  %4605 = vst [vmem:[#allocation37_spill] sm:$0xff] %v3264_v39  ;;  %v3281_v0 = vsel %vm511_vm4, %v587_v45, %v588_v24  ;;  %v590_v46 = vrot.slane %v3066_v5, 2 }
  0x95   : > { %750 = vrot.lane.b32.xlu0 %v3197_v34, %s2595_s7  ;;  %4607 = vst [vmem:[#allocation39_spill] sm:$0xff] %v3281_v0  ;;  %4608 = vst [vmem:[#allocation40_spill] sm:$0xff] %v3286_v19 }
  0x96   : > { %v3298_v14 = vsel %vm511_vm4, %v588_v24, %v590_v46 }
  0x97   : > { %4609 = vst [vmem:[#allocation41_spill] sm:$0xff] %v3298_v14 }
  0x98   : > { %752 = vrot.lane.b32.xlu1 %v3215_v23, %s2595_s7 }
  0x99   : > { %754 = vrot.lane.b32.xlu0 %v3210_v54, %s2595_s7 }
  0x9c   : > { %756 = vrot.lane.b32.xlu1 %v3228_v18, %s2595_s7 }
  0x9d   : > { %758 = vrot.lane.b32.xlu0 %v3223_v6, %s2595_s7 }
  0xa0   : > { %760 = vrot.lane.b32.xlu1 %v3241_v60, %s2595_s7 }
  0xa1   : > { %762 = vrot.lane.b32.xlu0 %v3236_v20, %s2595_s7 }
  0xa3   : > { %v3253_v7 = vpop.permute.xlu0 %618 }
  0xa4   : > { %764 = vrot.lane.b32.xlu1 %v3256_v1, %s2595_s7 }
  0xa5   : > { %766 = vrot.lane.b32.xlu0 %v3249_v2, %s2595_s7 }
  0xa6   : > { %v3274_v10 = vpop.permute.xlu1 %622 }
  0xa7   : > { %v3268_v8 = vpop.permute.xlu0 %620 }
  0xa8   : > { %768 = vrot.lane.b32.xlu1 %v3271_v27, %s2595_s7 }
  0xa9   : > { %770 = vrot.lane.b32.xlu0 %v3264_v39, %s2595_s7 }
  0xaa   : > { %v3289_v13 = vpop.permute.xlu1 %624 }
  0xab   : > { %v3283_v16 = vpop.permute.xlu0 %626 }
  0xac   : > { %772 = vrot.lane.b32.xlu1 %v3286_v19, %s2595_s7 }
  0xad   : > { %774 = vrot.lane.b32.xlu0 %v3281_v0, %s2595_s7 }
  0xae   : > { %v3300_v25 = vpop.permute.xlu1 %628 }
  0xaf   : > { %v3295_v26 = vpop.permute.xlu0 %630 }
  0xb0   : > { %776 = vrot.lane.b32.xlu1 %v3298_v14, %s2595_s7  ;;  %s2531_s7 = scalar_lea.vmem %s2214_s22, 32 }
  0xb1   : > { %810 = vrot.lane.b32.xlu0 %v2781_v30, %s2596_s8  ;;  %p2532_p11 = scmp.ne.s32.totalorder %s2214_s22, %s2531_s7 }
  0xb2   : > { %v3308_v56 = vpop.permute.xlu1 %632 }
  0xb3   : > { %v3306_v5 = vpop.permute.xlu0 %634  ;;  %p2533_p12 = pnand %p2532_p11, %p2666_p5 }
  0xb4   : > { %812 = vrot.lane.b32.xlu1 %v2783_v31, %s2596_s8 }
  0xb5   : > { %814 = vrot.lane.b32.xlu0 %v2785_v32, %s2596_s8  ;;  %p2534_p13 = pneg %p2533_p12 }
  0xb6   : > { %v3316_v24 = vpop.permute.xlu1 %636 }
  0xb7   : > { %v3314_v45 = vpop.permute.xlu0 %638 }
  0xb8   : > { %816 = vrot.lane.b32.xlu1 %v2792_v35, %s2596_s8 }
  0xb9   : > { %818 = vrot.lane.b32.xlu0 %v2799_v40, %s2596_s8 }
  0xba   : > { %v3324_v9 = vpop.permute.xlu1 %640 }
  0xbb   : > { %v3322_v30 = vpop.permute.xlu0 %642 }
  0xbc   : > { %4610 = vst [vmem:[#allocation42_spill] sm:$0xff] %v3322_v30  ;;  %820 = vrot.lane.b32.xlu1 %v2801_v41, %s2596_s8 }
  0xbd   : > { %822 = vrot.lane.b32.xlu0 %v2820_v49, %s2596_s8 }
  0xbe   : > { %v3332_v46 = vpop.permute.xlu1 %644 }
  0xbf   : > { %v3330_v31 = vpop.permute.xlu0 %646  ;;  %4612 = vst [vmem:[#allocation44_spill] sm:$0xff] %v3332_v46  ;;  %v4659_v46 = vld [vmem:[#allocation33_spill] sm:$0xff] }
  0xc0   : > { %4611 = vst [vmem:[#allocation43_spill] sm:$0xff] %v3330_v31  ;;  %824 = vrot.lane.b32.xlu1 %v2822_v50, %s2596_s8 }
  0xc1   : > { %826 = vrot.lane.b32.xlu0 %v2839_v57, %s2596_s8 }
  0xc2   : > { %v3340_v0 = vpop.permute.xlu1 %648 }
  0xc3   : > { %v3338_v14 = vpop.permute.xlu0 %650  ;;  %4614 = vst [vmem:[#allocation46_spill] sm:$0xff] %v3340_v0 }
  0xc4   : > { %4613 = vst [vmem:[#allocation45_spill] sm:$0xff] %v3338_v14  ;;  %828 = vrot.lane.b32.xlu1 %v2841_v58, %s2596_s8 }
  0xc5   : > { %830 = vrot.lane.b32.xlu0 %v2848_v61, %s2596_s8 }
  0xc6   : > { %v3348_v39 = vpop.permute.xlu1 %652 }
  0xc7   : > { %v3346_v19 = vpop.permute.xlu0 %654  ;;  %4616 = vst [vmem:[#allocation48_spill] sm:$0xff] %v3348_v39 }
  0xc8   : > { %4615 = vst [vmem:[#allocation47_spill] sm:$0xff] %v3346_v19  ;;  %832 = vrot.lane.b32.xlu1 %v2850_v62, %s2596_s8 }
  0xc9   : > { %834 = vrot.lane.b32.xlu0 %v2895_v21, %s2596_s8 }
  0xca   : > { %v3356_v14 = vpop.permute.xlu1 %656 }
  0xcb   : > { %v3354_v31 = vpop.permute.xlu0 %658  ;;  %4618 = vst [vmem:[#allocation50_spill] sm:$0xff] %v3356_v14 }
  0xcc   : > { %4617 = vst [vmem:[#allocation49_spill] sm:$0xff] %v3354_v31  ;;  %836 = vrot.lane.b32.xlu1 %v2897_v22, %s2596_s8 }
  0xcd   : > { %838 = vrot.lane.b32.xlu0 %v2914_v29, %s2596_s8 }
  0xce   : > { %v3364_v19 = vpop.permute.xlu1 %660 }
  0xcf   : > { %v3362_v0 = vpop.permute.xlu0 %662  ;;  %4620 = vst [vmem:[#allocation52_spill] sm:$0xff] %v3364_v19 }
  0xd0   : > { %4619 = vst [vmem:[#allocation51_spill] sm:$0xff] %v3362_v0  ;;  %840 = vrot.lane.b32.xlu1 %v2916_v33, %s2596_s8 }
  0xd1   : > { %842 = vrot.lane.b32.xlu0 %v2933_v48, %s2596_s8 }
  0xd2   : > { %v3372_v31 = vpop.permute.xlu1 %664 }
  0xd3   : > { %v3370_v39 = vpop.permute.xlu0 %666  ;;  %4622 = vst [vmem:[#allocation54_spill] sm:$0xff] %v3372_v31 }
  0xd4   : > { %4621 = vst [vmem:[#allocation53_spill] sm:$0xff] %v3370_v39  ;;  %844 = vrot.lane.b32.xlu1 %v2935_v53, %s2596_s8 }
  0xd5   : > { %846 = vrot.lane.b32.xlu0 %v2952_v3, %s2596_s8 }
  0xd6   : > { %v3380_v0 = vpop.permute.xlu1 %668 }
  0xd7   : > { %v3378_v14 = vpop.permute.xlu0 %670  ;;  %4624 = vst [vmem:[#allocation56_spill] sm:$0xff] %v3380_v0 }
  0xd8   : > { %4623 = vst [vmem:[#allocation55_spill] sm:$0xff] %v3378_v14  ;;  %848 = vrot.lane.b32.xlu1 %v2954_v4, %s2596_s8 }
  0xd9   : > { %850 = vrot.lane.b32.xlu0 %v2971_v17, %s2596_s8  ;;  %v324_v17 = vld [vmem:[%s4496_s1 + $0x20] sm:$0xf] }
  0xda   : > { %v3388_v39 = vpop.permute.xlu1 %672  ;;  %2383 = vmatprep.subr.msk.mxu0 %vm1752_vm5, %v324_v17  ;;  %2441 = vmatprep.subr.msk.mxu1 %vm1752_vm5, %v324_v17 }
  0xdb   : > { %v3386_v19 = vpop.permute.xlu0 %674  ;;  %4626 = vst [vmem:[#allocation58_spill] sm:$0xff] %v3388_v39  ;;  %2384 = vmatpush3.msk.msra.mxu0 %vm1752_vm5, %v324_v17  ;;  %2446 = vmatpush3.msk.msra.mxu1 %vm1752_vm5, %v324_v17  ;;  %v320_v17 = vld [vmem:[%s4496_s1] sm:$0xff] }
  0xdc   : > { %4625 = vst [vmem:[#allocation57_spill] sm:$0xff] %v3386_v19  ;;  %906 = vrot.lane.b32.xlu1 %v2807_v43, %s2597_s9  ;;  %v323_v43 = vld [vmem:[%s4496_s1 + $0x18] sm:$0xff] }
  0xdd   : > { %908 = vrot.lane.b32.xlu0 %v2817_v47, %s2597_s9  ;;  %2385 = vmatprep.subr.mxu0 %v323_v43 }
  0xde   : > { %v3399_v0 = vpop.permute.xlu1 %676  ;;  %2386 = vmatpush3.msra.mxu0 %v323_v43  ;;  %2442 = vmatprep.subr.mxu1 %v323_v43 }
  0xdf   : > { %v3394_v14 = vpop.permute.xlu0 %678  ;;  %4628 = vst [vmem:[#allocation60_spill] sm:$0xff] %v3399_v0  ;;  %2447 = vmatpush3.msra.mxu1 %v323_v43 }
  0xe0   : > { %4627 = vst [vmem:[#allocation59_spill] sm:$0xff] %v3394_v14  ;;  %1002 = vrot.lane.b32.xlu1 %v3096_v28, %s2598_s12  ;;  %v322_v14 = vld [vmem:[%s4496_s1 + $0x10] sm:$0xff]  ;;  %v321_v28 = vld [vmem:[%s4496_s1 + $0x8] sm:$0xff] }
  0xe1   : > { %1004 = vrot.lane.b32.xlu0 %v3111_v36, %s2598_s12  ;;  %2387 = vmatprep.subr.mxu0 %v322_v14 }
  0xe2   : > { %v3413_v0 = vpop.permute.xlu1 %680  ;;  %2388 = vmatpush3.msra.mxu0 %v322_v14  ;;  %2443 = vmatprep.subr.mxu1 %v322_v14 }
  0xe3   : > { %v3408_v47 = vpop.permute.xlu0 %714  ;;  %4629 = vst [vmem:[#allocation61_spill] sm:$0xff] %v3413_v0  ;;  %2389 = vmatprep.subr.mxu0 %v321_v28  ;;  %2448 = vmatpush3.msra.mxu1 %v322_v14 }
  0xe4   : > { %1098 = vrot.lane.b32.xlu1 %v2785_v32, %s2599_s23  ;;  %2390 = vmatpush3.msra.mxu0 %v321_v28 }
  0xe5   : > { %1100 = vrot.lane.b32.xlu0 %v2792_v35, %s2599_s23  ;;  %2391 = vmatprep.subr.mxu0 %v320_v17 }
  0xe6   : > { %v3427_v0 = vpop.permute.xlu1 %716  ;;  %2392 = vmatpush3.msra.mxu0 %v320_v17  ;;  %2444 = vmatprep.subr.mxu1 %v321_v28 }
  0xe7   : > { %v3422_v36 = vpop.permute.xlu0 %718  ;;  %2449 = vmatpush3.msra.mxu1 %v321_v28 }
  0xe8   : > { %1194 = vrot.lane.b32.xlu1 %v2812_v44, %s2600_s10  ;;  %2445 = vmatprep.subr.mxu1 %v320_v17 }
  0xe9   : > { %910 = vrot.lane.b32.xlu0 %v2812_v44, %s2597_s9  ;;  %2450 = vmatpush3.msra.mxu1 %v320_v17 }
  0xea   : > { %v3435_v35 = vpop.permute.xlu1 %720 }
  0xeb   : > { %v3433_v32 = vpop.permute.xlu0 %722 }
  0xec   : > { %1196 = vrot.lane.b32.xlu1 %v2836_v55, %s2600_s10 }
  0xed   : > { %1290 = vrot.lane.b32.xlu0 %v3106_v15, %s2601_s11 }
  0xee   : > { %v3443_v19 = vpop.permute.xlu1 %724 }
  0xef   : > { %v3441_v43 = vpop.permute.xlu0 %726 }
  0xf0   : > { %912 = vrot.lane.b32.xlu1 %v2836_v55, %s2597_s9 }
  0xf1   : > { %1006 = vrot.lane.b32.xlu0 %v3106_v15, %s2598_s12 }
  0xf2   : > { %v3451_v14 = vpop.permute.xlu1 %728 }
  0xf3   : > { %v3449_v44 = vpop.permute.xlu0 %730 }
  0xf4   : > { %1292 = vrot.lane.b32.xlu1 %v3124_v63, %s2601_s11 }
  0xf5   : > { %1008 = vrot.lane.b32.xlu0 %v3124_v63, %s2598_s12 }
  0xf6   : > { %v3459_v17 = vpop.permute.xlu1 %732 }
  0xf7   : > { %v3457_v28 = vpop.permute.xlu0 %734 }
  0xf8   : > { %1102 = vrot.lane.b32.xlu1 %v2799_v40, %s2599_s23 }
  0xf9   : > { %1104 = vrot.lane.b32.xlu0 %v2801_v41, %s2599_s23  ;;  %v4633_v41 = vld [vmem:[#allocation7_spill] sm:$0xff] }
  0xfa   : > { %v3467_v15 = vpop.permute.xlu1 %736 }
  0xfb   : > { %v3465_v55 = vpop.permute.xlu0 %738 }
  0xfc   : > { %4630 = vst [vmem:[#allocation62_spill] sm:$0xff] %v3465_v55  ;;  %1198 = vrot.lane.b32.xlu1 %v2831_v52, %s2600_s10 }
  0xfd   : > { %914 = vrot.lane.b32.xlu0 %v2831_v52, %s2597_s9 }
  0xfe   : > { %v3475_v39 = vpop.permute.xlu1 %740 }
  0xff   : > { %v3473_v63 = vpop.permute.xlu0 %742  ;;  %4632 = vst [vmem:[#allocation64_spill] sm:$0xff] %v3475_v39 }
 0x100   : > { %4631 = vst [vmem:[#allocation63_spill] sm:$0xff] %v3473_v63  ;;  %1200 = vrot.lane.b32.xlu1 %v4633_v41, %s2600_s10 }
 0x101   : > { %1294 = vrot.lane.b32.xlu0 %v3119_v37, %s2601_s11 }
 0x102   : > { %v3483_v31 = vpop.permute.xlu1 %744 }
 0x103   : > { %v3481_v40 = vpop.permute.xlu0 %746  ;;  %4635 = vst [vmem:[#allocation65_spill] sm:$0xff] %v3483_v31 }
 0x104   : > { %4634 = vst [vmem:[#allocation7_spill] sm:$0xff] %v3481_v40  ;;  %916 = vrot.lane.b32.xlu1 %v4633_v41, %s2597_s9 }
 0x105   : > { %1010 = vrot.lane.b32.xlu0 %v3119_v37, %s2598_s12 }
 0x106   : > { %v3491_v63 = vpop.permute.xlu1 %748 }
 0x107   : > { %v3489_v52 = vpop.permute.xlu0 %750  ;;  %4637 = vst [vmem:[#allocation67_spill] sm:$0xff] %v3491_v63  ;;  %v4657_v63 = vld [vmem:[#allocation10_spill] sm:$0xff] }
 0x108   : > { %4636 = vst [vmem:[#allocation66_spill] sm:$0xff] %v3489_v52  ;;  %1296 = vrot.lane.b32.xlu1 %v3137_v11, %s2601_s11  ;;  %v4642_v52 = vld [vmem:[#allocation6_spill] sm:$0xff] }
 0x109   : > { %1012 = vrot.lane.b32.xlu0 %v3137_v11, %s2598_s12 }
 0x10a   : > { %v3499_v40 = vpop.permute.xlu1 %752 }
 0x10b   : > { %v3497_v39 = vpop.permute.xlu0 %754  ;;  %4639 = vst [vmem:[#allocation69_spill] sm:$0xff] %v3499_v40  ;;  %v4645_v40 = vld [vmem:[#allocation31_spill] sm:$0xff] }
 0x10c   : > { %4638 = vst [vmem:[#allocation68_spill] sm:$0xff] %v3497_v39  ;;  %1106 = vrot.lane.b32.xlu1 %v2820_v49, %s2599_s23 }
 0x10d   : > { %1108 = vrot.lane.b32.xlu0 %v2822_v50, %s2599_s23  ;;  %v4646_v50 = vld [vmem:[#allocation9_spill] sm:$0xff] }
 0x10e   : > { %v3507_v41 = vpop.permute.xlu1 %756 }
 0x10f   : > { %v3505_v37 = vpop.permute.xlu0 %758  ;;  %4641 = vst [vmem:[#allocation71_spill] sm:$0xff] %v3507_v41 }
 0x110   : > { %4640 = vst [vmem:[#allocation70_spill] sm:$0xff] %v3505_v37  ;;  %1202 = vrot.lane.b32.xlu1 %v4642_v52, %s2600_s10 }
 0x111   : > { %918 = vrot.lane.b32.xlu0 %v4642_v52, %s2597_s9 }
 0x112   : > { %v3515_v39 = vpop.permute.xlu1 %760 }
 0x113   : > { %v3513_v11 = vpop.permute.xlu0 %762  ;;  %4644 = vst [vmem:[#allocation72_spill] sm:$0xff] %v3515_v39 }
 0x114   : > { %4643 = vst [vmem:[#allocation6_spill] sm:$0xff] %v3513_v11  ;;  %1204 = vrot.lane.b32.xlu1 %v4646_v50, %s2600_s10 }
 0x115   : > { %1298 = vrot.lane.b32.xlu0 %v4645_v40, %s2601_s11 }
 0x116   : > { %v3523_v37 = vpop.permute.xlu1 %764 }
 0x117   : > { %v3521_v49 = vpop.permute.xlu0 %766  ;;  %4648 = vst [vmem:[#allocation9_spill] sm:$0xff] %v3523_v37 }
 0x118   : > { %4647 = vst [vmem:[#allocation31_spill] sm:$0xff] %v3521_v49  ;;  %920 = vrot.lane.b32.xlu1 %v4646_v50, %s2597_s9 }
 0x119   : > { %1014 = vrot.lane.b32.xlu0 %v4645_v40, %s2598_s12 }
 0x11a   : > { %v3531_v11 = vpop.permute.xlu1 %768 }
 0x11b   : > { %v3529_v52 = vpop.permute.xlu0 %770  ;;  %4650 = vst [vmem:[#allocation74_spill] sm:$0xff] %v3531_v11 }
 0x11c   : > { %4649 = vst [vmem:[#allocation73_spill] sm:$0xff] %v3529_v52  ;;  %1300 = vrot.lane.b32.xlu1 %v3150_v38, %s2601_s11  ;;  %v4654_v52 = vld [vmem:[#allocation8_spill] sm:$0xff] }
 0x11d   : > { %1016 = vrot.lane.b32.xlu0 %v3150_v38, %s2598_s12 }
 0x11e   : > { %v3539_v49 = vpop.permute.xlu1 %772 }
 0x11f   : > { %v3537_v39 = vpop.permute.xlu0 %774  ;;  %4652 = vst [vmem:[#allocation76_spill] sm:$0xff] %v3539_v49  ;;  %v4655_v49 = vld [vmem:[#allocation32_spill] sm:$0xff] }
 0x120   : > { %4651 = vst [vmem:[#allocation75_spill] sm:$0xff] %v3537_v39  ;;  %1110 = vrot.lane.b32.xlu1 %v2839_v57, %s2599_s23 }
 0x121   : > { %1112 = vrot.lane.b32.xlu0 %v2841_v58, %s2599_s23  ;;  %v4656_v58 = vld [vmem:[#allocation11_spill] sm:$0xff] }
 0x122   : > { %v3547_v50 = vpop.permute.xlu1 %776 }
 0x123   : > { %v3545_v40 = vpop.permute.xlu0 %810  ;;  %4653 = vst [vmem:[#allocation77_spill] sm:$0xff] %v3547_v50 }
 0x124   : > { %1206 = vrot.lane.b32.xlu1 %v4654_v52, %s2600_s10 }
 0x125   : > { %922 = vrot.lane.b32.xlu0 %v4654_v52, %s2597_s9 }
 0x126   : > { %v3555_v39 = vpop.permute.xlu1 %812 }
 0x127   : > { %v3553_v38 = vpop.permute.xlu0 %814 }
 0x128   : > { %1208 = vrot.lane.b32.xlu1 %v4656_v58, %s2600_s10 }
 0x129   : > { %1302 = vrot.lane.b32.xlu0 %v4655_v49, %s2601_s11 }
 0x12a   : > { %v3563_v11 = vpop.permute.xlu1 %816 }
 0x12b   : > { %v3561_v57 = vpop.permute.xlu0 %818 }
 0x12c   : > { %924 = vrot.lane.b32.xlu1 %v4656_v58, %s2597_s9 }
 0x12d   : > { %1018 = vrot.lane.b32.xlu0 %v4655_v49, %s2598_s12 }
 0x12e   : > { %v3571_v50 = vpop.permute.xlu1 %820 }
 0x12f   : > { %v3569_v52 = vpop.permute.xlu0 %822 }
 0x130   : > { %1304 = vrot.lane.b32.xlu1 %v3163_v42, %s2601_s11 }
 0x131   : > { %1020 = vrot.lane.b32.xlu0 %v3163_v42, %s2598_s12 }
 0x132   : > { %v3579_v41 = vpop.permute.xlu1 %824 }
 0x133   : > { %v3577_v37 = vpop.permute.xlu0 %826 }
 0x134   : > { %1114 = vrot.lane.b32.xlu1 %v2848_v61, %s2599_s23 }
 0x135   : > { %1116 = vrot.lane.b32.xlu0 %v2850_v62, %s2599_s23  ;;  %v4660_v62 = vld [vmem:[#allocation13_spill] sm:$0xff] }
 0x136   : > { %v3587_v58 = vpop.permute.xlu1 %828 }
 0x137   : > { %v3585_v49 = vpop.permute.xlu0 %830 }
 0x138   : > { %1210 = vrot.lane.b32.xlu1 %v4657_v63, %s2600_s10 }
 0x139   : > { %926 = vrot.lane.b32.xlu0 %v4657_v63, %s2597_s9 }
 0x13a   : > { %v3595_v31 = vpop.permute.xlu1 %832 }
 0x13b   : > { %v3593_v42 = vpop.permute.xlu0 %834 }
 0x13c   : > { %4658 = vst [vmem:[#allocation8_spill] sm:$0xff] %v3593_v42  ;;  %1212 = vrot.lane.b32.xlu1 %v4660_v62, %s2600_s10 }
 0x13d   : > { %1306 = vrot.lane.b32.xlu0 %v4659_v46, %s2601_s11 }
 0x13e   : > { %v3603_v27 = vpop.permute.xlu1 %836 }
 0x13f   : > { %v3601_v61 = vpop.permute.xlu0 %838  ;;  %4662 = vst [vmem:[#allocation11_spill] sm:$0xff] %v3603_v27 }
 0x140   : > { %4661 = vst [vmem:[#allocation32_spill] sm:$0xff] %v3601_v61  ;;  %928 = vrot.lane.b32.xlu1 %v4660_v62, %s2597_s9 }
 0x141   : > { %1022 = vrot.lane.b32.xlu0 %v4659_v46, %s2598_s12 }
 0x142   : > { %v3611_v2 = vpop.permute.xlu1 %840 }
 0x143   : > { %v3609_v63 = vpop.permute.xlu0 %842  ;;  %4664 = vst [vmem:[#allocation33_spill] sm:$0xff] %v3611_v2 }
 0x144   : > { %4663 = vst [vmem:[#allocation10_spill] sm:$0xff] %v3609_v63  ;;  %1308 = vrot.lane.b32.xlu1 %v3176_v51, %s2601_s11  ;;  %v4669_v63 = vld [vmem:[#allocation12_spill] sm:$0xff] }
 0x145   : > { %1024 = vrot.lane.b32.xlu0 %v3176_v51, %s2598_s12 }
 0x146   : > { %v3619_v61 = vpop.permute.xlu1 %844 }
 0x147   : > { %v3617_v42 = vpop.permute.xlu0 %846  ;;  %4666 = vst [vmem:[#allocation78_spill] sm:$0xff] %v3619_v61  ;;  %v4670_v61 = vld [vmem:[#allocation34_spill] sm:$0xff] }
 0x148   : > { %4665 = vst [vmem:[#allocation13_spill] sm:$0xff] %v3617_v42  ;;  %1118 = vrot.lane.b32.xlu1 %v2895_v21, %s2599_s23 }
 0x149   : > { %1120 = vrot.lane.b32.xlu0 %v2897_v22, %s2599_s23  ;;  %v4671_v22 = vld [vmem:[#allocation15_spill] sm:$0xff] }
 0x14a   : > { %v3627_v62 = vpop.permute.xlu1 %848 }
 0x14b   : > { %v3625_v46 = vpop.permute.xlu0 %850  ;;  %4668 = vst [vmem:[#allocation80_spill] sm:$0xff] %v3627_v62  ;;  %v2499_v62 = vld [vmem:[#allocation2] sm:$0xff] }
 0x14c   : > { %4667 = vst [vmem:[#allocation79_spill] sm:$0xff] %v3625_v46  ;;  %1214 = vrot.lane.b32.xlu1 %v4669_v63, %s2600_s10  ;;  %v1386_v27 = vsel %vm209_vm0, %v2499_v62, %v3253_v7 }
 0x14d   : > { %930 = vrot.lane.b32.xlu0 %v4669_v63, %s2597_s9  ;;  %v1419_v55 = vsel %vm1418_vm6, %v1386_v27, %v3408_v47 }
 0x14e   : > { %v907_v42 = vpop.permute.xlu1 %906 }
 0x14f   : > { %v909_v51 = vpop.permute.xlu0 %908 }
 0x150   : > { %1216 = vrot.lane.b32.xlu1 %v4671_v22, %s2600_s10 }
 0x151   : > { %1310 = vrot.lane.b32.xlu0 %v4670_v61, %s2601_s11 }
 0x152   : > { %v1003_v21 = vpop.permute.xlu1 %1002 }
 0x153   : > { %v1005_v2 = vpop.permute.xlu0 %1004 }
 0x154   : > { %932 = vrot.lane.b32.xlu1 %v4671_v22, %s2597_s9 }
 0x155   : > { %1026 = vrot.lane.b32.xlu0 %v4670_v61, %s2598_s12  ;;  %v1452_v61 = vsel %vm1451_vm7, %v1419_v55, %v3545_v40 }
 0x156   : > { %v1099_v63 = vpop.permute.xlu1 %1098  ;;  %v1485_v30 = vsel %vm1484_vm8, %v1452_v61, %v907_v42  ;;  %v4672_v42 = vld [vmem:[#allocation14_spill] sm:$0xff] }
 0x157   : > { %v1101_v46 = vpop.permute.xlu0 %1100  ;;  %v1518_v62 = vsel %vm1517_vm9, %v1485_v30, %v1003_v21  ;;  %v2500_v30 = vld [vmem:[#allocation2 + $0x8] sm:$0xff] }
 0x158   : > { %1312 = vrot.lane.b32.xlu1 %v3189_v59, %s2601_s11  ;;  %v1551_v27 = vsel %vm1550_vm10, %v1518_v62, %v1099_v63  ;;  %v4673_v62 = vld [vmem:[#allocation35_spill] sm:$0xff] }
 0x159   : > { %1028 = vrot.lane.b32.xlu0 %v3189_v59, %s2598_s12 }
 0x15a   : > { %v1195_v7 = vpop.permute.xlu1 %1194 }
 0x15b   : > { %v911_v22 = vpop.permute.xlu0 %910  ;;  %v1584_v59 = vsel %vm1583_vm11, %v1551_v27, %v1195_v7 }
 0x15c   : > { %1122 = vrot.lane.b32.xlu1 %v2914_v29, %s2599_s23 }
 0x15d   : > { %1124 = vrot.lane.b32.xlu0 %v2916_v33, %s2599_s23  ;;  %v1387_v33 = vsel %vm209_vm0, %v2500_v30, %v3268_v8  ;;  %v4674_v8 = vld [vmem:[#allocation17_spill] sm:$0xff] }
 0x15e   : > { %v1197_v55 = vpop.permute.xlu1 %1196  ;;  %v1420_v29 = vsel %vm1418_vm6, %v1387_v33, %v3427_v0 }
 0x15f   : > { %v1291_v47 = vpop.permute.xlu0 %1290  ;;  %v1453_v63 = vsel %vm1451_vm7, %v1420_v29, %v3555_v39 }
 0x160   : > { %v1617_v40 = vsel %vm1616_vm12, %v1584_v59, %v1291_v47  ;;  %1218 = vrot.lane.b32.xlu1 %v4672_v42, %s2600_s10  ;;  %v1486_v7 = vsel %vm1484_vm8, %v1453_v63, %v909_v51  ;;  %v2501_v51 = vld [vmem:[#allocation2 + $0x18] sm:$0xff] }
 0x161   : > { %934 = vrot.lane.b32.xlu0 %v4672_v42, %s2597_s9  ;;  %2393 = vmatprep.mubr.msk.f32.mxu0 %vm1655_vm13, %v1617_v40  ;;  %v1519_v27 = vsel %vm1517_vm9, %v1486_v7, %v1005_v2 }
 0x162   : > { %v913_v61 = vpop.permute.xlu1 %912  ;;  %v1552_v59 = vsel %vm1550_vm10, %v1519_v27, %v1101_v46  ;;  %v1388_v46 = vsel %vm209_vm0, %v2501_v51, %v3274_v10  ;;  %v4675_v27 = vld [vmem:[#allocation16_spill] sm:$0xff] }
 0x163   : > { %v1007_v21 = vpop.permute.xlu0 %1006  ;;  %v1585_v0 = vsel %vm1583_vm11, %v1552_v59, %v1197_v55  ;;  %v1421_v55 = vsel %vm1418_vm6, %v1388_v46, %v3422_v36  ;;  %v2503_v46 = vld [vmem:[#allocation2 + $0x30] sm:$0xff] }
 0x164   : > { %1220 = vrot.lane.b32.xlu1 %v4674_v8, %s2600_s10  ;;  %v1454_v30 = vsel %vm1451_vm7, %v1421_v55, %v3553_v38 }
 0x165   : > { %1314 = vrot.lane.b32.xlu0 %v4673_v62, %s2601_s11  ;;  %v1487_v29 = vsel %vm1484_vm8, %v1454_v30, %v911_v22  ;;  %v2502_v22 = vld [vmem:[#allocation2 + $0x20] sm:$0xff] }
 0x166   : > { %v1293_v40 = vpop.permute.xlu1 %1292  ;;  %v1520_v7 = vsel %vm1517_vm9, %v1487_v29, %v1007_v21 }
 0x167   : > { %v1009_v47 = vpop.permute.xlu0 %1008  ;;  %v1618_v42 = vsel %vm1616_vm12, %v1585_v0, %v1293_v40 }
 0x168   : > { %936 = vrot.lane.b32.xlu1 %v4674_v8, %s2597_s9  ;;  %2394 = vmatmul.mubr.msk.f32.vlgmr.msra.gmra.mxu0 %vm1655_vm13, %v1618_v42 }
 0x169   : > { %1030 = vrot.lane.b32.xlu0 %v4673_v62, %s2598_s12 }
 0x16a   : > { %v1103_v39 = vpop.permute.xlu1 %1102 }
 0x16b   : > { %v1105_v2 = vpop.permute.xlu0 %1104  ;;  %v1553_v10 = vsel %vm1550_vm10, %v1520_v7, %v1103_v39  ;;  %v285_v7 = vld [vmem:[%s2728_s5 + $0xf0] sm:$0xff] }
 0x16c   : > { %1316 = vrot.lane.b32.xlu1 %v3202_v12, %s2601_s11  ;;  %318 = vst.msk [vmem:[#allocation2 + $0x181] sm:$0xff] %vm209_vm0, %v285_v7 }
 0x16d   : > { %1032 = vrot.lane.b32.xlu0 %v3202_v12, %s2598_s12 }
 0x16e   : > { %v1199_v63 = vpop.permute.xlu1 %1198 }
 0x16f   : > { %v915_v33 = vpop.permute.xlu0 %914  ;;  %v1586_v36 = vsel %vm1583_vm11, %v1553_v10, %v1199_v63 }
 0x170   : > { %1126 = vrot.lane.b32.xlu1 %v2933_v48, %s2599_s23 }
 0x171   : > { %1128 = vrot.lane.b32.xlu0 %v2935_v53, %s2599_s23  ;;  %v1389_v53 = vsel %vm209_vm0, %v2502_v22, %v3289_v13  ;;  %v4676_v13 = vld [vmem:[#allocation19_spill] sm:$0xff] }
 0x172   : > { %v1201_v38 = vpop.permute.xlu1 %1200  ;;  %v1422_v48 = vsel %vm1418_vm6, %v1389_v53, %v3435_v35 }
 0x173   : > { %v1295_v12 = vpop.permute.xlu0 %1294  ;;  %v1455_v8 = vsel %vm1451_vm7, %v1422_v48, %v3563_v11 }
 0x174   : > { %v1619_v62 = vsel %vm1616_vm12, %v1586_v36, %v1295_v12  ;;  %1222 = vrot.lane.b32.xlu1 %v4675_v27, %s2600_s10  ;;  %v1488_v0 = vsel %vm1484_vm8, %v1455_v8, %v913_v61  ;;  %v286_v36 = vld [vmem:[%s2728_s5 + $0xf8] sm:$0xff] }
 0x175   : > { %938 = vrot.lane.b32.xlu0 %v4675_v27, %s2597_s9  ;;  %2396 = vmatprep.mubr.msk.f32.mxu0 %vm1655_vm13, %v1619_v62  ;;  %v1521_v40 = vsel %vm1517_vm9, %v1488_v0, %v1009_v47  ;;  %v4677_v12 = vld [vmem:[#allocation18_spill] sm:$0xff]  ;;  %319 = vst.msk [vmem:[#allocation2 + $0x189] sm:$0xff] %vm209_vm0, %v286_v36 }
 0x176   : > { %v917_v59 = vpop.permute.xlu1 %916  ;;  %v1554_v42 = vsel %vm1550_vm10, %v1521_v40, %v1105_v2  ;;  %v1390_v2 = vsel %vm209_vm0, %v2503_v46, %v3283_v16 }
 0x177   : > { %v1011_v21 = vpop.permute.xlu0 %1010  ;;  %v1587_v35 = vsel %vm1583_vm11, %v1554_v42, %v1201_v38  ;;  %v1423_v55 = vsel %vm1418_vm6, %v1390_v2, %v3433_v32 }
 0x178   : > { %1224 = vrot.lane.b32.xlu1 %v4676_v13, %s2600_s10 }
 0x179   : > { %1318 = vrot.lane.b32.xlu0 %v3197_v34, %s2601_s11 }
 0x17a   : > { %v1297_v51 = vpop.permute.xlu1 %1296 }
 0x17b   : > { %v1013_v39 = vpop.permute.xlu0 %1012  ;;  %v1620_v11 = vsel %vm1616_vm12, %v1587_v35, %v1297_v51 }
 0x17c   : > { %940 = vrot.lane.b32.xlu1 %v4676_v13, %s2597_s9  ;;  %2397 = vmatmul.mubr.msk.f32.gmra.mxu0 %vm1655_vm13, %v1620_v11  ;;  %v2505_v13 = vld [vmem:[#allocation2 + $0x48] sm:$0xff] }
 0x17d   : > { %1034 = vrot.lane.b32.xlu0 %v3197_v34, %s2598_s12  ;;  %v1456_v34 = vsel %vm1451_vm7, %v1423_v55, %v3561_v57  ;;  %v1392_v42 = vsel %vm209_vm0, %v2505_v13, %v3295_v26  ;;  %v2508_v55 = vld [vmem:[#allocation2 + $0x50] sm:$0xff] }
 0x17e   : > { %v1107_v47 = vpop.permute.xlu1 %1106  ;;  %v1489_v29 = vsel %vm1484_vm8, %v1456_v34, %v915_v33  ;;  %v1393_v34 = vsel %vm209_vm0, %v2508_v55, %v3308_v56 }
 0x17f   : > { %v1109_v61 = vpop.permute.xlu0 %1108  ;;  %v1522_v16 = vsel %vm1517_vm9, %v1489_v29, %v1011_v21  ;;  %v1426_v29 = vsel %vm1418_vm6, %v1393_v34, %v3451_v14 }
 0x180   : > { %1320 = vrot.lane.b32.xlu1 %v3215_v23, %s2601_s11  ;;  %v1555_v32 = vsel %vm1550_vm10, %v1522_v16, %v1107_v47  ;;  %v3789_v47 = vld [vmem:[#allocation2 + $0x110] sm:$0xff]  ;;  %v1459_v7 = vsel %vm1451_vm7, %v1426_v29, %v3579_v41 }
 0x181   : > { %1036 = vrot.lane.b32.xlu0 %v3215_v23, %s2598_s12 }
 0x182   : > { %v1203_v63 = vpop.permute.xlu1 %1202 }
 0x183   : > { %v919_v30 = vpop.permute.xlu0 %918  ;;  %v1588_v23 = vsel %vm1583_vm11, %v1555_v32, %v1203_v63 }
 0x184   : > { %1130 = vrot.lane.b32.xlu1 %v2952_v3, %s2599_s23 }
 0x185   : > { %1132 = vrot.lane.b32.xlu0 %v2954_v4, %s2599_s23  ;;  %v2504_v4 = vld [vmem:[#allocation2 + $0x38] sm:$0xff] }
 0x186   : > { %v1205_v33 = vpop.permute.xlu1 %1204  ;;  %v1391_v62 = vsel %vm209_vm0, %v2504_v4, %v3300_v25  ;;  %v4678_v25 = vld [vmem:[#allocation21_spill] sm:$0xff]  ;;  %v2509_v4 = vld [vmem:[#allocation2 + $0x60] sm:$0xff] }
 0x187   : > { %v1299_v57 = vpop.permute.xlu0 %1298  ;;  %v1424_v3 = vsel %vm1418_vm6, %v1391_v62, %v3443_v19  ;;  %v1394_v62 = vsel %vm209_vm0, %v2509_v4, %v3306_v5 }
 0x188   : > { %v1621_v10 = vsel %vm1616_vm12, %v1588_v23, %v1299_v57  ;;  %1226 = vrot.lane.b32.xlu1 %v4677_v12, %s2600_s10  ;;  %v1457_v27 = vsel %vm1451_vm7, %v1424_v3, %v3571_v50  ;;  %v4680_v23 = vld [vmem:[#allocation23_spill] sm:$0xff]  ;;  %v1427_v3 = vsel %vm1418_vm6, %v1394_v62, %v3449_v44  ;;  %v2517_v62 = vld [vmem:[#allocation2 + $0x90] sm:$0xff] }
 0x189   : > { %942 = vrot.lane.b32.xlu0 %v4677_v12, %s2597_s9  ;;  %2399 = vmatprep.mubr.msk.f32.mxu0 %vm1655_vm13, %v1621_v10  ;;  %v1490_v53 = vsel %vm1484_vm8, %v1457_v27, %v917_v59 }
 0x18a   : > { %v921_v22 = vpop.permute.xlu1 %920  ;;  %v1523_v48 = vsel %vm1517_vm9, %v1490_v53, %v1013_v39  ;;  %v1425_v39 = vsel %vm1418_vm6, %v1392_v42, %v3441_v43  ;;  %v3794_v43 = vld [vmem:[#allocation2 + $0x108] sm:$0xff] }
 0x18b   : > { %v1015_v38 = vpop.permute.xlu0 %1014  ;;  %v1556_v21 = vsel %vm1550_vm10, %v1523_v48, %v1109_v61  ;;  %v1492_v32 = vsel %vm1484_vm8, %v1459_v7, %v921_v22  ;;  %v3892_v7 = vld [vmem:[#allocation2 + $0x138] sm:$0xff] }
 0x18c   : > { %1228 = vrot.lane.b32.xlu1 %v4678_v25, %s2600_s10  ;;  %v1589_v19 = vsel %vm1583_vm11, %v1556_v21, %v1205_v33 }
 0x18d   : > { %1322 = vrot.lane.b32.xlu0 %v3210_v54, %s2601_s11 }
 0x18e   : > { %v1301_v0 = vpop.permute.xlu1 %1300 }
 0x18f   : > { %v1017_v8 = vpop.permute.xlu0 %1016  ;;  %v1622_v40 = vsel %vm1616_vm12, %v1589_v19, %v1301_v0  ;;  %v2512_v19 = vld [vmem:[#allocation2 + $0x68] sm:$0xff] }
 0x190   : > { %944 = vrot.lane.b32.xlu1 %v4678_v25, %s2597_s9  ;;  %2400 = vmatmul.mubr.msk.f32.gmra.mxu0 %vm1655_vm13, %v1622_v40  ;;  %v1525_v57 = vsel %vm1517_vm9, %v1492_v32, %v1017_v8  ;;  %v3837_v25 = vld [vmem:[#allocation2 + $0x120] sm:$0xff]  ;;  %v3846_v8 = vld [vmem:[#allocation2 + $0x128] sm:$0xff]  ;;  %v1395_v0 = vsel %vm209_vm0, %v2512_v19, %v3316_v24  ;;  %v4681_v24 = vld [vmem:[#allocation22_spill] sm:$0xff] }
 0x191   : > { %1038 = vrot.lane.b32.xlu0 %v3210_v54, %s2598_s12  ;;  %v1458_v54 = vsel %vm1451_vm7, %v1425_v39, %v3569_v52 }
 0x192   : > { %v1111_v59 = vpop.permute.xlu1 %1110  ;;  %v1491_v51 = vsel %vm1484_vm8, %v1458_v54, %v919_v30  ;;  %v4679_v30 = vld [vmem:[#allocation20_spill] sm:$0xff] }
 0x193   : > { %v1113_v50 = vpop.permute.xlu0 %1112  ;;  %v1524_v61 = vsel %vm1517_vm9, %v1491_v51, %v1015_v38  ;;  %v1460_v38 = vsel %vm1451_vm7, %v1427_v3, %v3577_v37  ;;  %v4684_v3 = vld [vmem:[#allocation42_spill] sm:$0xff] }
 0x194   : > { %1324 = vrot.lane.b32.xlu1 %v3228_v18, %s2601_s11  ;;  %v1557_v26 = vsel %vm1550_vm10, %v1524_v61, %v1111_v59  ;;  %v1558_v56 = vsel %vm1550_vm10, %v1525_v57, %v1113_v50 }
 0x195   : > { %1040 = vrot.lane.b32.xlu0 %v3228_v18, %s2598_s12 }
 0x196   : > { %v1207_v11 = vpop.permute.xlu1 %1206 }
 0x197   : > { %v923_v35 = vpop.permute.xlu0 %922  ;;  %v1590_v18 = vsel %vm1583_vm11, %v1557_v26, %v1207_v11  ;;  %v2513_v26 = vld [vmem:[#allocation2 + $0x78] sm:$0xff] }
 0x198   : > { %1134 = vrot.lane.b32.xlu1 %v3794_v43, %s2599_s23  ;;  %v1493_v22 = vsel %vm1484_vm8, %v1460_v38, %v923_v35  ;;  %v1398_v38 = vsel %vm209_vm0, %v2517_v62, %v4684_v3  ;;  %v4698_v62 = vld [vmem:[#allocation46_spill] sm:$0xff] }
 0x199   : > { %1136 = vrot.lane.b32.xlu0 %v3789_v47, %s2599_s23 }
 0x19a   : > { %v1209_v2 = vpop.permute.xlu1 %1208 }
 0x19b   : > { %v1303_v52 = vpop.permute.xlu0 %1302  ;;  %v1591_v14 = vsel %vm1583_vm11, %v1558_v56, %v1209_v2 }
 0x19c   : > { %v1623_v46 = vsel %vm1616_vm12, %v1590_v18, %v1303_v52  ;;  %1230 = vrot.lane.b32.xlu1 %v4679_v30, %s2600_s10  ;;  %v1396_v18 = vsel %vm209_vm0, %v2513_v26, %v3314_v45  ;;  %v3952_v26 = vld [vmem:[#allocation2 + $0x150] sm:$0xff] }
 0x19d   : > { %852 = vrot.lane.b32.xlu0 %v3789_v47, %s2596_s8  ;;  %2402 = vmatprep.mubr.msk.f32.mxu0 %vm1655_vm13, %v1623_v46  ;;  %v1429_v52 = vsel %vm1418_vm6, %v1396_v18, %v3457_v28 }
 0x19e   : > { %v925_v16 = vpop.permute.xlu1 %924  ;;  %v1462_v46 = vsel %vm1451_vm7, %v1429_v52, %v3585_v49 }
 0x19f   : > { %v1019_v63 = vpop.permute.xlu0 %1018 }
 0x1a0   : > { %946 = vrot.lane.b32.xlu1 %v4679_v30, %s2597_s9  ;;  %v1526_v48 = vsel %vm1517_vm9, %v1493_v22, %v1019_v63  ;;  %v4686_v22 = vld [vmem:[#allocation62_spill] sm:$0xff] }
 0x1a1   : > { %1232 = vrot.lane.b32.xlu0 %v4680_v23, %s2600_s10 }
 0x1a2   : > { %v1305_v33 = vpop.permute.xlu1 %1304 }
 0x1a3   : > { %v1021_v10 = vpop.permute.xlu0 %1020  ;;  %v1624_v36 = vsel %vm1616_vm12, %v1591_v14, %v1305_v33  ;;  %v3906_v14 = vld [vmem:[#allocation2 + $0x140] sm:$0xff] }
 0x1a4   : > { %1326 = vrot.lane.b32.xlu1 %v3223_v6, %s2601_s11  ;;  %2403 = vmatmul.mubr.msk.f32.gmra.mxu0 %vm1655_vm13, %v1624_v36 }
 0x1a5   : > { %948 = vrot.lane.b32.xlu0 %v4680_v23, %s2597_s9 }
 0x1a6   : > { %v1115_v12 = vpop.permute.xlu1 %1114 }
 0x1a7   : > { %v1117_v41 = vpop.permute.xlu0 %1116  ;;  %v1559_v5 = vsel %vm1550_vm10, %v1526_v48, %v1115_v12  ;;  %v4687_v48 = vld [vmem:[#allocation8_spill] sm:$0xff] }
 0x1a8   : > { %1042 = vrot.lane.b32.xlu1 %v3223_v6, %s2598_s12 }
 0x1a9   : > { %1328 = vrot.lane.b32.xlu0 %v3241_v60, %s2601_s11 }
 0x1aa   : > { %v1211_v53 = vpop.permute.xlu1 %1210 }
 0x1ab   : > { %v927_v27 = vpop.permute.xlu0 %926  ;;  %v1592_v6 = vsel %vm1583_vm11, %v1559_v5, %v1211_v53  ;;  %v1431_v53 = vsel %vm1418_vm6, %v1398_v38, %v4686_v22  ;;  %v4699_v38 = vld [vmem:[#allocation37_spill] sm:$0xff] }
 0x1ac   : > { %1044 = vrot.lane.b32.xlu1 %v3241_v60, %s2598_s12  ;;  %v1428_v60 = vsel %vm1418_vm6, %v1395_v0, %v3459_v17  ;;  %v1495_v55 = vsel %vm1484_vm8, %v1462_v46, %v927_v27  ;;  %v4685_v27 = vld [vmem:[#allocation27_spill] sm:$0xff]  ;;  %v1464_v5 = vsel %vm1451_vm7, %v1431_v53, %v4687_v48  ;;  %v4688_v0 = vld [vmem:[#allocation36_spill] sm:$0xff]  ;;  %v4701_v48 = vld [vmem:[#allocation33_spill] sm:$0xff] }
 0x1ad   : > { %1138 = vrot.lane.b32.xlu0 %v3837_v25, %s2599_s23  ;;  %v1461_v50 = vsel %vm1451_vm7, %v1428_v60, %v3587_v58  ;;  %v4682_v58 = vld [vmem:[#allocation25_spill] sm:$0xff] }
 0x1ae   : > { %v1213_v21 = vpop.permute.xlu1 %1212  ;;  %v1494_v13 = vsel %vm1484_vm8, %v1461_v50, %v925_v16  ;;  %v2515_v16 = vld [vmem:[#allocation2 + $0x80] sm:$0xff] }
 0x1af   : > { %v1307_v44 = vpop.permute.xlu0 %1306  ;;  %v1527_v42 = vsel %vm1517_vm9, %v1494_v13, %v1021_v10  ;;  %v1397_v32 = vsel %vm209_vm0, %v2515_v16, %v3324_v9  ;;  %v4689_v13 = vld [vmem:[#allocation38_spill] sm:$0xff]  ;;  %v4694_v16 = vld [vmem:[#allocation63_spill] sm:$0xff] }
 0x1b0   : > { %v1625_v37 = vsel %vm1616_vm12, %v1592_v6, %v1307_v44  ;;  %854 = vrot.lane.b32.xlu1 %v3837_v25, %s2596_s8  ;;  %v1560_v39 = vsel %vm1550_vm10, %v1527_v42, %v1117_v41  ;;  %v4683_v41 = vld [vmem:[#allocation24_spill] sm:$0xff]  ;;  %v2518_v42 = vld [vmem:[#allocation2 + $0x98] sm:$0xff] }
 0x1b1   : > { %1140 = vrot.lane.b32.xlu0 %v3846_v8, %s2599_s23  ;;  %2405 = vmatprep.mubr.msk.f32.mxu0 %vm1655_vm13, %v1625_v37  ;;  %v1593_v17 = vsel %vm1583_vm11, %v1560_v39, %v1213_v21 }
 0x1b2   : > { %v929_v59 = vpop.permute.xlu1 %928 }
 0x1b3   : > { %v1023_v40 = vpop.permute.xlu0 %1022 }
 0x1b4   : > { %1234 = vrot.lane.b32.xlu1 %v4681_v24, %s2600_s10  ;;  %v1528_v30 = vsel %vm1517_vm9, %v1495_v55, %v1023_v40 }
 0x1b5   : > { %856 = vrot.lane.b32.xlu0 %v3846_v8, %s2596_s8 }
 0x1b6   : > { %v1309_v35 = vpop.permute.xlu1 %1308 }
 0x1b7   : > { %v1025_v54 = vpop.permute.xlu0 %1024  ;;  %v1626_v51 = vsel %vm1616_vm12, %v1593_v17, %v1309_v35 }
 0x1b8   : > { %950 = vrot.lane.b32.xlu1 %v4681_v24, %s2597_s9  ;;  %2406 = vmatmul.mubr.msk.f32.gmra.mxu0 %vm1655_vm13, %v1626_v51  ;;  %v4690_v24 = vld [vmem:[#allocation44_spill] sm:$0xff]  ;;  %v4692_v51 = vld [vmem:[#allocation11_spill] sm:$0xff] }
 0x1b9   : > { %1236 = vrot.lane.b32.xlu0 %v4682_v58, %s2600_s10  ;;  %v1399_v39 = vsel %vm209_vm0, %v2518_v42, %v4690_v24  ;;  %v2524_v24 = vld [vmem:[#allocation2 + $0xc0] sm:$0xff] }
 0x1ba   : > { %v1119_v61 = vpop.permute.xlu1 %1118 }
 0x1bb   : > { %v1121_v11 = vpop.permute.xlu0 %1120  ;;  %v1561_v45 = vsel %vm1550_vm10, %v1528_v30, %v1119_v61  ;;  %v3962_v30 = vld [vmem:[#allocation2 + $0x158] sm:$0xff] }
 0x1bc   : > { %1330 = vrot.lane.b32.xlu1 %v3236_v20, %s2601_s11 }
 0x1bd   : > { %952 = vrot.lane.b32.xlu0 %v4682_v58, %s2597_s9 }
 0x1be   : > { %v1215_v34 = vpop.permute.xlu1 %1214 }
 0x1bf   : > { %v931_v2 = vpop.permute.xlu0 %930  ;;  %v1594_v28 = vsel %vm1583_vm11, %v1561_v45, %v1215_v34 }
 0x1c0   : > { %1046 = vrot.lane.b32.xlu1 %v3236_v20, %s2598_s12  ;;  %v1430_v20 = vsel %vm1418_vm6, %v1397_v32, %v3467_v15  ;;  %v1497_v44 = vsel %vm1484_vm8, %v1464_v5, %v931_v2 }
 0x1c1   : > { %1332 = vrot.lane.b32.xlu0 %v3256_v1, %s2601_s11  ;;  %v1463_v57 = vsel %vm1451_vm7, %v1430_v20, %v3595_v31  ;;  %v4695_v20 = vld [vmem:[#allocation26_spill] sm:$0xff] }
 0x1c2   : > { %v1217_v49 = vpop.permute.xlu1 %1216  ;;  %v1496_v10 = vsel %vm1484_vm8, %v1463_v57, %v929_v59 }
 0x1c3   : > { %v1311_v29 = vpop.permute.xlu0 %1310  ;;  %v1529_v9 = vsel %vm1517_vm9, %v1496_v10, %v1025_v54  ;;  %v4691_v54 = vld [vmem:[#allocation64_spill] sm:$0xff] }
 0x1c4   : > { %v1627_v63 = vsel %vm1616_vm12, %v1594_v28, %v1311_v29  ;;  %1048 = vrot.lane.b32.xlu1 %v3256_v1, %s2598_s12  ;;  %v1562_v1 = vsel %vm1550_vm10, %v1529_v9, %v1121_v11  ;;  %v1432_v17 = vsel %vm1418_vm6, %v1399_v39, %v4691_v54  ;;  %v2521_v29 = vld [vmem:[#allocation2 + $0xa8] sm:$0xff] }
 0x1c5   : > { %1142 = vrot.lane.b32.xlu0 %v3892_v7, %s2599_s23  ;;  %2408 = vmatprep.mubr.msk.f32.mxu0 %vm1655_vm13, %v1627_v63  ;;  %v1595_v33 = vsel %vm1583_vm11, %v1562_v1, %v1217_v49  ;;  %v1465_v58 = vsel %vm1451_vm7, %v1432_v17, %v4692_v51  ;;  %v4693_v63 = vld [vmem:[#allocation43_spill] sm:$0xff]  ;;  %v4703_v39 = vld [vmem:[#allocation45_spill] sm:$0xff] }
 0x1c6   : > { %v933_v56 = vpop.permute.xlu1 %932  ;;  %v1400_v49 = vsel %vm209_vm0, %v2521_v29, %v4693_v63  ;;  %v1402_v54 = vsel %vm209_vm0, %v2524_v24, %v4703_v39  ;;  %v4017_v17 = vld [vmem:[#allocation2 + $0x170] sm:$0xff] }
 0x1c7   : > { %v1027_v23 = vpop.permute.xlu0 %1026  ;;  %v1498_v61 = vsel %vm1484_vm8, %v1465_v58, %v933_v56  ;;  %v1433_v32 = vsel %vm1418_vm6, %v1400_v49, %v4694_v16  ;;  %v4705_v58 = vld [vmem:[#allocation10_spill] sm:$0xff]  ;;  %v2526_v49 = vld [vmem:[#allocation2 + $0xc8] sm:$0xff] }
 0x1c8   : > { %858 = vrot.lane.b32.xlu1 %v3892_v7, %s2596_s8  ;;  %v1530_v21 = vsel %vm1517_vm9, %v1497_v44, %v1027_v23  ;;  %v4696_v23 = vld [vmem:[#allocation32_spill] sm:$0xff]  ;;  %v4707_v63 = vld [vmem:[#allocation30_spill] sm:$0xff] }
 0x1c9   : > { %1144 = vrot.lane.b32.xlu0 %v3906_v14, %s2599_s23  ;;  %v1466_v57 = vsel %vm1451_vm7, %v1433_v32, %v4696_v23  ;;  %v4708_v16 = vld [vmem:[#allocation48_spill] sm:$0xff] }
 0x1ca   : > { %v1313_v36 = vpop.permute.xlu1 %1312  ;;  %v1403_v32 = vsel %vm209_vm0, %v2526_v49, %v4708_v16 }
 0x1cb   : > { %v1029_v15 = vpop.permute.xlu0 %1028  ;;  %v1628_v31 = vsel %vm1616_vm12, %v1595_v33, %v1313_v36 }
 0x1cc   : > { %1238 = vrot.lane.b32.xlu1 %v4683_v41, %s2600_s10  ;;  %2409 = vmatmul.mubr.msk.f32.gmra.mxu0 %vm1655_vm13, %v1628_v31  ;;  %v1531_v18 = vsel %vm1517_vm9, %v1498_v61, %v1029_v15  ;;  %v4697_v15 = vld [vmem:[#allocation29_spill] sm:$0xff] }
 0x1cd   : > { %860 = vrot.lane.b32.xlu0 %v3906_v14, %s2596_s8 }
 0x1ce   : > { %v1123_v4 = vpop.permute.xlu1 %1122 }
 0x1cf   : > { %v1125_v12 = vpop.permute.xlu0 %1124  ;;  %v1563_v19 = vsel %vm1550_vm10, %v1530_v21, %v1123_v4  ;;  %v2522_v4 = vld [vmem:[#allocation2 + $0xb0] sm:$0xff] }
 0x1d0   : > { %954 = vrot.lane.b32.xlu1 %v4683_v41, %s2597_s9  ;;  %v1564_v52 = vsel %vm1550_vm10, %v1531_v18, %v1125_v12  ;;  %v1401_v3 = vsel %vm209_vm0, %v2522_v4, %v4698_v62  ;;  %v4712_v62 = vld [vmem:[#allocation41_spill] sm:$0xff] }
 0x1d1   : > { %1240 = vrot.lane.b32.xlu0 %v4685_v27, %s2600_s10 }
 0x1d2   : > { %v1219_v37 = vpop.permute.xlu1 %1218 }
 0x1d3   : > { %v935_v6 = vpop.permute.xlu0 %934  ;;  %v1596_v60 = vsel %vm1583_vm11, %v1563_v19, %v1219_v37  ;;  %v4702_v37 = vld [vmem:[#allocation40_spill] sm:$0xff] }
 0x1d4   : > { %1334 = vrot.lane.b32.xlu1 %v4688_v0, %s2601_s11  ;;  %v1499_v10 = vsel %vm1484_vm8, %v1466_v57, %v935_v6 }
 0x1d5   : > { %956 = vrot.lane.b32.xlu0 %v4685_v27, %s2597_s9  ;;  %v4700_v27 = vld [vmem:[#allocation65_spill] sm:$0xff] }
 0x1d6   : > { %v1221_v59 = vpop.permute.xlu1 %1220  ;;  %v1434_v22 = vsel %vm1418_vm6, %v1401_v3, %v4700_v27  ;;  %v376_v3 = vld [vmem:[#allocation2 + $0x180] sm:$0xff] }
 0x1d7   : > { %v1315_v40 = vpop.permute.xlu0 %1314  ;;  %v1597_v2 = vsel %vm1583_vm11, %v1564_v52, %v1221_v59  ;;  %v1467_v5 = vsel %vm1451_vm7, %v1434_v22, %v4701_v48  ;;  %v4008_v59 = vld [vmem:[#allocation2 + $0x168] sm:$0xff] }
 0x1d8   : > { %v1629_v50 = vsel %vm1616_vm12, %v1596_v60, %v1315_v40  ;;  %1050 = vrot.lane.b32.xlu1 %v4688_v0, %s2598_s12  ;;  %v377_v22 = vld [vmem:[#allocation2 + $0x188] sm:$0xff] }
 0x1d9   : > { %1336 = vrot.lane.b32.xlu0 %v4689_v13, %s2601_s11  ;;  %2411 = vmatprep.mubr.msk.f32.mxu0 %vm1655_vm13, %v1629_v50 }
 0x1da   : > { %v937_v11 = vpop.permute.xlu1 %936 }
 0x1db   : > { %v1031_v35 = vpop.permute.xlu0 %1030  ;;  %v1500_v44 = vsel %vm1484_vm8, %v1467_v5, %v937_v11  ;;  %v596_v5 = vrot.slane %v377_v22, 1 }
 0x1dc   : > { %1052 = vrot.lane.b32.xlu1 %v4689_v13, %s2598_s12  ;;  %v1532_v1 = vsel %vm1517_vm9, %v1499_v10, %v1031_v35  ;;  %v4704_v35 = vld [vmem:[#allocation7_spill] sm:$0xff] }
 0x1dd   : > { %1146 = vrot.lane.b32.xlu0 %v3952_v26, %s2599_s23  ;;  %v1435_v51 = vsel %vm1418_vm6, %v1402_v54, %v4704_v35  ;;  %v2528_v54 = vld [vmem:[#allocation2 + $0xe0] sm:$0xff]  ;;  %v4716_v35 = vld [vmem:[#allocation50_spill] sm:$0xff] }
 0x1de   : > { %v1317_v55 = vpop.permute.xlu1 %1316  ;;  %v1468_v11 = vsel %vm1451_vm7, %v1435_v51, %v4705_v58  ;;  %v1405_v51 = vsel %vm209_vm0, %v2528_v54, %v4716_v35 }
 0x1df   : > { %v1033_v46 = vpop.permute.xlu0 %1032  ;;  %v1630_v34 = vsel %vm1616_vm12, %v1597_v2, %v1317_v55  ;;  %v4706_v55 = vld [vmem:[#allocation28_spill] sm:$0xff] }
 0x1e0   : > { %862 = vrot.lane.b32.xlu1 %v3952_v26, %s2596_s8  ;;  %2412 = vmatmul.mubr.msk.f32.gmra.mxu0 %vm1655_vm13, %v1630_v34  ;;  %v1533_v21 = vsel %vm1517_vm9, %v1500_v44, %v1033_v46 }
 0x1e1   : > { %1148 = vrot.lane.b32.xlu0 %v3962_v30, %s2599_s23 }
 0x1e2   : > { %v1127_v28 = vpop.permute.xlu1 %1126 }
 0x1e3   : > { %v1129_v45 = vpop.permute.xlu0 %1128  ;;  %v1565_v33 = vsel %vm1550_vm10, %v1532_v1, %v1127_v28 }
 0x1e4   : > { %1242 = vrot.lane.b32.xlu1 %v4695_v20, %s2600_s10  ;;  %v1566_v19 = vsel %vm1550_vm10, %v1533_v21, %v1129_v45  ;;  %v4713_v21 = vld [vmem:[#allocation47_spill] sm:$0xff] }
 0x1e5   : > { %864 = vrot.lane.b32.xlu0 %v3962_v30, %s2596_s8 }
 0x1e6   : > { %v1223_v9 = vpop.permute.xlu1 %1222 }
 0x1e7   : > { %v939_v56 = vpop.permute.xlu0 %938  ;;  %v1598_v36 = vsel %vm1583_vm11, %v1565_v33, %v1223_v9  ;;  %v4711_v33 = vld [vmem:[#allocation39_spill] sm:$0xff] }
 0x1e8   : > { %958 = vrot.lane.b32.xlu1 %v4695_v20, %s2597_s9  ;;  %v1501_v18 = vsel %vm1484_vm8, %v1468_v11, %v939_v56  ;;  %v4709_v20 = vld [vmem:[#allocation67_spill] sm:$0xff]  ;;  %v4710_v56 = vld [vmem:[#allocation78_spill] sm:$0xff]  ;;  %v4717_v11 = vld [vmem:[#allocation69_spill] sm:$0xff] }
 0x1e9   : > { %1244 = vrot.lane.b32.xlu0 %v4697_v15, %s2600_s10  ;;  %v1436_v23 = vsel %vm1418_vm6, %v1403_v32, %v4709_v20 }
 0x1ea   : > { %v1225_v12 = vpop.permute.xlu1 %1224  ;;  %v1469_v10 = vsel %vm1451_vm7, %v1436_v23, %v4710_v56 }
 0x1eb   : > { %v1319_v31 = vpop.permute.xlu0 %1318  ;;  %v1599_v60 = vsel %vm1583_vm11, %v1566_v19, %v1225_v12 }
 0x1ec   : > { %v1631_v41 = vsel %vm1616_vm12, %v1598_v36, %v1319_v31  ;;  %1338 = vrot.lane.b32.xlu1 %v4699_v38, %s2601_s11 }
 0x1ed   : > { %960 = vrot.lane.b32.xlu0 %v4697_v15, %s2597_s9  ;;  %2414 = vmatprep.mubr.msk.f32.mxu0 %vm1655_vm13, %v1631_v41 }
 0x1ee   : > { %v941_v6 = vpop.permute.xlu1 %940 }
 0x1ef   : > { %v1035_v53 = vpop.permute.xlu0 %1034  ;;  %v1502_v1 = vsel %vm1484_vm8, %v1469_v10, %v941_v6  ;;  %v378_v6 = vld [vmem:[#allocation2 + $0x190] sm:$0x3] }
 0x1f0   : > { %1054 = vrot.lane.b32.xlu1 %v4699_v38, %s2598_s12  ;;  %v1534_v46 = vsel %vm1517_vm9, %v1501_v18, %v1035_v53  ;;  %v595_v53 = vrot.slane %v376_v3, 1  ;;  %v1438_v18 = vsel %vm1418_vm6, %v1405_v51, %v4717_v11  ;;  %v603_v23 = vrot.slane %v378_v6, 2  ;;  %v2530_v51 = vld [vmem:[#allocation2 + $0xf8] sm:$0xff] }
 0x1f1   : > { %1340 = vrot.lane.b32.xlu0 %v4702_v37, %s2601_s11 }
 0x1f2   : > { %v1321_v40 = vpop.permute.xlu1 %1320 }
 0x1f3   : > { %v1037_v0 = vpop.permute.xlu0 %1036  ;;  %v1632_v50 = vsel %vm1616_vm12, %v1599_v60, %v1321_v40  ;;  %v4714_v60 = vld [vmem:[#allocation66_spill] sm:$0xff] }
 0x1f4   : > { %1056 = vrot.lane.b32.xlu1 %v4702_v37, %s2598_s12  ;;  %2415 = vmatmul.mubr.msk.f32.gmra.mxu0 %vm1655_vm13, %v1632_v50  ;;  %v1535_v15 = vsel %vm1517_vm9, %v1502_v1, %v1037_v0  ;;  %v2527_v37 = vld [vmem:[#allocation2 + $0xd8] sm:$0xff]  ;;  %v598_v0 = vrot.slane %v378_v6, 1 }
 0x1f5   : > { %1150 = vrot.lane.b32.xlu0 %v4008_v59, %s2599_s23  ;;  %v1404_v19 = vsel %vm209_vm0, %v2527_v37, %v4713_v21  ;;  %v4118_v37 = vld [vmem:[%s4497_s2] ss:$0 sm:$0xff]  ;;  %v2529_v21 = vld [vmem:[#allocation2 + $0xf0] sm:$0xff] }
 0x1f6   : > { %v1131_v42 = vpop.permute.xlu1 %1130  ;;  %v1437_v40 = vsel %vm1418_vm6, %v1404_v19, %v4714_v60  ;;  %v4719_v19 = vld [vmem:[#allocation49_spill] sm:$0xff] }
 0x1f7   : > { %v1133_v13 = vpop.permute.xlu0 %1132  ;;  %v1567_v2 = vsel %vm1550_vm10, %v1534_v46, %v1131_v42  ;;  %v4715_v42 = vld [vmem:[#allocation13_spill] sm:$0xff]  ;;  %v599_v46 = vsel %vm430_vm3, %v596_v5, %v598_v0  ;;  %v1406_v0 = vsel %vm209_vm0, %v2529_v21, %v4719_v19 }
 0x1f8   : > { %866 = vrot.lane.b32.xlu1 %v4008_v59, %s2596_s8  ;;  %v1568_v36 = vsel %vm1550_vm10, %v1535_v15, %v1133_v13  ;;  %v597_v13 = vsel %vm430_vm3, %v595_v53, %v596_v5  ;;  %v1470_v24 = vsel %vm1451_vm7, %v1437_v40, %v4715_v42 }
 0x1f9   : > { %1152 = vrot.lane.b32.xlu0 %v4017_v17, %s2599_s23 }
 0x1fa   : > { %v1227_v52 = vpop.permute.xlu1 %1226 }
 0x1fb   : > { %v943_v61 = vpop.permute.xlu0 %942  ;;  %v1600_v34 = vsel %vm1583_vm11, %v1567_v2, %v1227_v52  ;;  %v4718_v2 = vld [vmem:[#allocation80_spill] sm:$0xff] }
 0x1fc   : > { %1246 = vrot.lane.b32.xlu1 %v4706_v55, %s2600_s10  ;;  %v1503_v58 = vsel %vm1484_vm8, %v1470_v24, %v943_v61 }
 0x1fd   : > { %868 = vrot.lane.b32.xlu0 %v4017_v17, %s2596_s8 }
 0x1fe   : > { %v1229_v28 = vpop.permute.xlu1 %1228 }
 0x1ff   : > { %v1323_v45 = vpop.permute.xlu0 %1322  ;;  %v1601_v41 = vsel %vm1583_vm11, %v1568_v36, %v1229_v28  ;;  %v601_v28 = vrot.slane %v377_v22, 2  ;;  %v379_v36 = vld [vmem:[#allocation2 + $0x198] sm:$0xff] }
 0x200   : > { %v1633_v29 = vsel %vm1616_vm12, %v1600_v34, %v1323_v45  ;;  %962 = vrot.lane.b32.xlu1 %v4706_v55, %s2597_s9  ;;  %v1471_v55 = vsel %vm1451_vm7, %v1438_v18, %v4718_v2  ;;  %v600_v45 = vrot.slane %v376_v3, 2  ;;  %v4722_v18 = vld [vmem:[#allocation79_spill] sm:$0xff] }
 0x201   : > { %1248 = vrot.lane.b32.xlu0 %v4707_v63, %s2600_s10  ;;  %2417 = vmatprep.mubr.msk.f32.mxu1 %vm1655_vm13, %v1633_v29  ;;  %v604_v15 = vsel %vm511_vm4, %v601_v28, %v603_v23 }
 0x202   : > { %v945_v9 = vpop.permute.xlu1 %944  ;;  %v602_v10 = vsel %vm511_vm4, %v600_v45, %v601_v28 }
 0x203   : > { %v1039_v57 = vpop.permute.xlu0 %1038  ;;  %v1504_v61 = vsel %vm1484_vm8, %v1471_v55, %v945_v9  ;;  %v4723_v55 = vld [vmem:[#allocation71_spill] sm:$0xff] }
 0x204   : > { %1342 = vrot.lane.b32.xlu1 %v4711_v33, %s2601_s11  ;;  %v1536_v52 = vsel %vm1517_vm9, %v1503_v58, %v1039_v57  ;;  %v4721_v58 = vld [vmem:[#allocation52_spill] sm:$0xff] }
 0x205   : > { %964 = vrot.lane.b32.xlu0 %v4707_v63, %s2597_s9  ;;  %v1407_v11 = vsel %vm209_vm0, %v2530_v51, %v4721_v58 }
 0x206   : > { %v1325_v12 = vpop.permute.xlu1 %1324 }
 0x207   : > { %v1041_v31 = vpop.permute.xlu0 %1040  ;;  %v1634_v4 = vsel %vm1616_vm12, %v1601_v41, %v1325_v12  ;;  %v608_v12 = vrot.slane %v379_v36, 1 }
 0x208   : > { %1058 = vrot.lane.b32.xlu1 %v4711_v33, %s2598_s12  ;;  %2418 = vmatmul.mubr.msk.f32.vlgmr.msra.gmra.mxu1 %vm1655_vm13, %v1634_v4  ;;  %v1537_v16 = vsel %vm1517_vm9, %v1504_v61, %v1041_v31  ;;  %v380_v31 = vld [vmem:[#allocation2 + $0x1a0] sm:$0xff] }
 0x209   : > { %1344 = vrot.lane.b32.xlu0 %v4712_v62, %s2601_s11  ;;  %v609_v4 = vrot.slane %v380_v31, 1  ;;  %v614_v53 = vrot.slane %v380_v31, 2 }
 0x20a   : > { %v1135_v27 = vpop.permute.xlu1 %1134 }
 0x20b   : > { %v1137_v38 = vpop.permute.xlu0 %1136  ;;  %v1569_v34 = vsel %vm1550_vm10, %v1536_v52, %v1135_v27  ;;  %v613_v27 = vrot.slane %v379_v36, 2 }
 0x20c   : > { %1060 = vrot.lane.b32.xlu1 %v4712_v62, %s2598_s12  ;;  %v1570_v20 = vsel %vm1550_vm10, %v1537_v16, %v1137_v38  ;;  %v381_v38 = vld [vmem:[#allocation2 + $0x1a8] sm:$0x3] }
 0x20d   : > { %1154 = vrot.lane.b32.xlu0 %v376_v3, %s2599_s23  ;;  %v611_v6 = vrot.slane %v381_v38, 1  ;;  %v615_v40 = vsel %vm511_vm4, %v613_v27, %v614_v53 }
 0x20e   : > { %v1231_v44 = vpop.permute.xlu1 %1230 }
 0x20f   : > { %v4064_v48 = vpop.permute.xlu0 %852  ;;  %v1602_v63 = vsel %vm1583_vm11, %v1569_v34, %v1231_v44  ;;  %v612_v35 = vsel %vm430_vm3, %v609_v4, %v611_v6  ;;  %v1440_v34 = vsel %vm1418_vm6, %v1407_v11, %v4723_v55 }
 0x210   : > { %870 = vrot.lane.b32.xlu1 %v376_v3, %s2596_s8 }
 0x211   : > { %1156 = vrot.lane.b32.xlu0 %v377_v22, %s2599_s23 }
 0x212   : > { %v4075_v39 = vpop.permute.xlu1 %946 }
 0x213   : > { %v1233_v50 = vpop.permute.xlu0 %1232 }
 0x214   : > { %1250 = vrot.lane.b32.xlu1 %v597_v13, %s2600_s10  ;;  %v1603_v57 = vsel %vm1583_vm11, %v1570_v20, %v1233_v50  ;;  %v616_v50 = vrot.slane %v381_v38, 2 }
 0x215   : > { %872 = vrot.lane.b32.xlu0 %v377_v22, %s2596_s8  ;;  %v610_v22 = vsel %vm430_vm3, %v608_v12, %v609_v4 }
 0x216   : > { %v1327_v49 = vpop.permute.xlu1 %1326  ;;  %v617_v16 = vsel %vm511_vm4, %v614_v53, %v616_v50 }
 0x217   : > { %v4089_v29 = vpop.permute.xlu0 %948  ;;  %v1635_v32 = vsel %vm1616_vm12, %v1602_v63, %v1327_v49  ;;  %v1473_v63 = vsel %vm1451_vm7, %v1440_v34, %v4064_v48 }
 0x218   : > { %966 = vrot.lane.b32.xlu1 %v597_v13, %s2597_s9  ;;  %2420 = vmatprep.mubr.msk.f32.mxu1 %vm1655_vm13, %v1635_v32  ;;  %v4720_v13 = vld [vmem:[#allocation68_spill] sm:$0xff] }
 0x219   : > { %1252 = vrot.lane.b32.xlu0 %v599_v46, %s2600_s10  ;;  %v1439_v42 = vsel %vm1418_vm6, %v1406_v0, %v4720_v13  ;;  %v4725_v13 = vld [vmem:[#allocation70_spill] sm:$0xff] }
 0x21a   : > { %v1043_v1 = vpop.permute.xlu1 %1042  ;;  %v1472_v52 = vsel %vm1451_vm7, %v1439_v42, %v4722_v18 }
 0x21b   : > { %v1329_v56 = vpop.permute.xlu0 %1328  ;;  %v1505_v45 = vsel %vm1484_vm8, %v1472_v52, %v4075_v39  ;;  %v4726_v52 = vld [vmem:[#allocation54_spill] sm:$0xff] }
 0x21c   : > { %v1636_v9 = vsel %vm1616_vm12, %v1603_v57, %v1329_v56  ;;  %1346 = vrot.lane.b32.xlu1 %v602_v10, %s2601_s11  ;;  %v1538_v49 = vsel %vm1517_vm9, %v1505_v45, %v1043_v1  ;;  %v1506_v56 = vsel %vm1484_vm8, %v1473_v63, %v4089_v29  ;;  %v4727_v45 = vld [vmem:[#allocation72_spill] sm:$0xff] }
 0x21d   : > { %968 = vrot.lane.b32.xlu0 %v599_v46, %s2597_s9  ;;  %2421 = vmatmul.mubr.msk.f32.gmra.mxu1 %vm1655_vm13, %v1636_v9 }
 0x21e   : > { %v1045_v41 = vpop.permute.xlu1 %1044 }
 0x21f   : > { %v1139_v33 = vpop.permute.xlu0 %1138  ;;  %v1539_v1 = vsel %vm1517_vm9, %v1506_v56, %v1045_v41 }
 0x220   : > { %1062 = vrot.lane.b32.xlu1 %v602_v10, %s2598_s12  ;;  %v1571_v32 = vsel %vm1550_vm10, %v1538_v49, %v1139_v33 }
 0x221   : > { %1348 = vrot.lane.b32.xlu0 %v604_v15, %s2601_s11 }
 0x222   : > { %v4108_v3 = vpop.permute.xlu1 %854 }
 0x223   : > { %v1141_v62 = vpop.permute.xlu0 %1140 }
 0x224   : > { %1064 = vrot.lane.b32.xlu1 %v604_v15, %s2598_s12 }
 0x225   : > { %1158 = vrot.lane.b32.xlu0 %v379_v36, %s2599_s23 }
 0x226   : > { %v1235_v44 = vpop.permute.xlu1 %1234 }
 0x227   : > { %v4113_v5 = vpop.permute.xlu0 %856  ;;  %v1604_v48 = vsel %vm1583_vm11, %v1571_v32, %v1235_v44 }
 0x228   : > { %v2395_v60 = vpop.f32.mrf.mxu0  ;;  %1160 = vrot.lane.b32.xlu1 %v380_v31, %s2599_s23  ;;  %v1572_v31 = vsel %vm1550_vm10, %v1539_v1, %v1141_v62 }
 0x229   : > { %1254 = vrot.lane.b32.xlu0 %v610_v22, %s2600_s10  ;;  %v1828_v24 = vadd.f32 %v2395_v60, %v4118_v37 }
 0x22a   : > { %v1822_v46 = vpop.f32.mrf.mxu0  ;;  %v951_v2 = vpop.permute.xlu1 %950 }
 0x22b   : > { %v1237_v54 = vpop.permute.xlu0 %1236  ;;  %1984 = vst.msk [vmem:[%s4128_s13 + $0x8] sm:$0xff] %vm1418_vm6, %v1828_v24  ;;  %v2086_v28 = vmul.f32 %v1828_v24, %v1828_v24  ;;  %v1823_v61 = vadd.f32 %v4118_v37, %v1822_v46  ;;  %v2016_v39 = vsel %vm1418_vm6, %v1828_v24, 0.0  ;;  %v1409_v46 = vsel %vm209_vm0, %v3789_v47, %v4726_v52  ;;  %v4730_v52 = vld [vmem:[#allocation56_spill] sm:$0xff] }
 0x22c   : > { %1256 = vrot.lane.b32.xlu1 %v612_v35, %s2600_s10  ;;  %v1605_v29 = vsel %vm1583_vm11, %v1572_v31, %v1237_v54  ;;  %s2535_s10 = sshll.u32 %s2602_s19, 4  ;;  %s2536_s10 = int_to_ptr.vmem [resolvable:$false] %s2535_s10 }
 0x22d   : > { %1350 = vrot.lane.b32.xlu0 %v615_v40, %s2601_s11  ;;  %1983 = vst.msk [vmem:[%s4128_s13] sm:$0xff] %vm1418_vm6, %v1823_v61  ;;  %v2015_v20 = vsel %vm1418_vm6, %v1823_v61, 0.0  ;;  %v2085_v23 = vmul.f32 %v1823_v61, %v1823_v61  ;;  %v2118_v15 = vsel %vm1418_vm6, %v2086_v28, 0.0  ;;  %v4724_v40 = vld [vmem:[#allocation51_spill] sm:$0xff]  ;;  %v1442_v28 = vsel %vm1418_vm6, %v1409_v46, %v4727_v45  ;;  %p2538_p0 = scmp.lt.s32.totalorder %s2214_s22, %s2536_s10 }
 0x22e   : > { %v2017_v10 = vadd.f32 %v2016_v39, %v2015_v20  ;;  %v1331_v9 = vpop.permute.xlu1 %1330  ;;  %v1408_v50 = vsel %vm209_vm0, %v3794_v43, %v4724_v40  ;;  %v1411_v46 = vsel %vm209_vm0, %v3846_v8, %v4730_v52 }
 0x22f   : > { %v953_v57 = vpop.permute.xlu0 %952  ;;  %v2117_v33 = vsel %vm1418_vm6, %v2085_v23, 0.0  ;;  %v1637_v36 = vsel %vm1616_vm12, %v1604_v48, %v1331_v9  ;;  %v1441_v42 = vsel %vm1418_vm6, %v1408_v50, %v4725_v13 }
 0x230   : > { %v2119_v12 = vadd.f32 %v2118_v15, %v2117_v33  ;;  %1352 = vrot.lane.b32.xlu1 %v617_v16, %s2601_s11  ;;  %2423 = vmatprep.mubr.msk.f32.mxu1 %vm1655_vm13, %v1637_v36  ;;  %v1474_v58 = vsel %vm1451_vm7, %v1441_v42, %v4108_v3  ;;  %v1475_v3 = vsel %vm1451_vm7, %v1442_v28, %v4113_v5  ;;  %v4729_v42 = vld [vmem:[#allocation6_spill] sm:$0xff]  ;;  %s2537_s11 = scalar_lea.vmem %s2536_s10, 64 }
 0x231   : > { %v1507_v43 = vsel %vm1484_vm8, %v1474_v58, %v951_v2  ;;  %v1508_v2 = vsel %vm1484_vm8, %v1475_v3, %v953_v57  ;;  %p2539_p1 = scmp.lt.s32.totalorder %s2537_s11, %s2531_s7 }
 0x232   : > { %v1047_v41 = vpop.permute.xlu1 %1046 }
 0x233   : > { %v1333_v4 = vpop.permute.xlu0 %1332  ;;  %v1540_v61 = vsel %vm1517_vm9, %v1507_v43, %v1047_v41  ;;  %p2540_p2 = por %p2539_p1, %p2538_p0 }
 0x234   : > { %v1638_v38 = vsel %vm1616_vm12, %v1605_v29, %v1333_v4 }
 0x235   : > { %2424 = vmatmul.mubr.msk.f32.gmra.mxu1 %vm1655_vm13, %v1638_v38  ;;  %p2541_p3 = pnand %p2540_p2, %p2534_p13 }
 0x236   : > { %v1049_v22 = vpop.permute.xlu1 %1048 }
 0x237   : > { %v1143_v27 = vpop.permute.xlu0 %1142  ;;  %v1541_v56 = vsel %vm1517_vm9, %v1508_v2, %v1049_v22 }
 0x238   : > { %v1573_v16 = vsel %vm1550_vm10, %v1540_v61, %v1143_v27 }
 0x23a   : > { %v4171_v6 = vpop.permute.xlu1 %858 }
 0x23b   : > { %v1145_v53 = vpop.permute.xlu0 %1144 }
 0x23c   : > { %v2398_v62 = vpop.f32.mrf.mxu0 }
 0x23d   : > { %v1838_v44 = vadd.f32 %v2398_v62, %v4118_v37 }
 0x23e   : > { %v1832_v19 = vpop.f32.mrf.mxu0  ;;  %v1239_v0 = vpop.permute.xlu1 %1238 }
 0x23f   : > { %v4174_v21 = vpop.permute.xlu0 %860  ;;  %1986 = vst.msk [vmem:[%s4128_s13 + $0x18] sm:$0xff] %vm1418_vm6, %v1838_v44  ;;  %v1833_v60 = vadd.f32 %v4118_v37, %v1832_v19  ;;  %v2088_v24 = vmul.f32 %v1838_v44, %v1838_v44  ;;  %v2020_v55 = vsel %vm1418_vm6, %v1838_v44, 0.0  ;;  %v1606_v39 = vsel %vm1583_vm11, %v1573_v16, %v1239_v0 }
 0x241   : > { %1985 = vst.msk [vmem:[%s4128_s13 + $0x10] sm:$0xff] %vm1418_vm6, %v1833_v60  ;;  %v2018_v54 = vsel %vm1418_vm6, %v1833_v60, 0.0  ;;  %v2087_v35 = vmul.f32 %v1833_v60, %v1833_v60  ;;  %v2122_v47 = vsel %vm1418_vm6, %v2088_v24, 0.0  ;;  %v4728_v60 = vld [vmem:[#allocation53_spill] sm:$0xff] }
 0x242   : > { %v2019_v11 = vadd.f32 %v2018_v54, %v2017_v10  ;;  %v955_v18 = vpop.permute.xlu1 %954  ;;  %v1574_v10 = vsel %vm1550_vm10, %v1541_v56, %v1145_v53  ;;  %v1410_v40 = vsel %vm209_vm0, %v3837_v25, %v4728_v60  ;;  %v4731_v25 = vld [vmem:[#allocation9_spill] sm:$0xff] }
 0x243   : > { %v1241_v51 = vpop.permute.xlu0 %1240  ;;  %v2120_v34 = vsel %vm1418_vm6, %v2087_v35, 0.0  ;;  %v1443_v24 = vsel %vm1418_vm6, %v1410_v40, %v4729_v42 }
 0x244   : > { %v2121_v63 = vadd.f32 %v2120_v34, %v2119_v12  ;;  %v2021_v49 = vadd.f32 %v2020_v55, %v2019_v11  ;;  %v1607_v5 = vsel %vm1583_vm11, %v1574_v10, %v1241_v51  ;;  %v1476_v51 = vsel %vm1451_vm7, %v1443_v24, %v4171_v6  ;;  %v4735_v24 = vld [vmem:[#allocation74_spill] sm:$0xff] }
 0x245   : > { %v1509_v43 = vsel %vm1484_vm8, %v1476_v51, %v955_v18  ;;  %v1444_v55 = vsel %vm1418_vm6, %v1411_v46, %v4731_v25 }
 0x246   : > { %v1335_v20 = vpop.permute.xlu1 %1334  ;;  %v2123_v23 = vadd.f32 %v2122_v47, %v2121_v63  ;;  %v1477_v45 = vsel %vm1451_vm7, %v1444_v55, %v4174_v21 }
 0x247   : > { %v957_v32 = vpop.permute.xlu0 %956  ;;  %v1639_v48 = vsel %vm1616_vm12, %v1606_v39, %v1335_v20 }
 0x248   : > { %2426 = vmatprep.mubr.msk.f32.mxu1 %vm1655_vm13, %v1639_v48  ;;  %v1510_v6 = vsel %vm1484_vm8, %v1477_v45, %v957_v32 }
 0x24a   : > { %v1051_v57 = vpop.permute.xlu1 %1050 }
 0x24b   : > { %v1337_v9 = vpop.permute.xlu0 %1336  ;;  %v1542_v34 = vsel %vm1517_vm9, %v1509_v43, %v1051_v57 }
 0x24c   : > { %v1640_v1 = vsel %vm1616_vm12, %v1607_v5, %v1337_v9 }
 0x24d   : > { %2427 = vmatmul.mubr.msk.f32.gmra.mxu1 %vm1655_vm13, %v1640_v1 }
 0x24e   : > { %v1053_v33 = vpop.permute.xlu1 %1052 }
 0x24f   : > { %v1147_v15 = vpop.permute.xlu0 %1146  ;;  %v1543_v8 = vsel %vm1517_vm9, %v1510_v6, %v1053_v33 }
 0x250   : > { %v2401_v36 = vpop.f32.mrf.mxu0  ;;  %v1575_v28 = vsel %vm1550_vm10, %v1542_v34, %v1147_v15 }
 0x251   : > { %v1848_v31 = vadd.f32 %v2401_v36, %v4118_v37 }
 0x252   : > { %v1842_v29 = vpop.f32.mrf.mxu0  ;;  %v4212_v4 = vpop.permute.xlu1 %862 }
 0x253   : > { %v1149_v12 = vpop.permute.xlu0 %1148  ;;  %1988 = vst.msk [vmem:[%s4128_s13 + $0x28] sm:$0xff] %vm1418_vm6, %v1848_v31  ;;  %v1843_v38 = vadd.f32 %v4118_v37, %v1842_v29  ;;  %v2090_v41 = vmul.f32 %v1848_v31, %v1848_v31  ;;  %v2024_v19 = vsel %vm1418_vm6, %v1848_v31, 0.0 }
 0x254   : > { %v1576_v3 = vsel %vm1550_vm10, %v1543_v8, %v1149_v12 }
 0x255   : > { %1987 = vst.msk [vmem:[%s4128_s13 + $0x20] sm:$0xff] %vm1418_vm6, %v1843_v38  ;;  %v2022_v27 = vsel %vm1418_vm6, %v1843_v38, 0.0  ;;  %v2089_v22 = vmul.f32 %v1843_v38, %v1843_v38  ;;  %v2126_v54 = vsel %vm1418_vm6, %v2090_v41, 0.0 }
 0x256   : > { %v2023_v62 = vadd.f32 %v2022_v27, %v2021_v49  ;;  %v1243_v44 = vpop.permute.xlu1 %1242 }
 0x257   : > { %v4220_v53 = vpop.permute.xlu0 %864  ;;  %v2124_v0 = vsel %vm1418_vm6, %v2089_v22, 0.0  ;;  %v1608_v63 = vsel %vm1583_vm11, %v1575_v28, %v1243_v44  ;;  %v4732_v22 = vld [vmem:[#allocation55_spill] sm:$0xff] }
 0x258   : > { %v2125_v50 = vadd.f32 %v2124_v0, %v2123_v23  ;;  %v2025_v13 = vadd.f32 %v2024_v19, %v2023_v62  ;;  %v1412_v62 = vsel %vm209_vm0, %v3892_v7, %v4732_v22  ;;  %v4733_v44 = vld [vmem:[#allocation31_spill] sm:$0xff] }
 0x259   : > { %v1445_v19 = vsel %vm1418_vm6, %v1412_v62, %v4733_v44 }
 0x25a   : > { %v959_v58 = vpop.permute.xlu1 %958  ;;  %v2127_v11 = vadd.f32 %v2126_v54, %v2125_v50  ;;  %v1478_v60 = vsel %vm1451_vm7, %v1445_v19, %v4212_v4  ;;  %v4734_v50 = vld [vmem:[#allocation58_spill] sm:$0xff] }
 0x25b   : > { %v1245_v35 = vpop.permute.xlu0 %1244  ;;  %v1511_v42 = vsel %vm1484_vm8, %v1478_v60, %v959_v58 }
 0x25c   : > { %v1609_v21 = vsel %vm1583_vm11, %v1576_v3, %v1245_v35 }
 0x25e   : > { %v1339_v49 = vpop.permute.xlu1 %1338 }
 0x25f   : > { %v961_v61 = vpop.permute.xlu0 %960  ;;  %v1641_v18 = vsel %vm1616_vm12, %v1608_v63, %v1339_v49 }
 0x260   : > { %2429 = vmatprep.mubr.msk.f32.mxu1 %vm1655_vm13, %v1641_v18 }
 0x262   : > { %v1055_v2 = vpop.permute.xlu1 %1054 }
 0x263   : > { %v1341_v16 = vpop.permute.xlu0 %1340  ;;  %v1544_v35 = vsel %vm1517_vm9, %v1511_v42, %v1055_v2 }
 0x264   : > { %v1642_v47 = vsel %vm1616_vm12, %v1609_v21, %v1341_v16  ;;  %v2404_v32 = vpop.f32.mrf.mxu0 }
 0x265   : > { %2430 = vmatmul.mubr.msk.f32.gmra.mxu1 %vm1655_vm13, %v1642_v47  ;;  %v1858_v39 = vadd.f32 %v2404_v32, %v4118_v37 }
 0x266   : > { %v1852_v23 = vpop.f32.mrf.mxu0  ;;  %v1057_v56 = vpop.permute.xlu1 %1056 }
 0x267   : > { %v1151_v20 = vpop.permute.xlu0 %1150  ;;  %1990 = vst.msk [vmem:[%s4128_s13 + $0x38] sm:$0xff] %vm1418_vm6, %v1858_v39  ;;  %v1853_v48 = vadd.f32 %v4118_v37, %v1852_v23  ;;  %v2092_v10 = vmul.f32 %v1858_v39, %v1858_v39  ;;  %v2028_v33 = vsel %vm1418_vm6, %v1858_v39, 0.0 }
 0x268   : > { %v1577_v51 = vsel %vm1550_vm10, %v1544_v35, %v1151_v20 }
 0x269   : > { %1989 = vst.msk [vmem:[%s4128_s13 + $0x30] sm:$0xff] %vm1418_vm6, %v1853_v48  ;;  %v2026_v5 = vsel %vm1418_vm6, %v1853_v48, 0.0  ;;  %v2091_v9 = vmul.f32 %v1853_v48, %v1853_v48  ;;  %v2130_v29 = vsel %vm1418_vm6, %v2092_v10, 0.0 }
 0x26a   : > { %v2027_v57 = vadd.f32 %v2026_v5, %v2025_v13  ;;  %v867_v15 = vpop.permute.xlu1 %866  ;;  %v1413_v13 = vsel %vm209_vm0, %v3906_v14, %v4734_v50  ;;  %v4736_v5 = vld [vmem:[#allocation57_spill] sm:$0xff] }
 0x26b   : > { %v1153_v1 = vpop.permute.xlu0 %1152  ;;  %v2128_v36 = vsel %vm1418_vm6, %v2091_v9, 0.0  ;;  %v1446_v54 = vsel %vm1418_vm6, %v1413_v13, %v4735_v24  ;;  %v1414_v9 = vsel %vm209_vm0, %v3952_v26, %v4736_v5 }
 0x26c   : > { %v2129_v31 = vadd.f32 %v2128_v36, %v2127_v11  ;;  %v2029_v12 = vadd.f32 %v2028_v33, %v2027_v57  ;;  %v1479_v7 = vsel %vm1451_vm7, %v1446_v54, %v4220_v53 }
 0x26d   : > { %v1512_v4 = vsel %vm1484_vm8, %v1479_v7, %v961_v61 }
 0x26e   : > { %v1247_v41 = vpop.permute.xlu1 %1246  ;;  %v2131_v27 = vadd.f32 %v2130_v29, %v2129_v31  ;;  %v1545_v14 = vsel %vm1517_vm9, %v1512_v4, %v1057_v56 }
 0x26f   : > { %v869_v38 = vpop.permute.xlu0 %868  ;;  %v1610_v52 = vsel %vm1583_vm11, %v1577_v51, %v1247_v41  ;;  %v1578_v43 = vsel %vm1550_vm10, %v1545_v14, %v1153_v1  ;;  %v4737_v1 = vld [vmem:[#allocation73_spill] sm:$0xff] }
 0x270   : > { %v1447_v57 = vsel %vm1418_vm6, %v1414_v9, %v4737_v1 }
 0x271   : > { %v1480_v36 = vsel %vm1451_vm7, %v1447_v57, %v867_v15 }
 0x272   : > { %v963_v40 = vpop.permute.xlu1 %962 }
 0x273   : > { %v1249_v0 = vpop.permute.xlu0 %1248  ;;  %v1513_v41 = vsel %vm1484_vm8, %v1480_v36, %v963_v40 }
 0x274   : > { %v1611_v53 = vsel %vm1583_vm11, %v1578_v43, %v1249_v0 }
 0x276   : > { %v1343_v46 = vpop.permute.xlu1 %1342 }
 0x277   : > { %v965_v11 = vpop.permute.xlu0 %964  ;;  %v1643_v58 = vsel %vm1616_vm12, %v1610_v52, %v1343_v46 }
 0x278   : > { %v2407_v25 = vpop.f32.mrf.mxu0  ;;  %2432 = vmatprep.mubr.msk.f32.mxu1 %vm1655_vm13, %v1643_v58 }
 0x279   : > { %v1868_v55 = vadd.f32 %v2407_v25, %v4118_v37 }
 0x27a   : > { %v1862_v28 = vpop.f32.mrf.mxu0  ;;  %v1059_v61 = vpop.permute.xlu1 %1058 }
 0x27b   : > { %v1345_v34 = vpop.permute.xlu0 %1344  ;;  %1992 = vst.msk [vmem:[%s4128_s13 + $0x48] sm:$0xff] %vm1418_vm6, %v1868_v55  ;;  %v1863_v6 = vadd.f32 %v4118_v37, %v1862_v28  ;;  %v2094_v63 = vmul.f32 %v1868_v55, %v1868_v55  ;;  %v2032_v16 = vsel %vm1418_vm6, %v1868_v55, 0.0  ;;  %v1546_v62 = vsel %vm1517_vm9, %v1513_v41, %v1059_v61  ;;  %v4740_v28 = vld [vmem:[#allocation59_spill] sm:$0xff] }
 0x27c   : > { %v1644_v45 = vsel %vm1616_vm12, %v1611_v53, %v1345_v34  ;;  %v1416_v61 = vsel %vm209_vm0, %v4008_v59, %v4740_v28 }
 0x27d   : > { %2433 = vmatmul.mubr.msk.f32.gmra.mxu1 %vm1655_vm13, %v1644_v45  ;;  %1991 = vst.msk [vmem:[%s4128_s13 + $0x40] sm:$0xff] %vm1418_vm6, %v1863_v6  ;;  %v2030_v49 = vsel %vm1418_vm6, %v1863_v6, 0.0  ;;  %v2093_v8 = vmul.f32 %v1863_v6, %v1863_v6  ;;  %v2134_v39 = vsel %vm1418_vm6, %v2094_v63, 0.0  ;;  %v4741_v6 = vld [vmem:[#allocation75_spill] sm:$0xff] }
 0x27e   : > { %v2031_v3 = vadd.f32 %v2030_v49, %v2029_v12  ;;  %v1061_v21 = vpop.permute.xlu1 %1060  ;;  %v4738_v12 = vld [vmem:[#allocation60_spill] sm:$0xff]  ;;  %v1449_v63 = vsel %vm1418_vm6, %v1416_v61, %v4741_v6 }
 0x27f   : > { %v1155_v18 = vpop.permute.xlu0 %1154  ;;  %v2132_v47 = vsel %vm1418_vm6, %v2093_v8, 0.0  ;;  %v1415_v29 = vsel %vm209_vm0, %v3962_v30, %v4738_v12 }
 0x280   : > { %v2133_v2 = vadd.f32 %v2132_v47, %v2131_v27  ;;  %v2033_v32 = vadd.f32 %v2032_v16, %v2031_v3  ;;  %v4739_v27 = vld [vmem:[#allocation76_spill] sm:$0xff]  ;;  %v1579_v19 = vsel %vm1550_vm10, %v1546_v62, %v1155_v18  ;;  %v4742_v16 = vld [vmem:[#allocation61_spill] sm:$0xff] }
 0x281   : > { %v1448_v22 = vsel %vm1418_vm6, %v1415_v29, %v4739_v27  ;;  %v1417_v47 = vsel %vm209_vm0, %v4017_v17, %v4742_v16 }
 0x282   : > { %v871_v23 = vpop.permute.xlu1 %870  ;;  %v2135_v56 = vadd.f32 %v2134_v39, %v2133_v2  ;;  %v1481_v44 = vsel %vm1451_vm7, %v1448_v22, %v869_v38 }
 0x283   : > { %v1157_v20 = vpop.permute.xlu0 %1156  ;;  %v1514_v60 = vsel %vm1484_vm8, %v1481_v44, %v965_v11  ;;  %v1482_v49 = vsel %vm1451_vm7, %v1449_v63, %v871_v23 }
 0x284   : > { %v1547_v13 = vsel %vm1517_vm9, %v1514_v60, %v1061_v21 }
 0x285   : > { %v1580_v24 = vsel %vm1550_vm10, %v1547_v13, %v1157_v20 }
 0x286   : > { %v1251_v10 = vpop.permute.xlu1 %1250 }
 0x287   : > { %v873_v48 = vpop.permute.xlu0 %872  ;;  %v1612_v30 = vsel %vm1583_vm11, %v1579_v19, %v1251_v10 }
 0x28a   : > { %v967_v31 = vpop.permute.xlu1 %966 }
 0x28b   : > { %v1253_v33 = vpop.permute.xlu0 %1252  ;;  %v1515_v18 = vsel %vm1484_vm8, %v1482_v49, %v967_v31 }
 0x28c   : > { %v2410_v26 = vpop.f32.mrf.mxu0  ;;  %v1613_v54 = vsel %vm1583_vm11, %v1580_v24, %v1253_v33 }
 0x28d   : > { %v1878_v15 = vadd.f32 %v2410_v26, %v4118_v37 }
 0x28e   : > { %v1872_v50 = vpop.f32.mrf.mxu0  ;;  %v1347_v40 = vpop.permute.xlu1 %1346 }
 0x28f   : > { %v969_v0 = vpop.permute.xlu0 %968  ;;  %1994 = vst.msk [vmem:[%s4128_s13 + $0x58] sm:$0xff] %vm1418_vm6, %v1878_v15  ;;  %v1873_v42 = vadd.f32 %v4118_v37, %v1872_v50  ;;  %v1645_v38 = vsel %vm1616_vm12, %v1612_v30, %v1347_v40  ;;  %v2096_v35 = vmul.f32 %v1878_v15, %v1878_v15  ;;  %v2036_v14 = vsel %vm1418_vm6, %v1878_v15, 0.0 }
 0x290   : > { %2435 = vmatprep.mubr.msk.f32.mxu1 %vm1655_vm13, %v1645_v38 }
 0x291   : > { %1993 = vst.msk [vmem:[%s4128_s13 + $0x50] sm:$0xff] %vm1418_vm6, %v1873_v42  ;;  %v2034_v7 = vsel %vm1418_vm6, %v1873_v42, 0.0  ;;  %v2095_v51 = vmul.f32 %v1873_v42, %v1873_v42  ;;  %v2138_v53 = vsel %vm1418_vm6, %v2096_v35, 0.0 }
 0x292   : > { %v2035_v4 = vadd.f32 %v2034_v7, %v2033_v32  ;;  %v1063_v46 = vpop.permute.xlu1 %1062  ;;  %v4743_v32 = vld [vmem:[#allocation77_spill] sm:$0xff] }
 0x293   : > { %v1349_v11 = vpop.permute.xlu0 %1348  ;;  %v2136_v58 = vsel %vm1418_vm6, %v2095_v51, 0.0  ;;  %v1548_v21 = vsel %vm1517_vm9, %v1515_v18, %v1063_v46  ;;  %v1450_v59 = vsel %vm1418_vm6, %v1417_v47, %v4743_v32 }
 0x294   : > { %v1646_v52 = vsel %vm1616_vm12, %v1613_v54, %v1349_v11  ;;  %v2137_v43 = vadd.f32 %v2136_v58, %v2135_v56  ;;  %v2037_v25 = vadd.f32 %v2036_v14, %v2035_v4  ;;  %v1483_v23 = vsel %vm1451_vm7, %v1450_v59, %v873_v48 }
 0x295   : > { %2436 = vmatmul.mubr.msk.f32.gmra.mxu1 %vm1655_vm13, %v1646_v52  ;;  %v1516_v5 = vsel %vm1484_vm8, %v1483_v23, %v969_v0 }
 0x296   : > { %v1065_v34 = vpop.permute.xlu1 %1064  ;;  %v2139_v45 = vadd.f32 %v2138_v53, %v2137_v43 }
 0x297   : > { %v1159_v55 = vpop.permute.xlu0 %1158  ;;  %v1549_v17 = vsel %vm1517_vm9, %v1516_v5, %v1065_v34 }
 0x298   : > { %v1581_v2 = vsel %vm1550_vm10, %v1548_v21, %v1159_v55 }
 0x29a   : > { %v1161_v3 = vpop.permute.xlu1 %1160 }
 0x29b   : > { %v1255_v8 = vpop.permute.xlu0 %1254  ;;  %v1582_v1 = vsel %vm1550_vm10, %v1549_v17, %v1161_v3 }
 0x29c   : > { %v1614_v39 = vsel %vm1583_vm11, %v1581_v2, %v1255_v8 }
 0x29e   : > { %v1257_v10 = vpop.permute.xlu1 %1256 }
 0x29f   : > { %v1351_v20 = vpop.permute.xlu0 %1350  ;;  %v1615_v33 = vsel %vm1583_vm11, %v1582_v1, %v1257_v10 }
 0x2a0   : > { %v1647_v56 = vsel %vm1616_vm12, %v1614_v39, %v1351_v20  ;;  %v2413_v9 = vpop.f32.mrf.mxu0 }
 0x2a1   : > { %2438 = vmatprep.mubr.msk.f32.mxu1 %vm1655_vm13, %v1647_v56  ;;  %v1888_v57 = vadd.f32 %v2413_v9, %v4118_v37 }
 0x2a2   : > { %v1882_v36 = vpop.f32.mrf.mxu0  ;;  %v1353_v31 = vpop.permute.xlu1 %1352 }
 0x2a3   : > { %1996 = vst.msk [vmem:[%s4128_s13 + $0x68] sm:$0xff] %vm1418_vm6, %v1888_v57  ;;  %v1883_v48 = vadd.f32 %v4118_v37, %v1882_v36  ;;  %v1648_v12 = vsel %vm1616_vm12, %v1615_v33, %v1353_v31  ;;  %v2098_v29 = vmul.f32 %v1888_v57, %v1888_v57  ;;  %v2040_v62 = vsel %vm1418_vm6, %v1888_v57, 0.0 }
 0x2a4   : > { %2439 = vmatmul.mubr.msk.f32.gmra.mxu1 %vm1655_vm13, %v1648_v12 }
 0x2a5   : > { %1995 = vst.msk [vmem:[%s4128_s13 + $0x60] sm:$0xff] %vm1418_vm6, %v1883_v48  ;;  %v2038_v41 = vsel %vm1418_vm6, %v1883_v48, 0.0  ;;  %v2097_v27 = vmul.f32 %v1883_v48, %v1883_v48  ;;  %v2142_v15 = vsel %vm1418_vm6, %v2098_v29, 0.0 }
 0x2a6   : > { %v2039_v22 = vadd.f32 %v2038_v41, %v2037_v25 }
 0x2a7   : > { %v2140_v26 = vsel %vm1418_vm6, %v2097_v27, 0.0 }
 0x2a8   : > { %v2141_v44 = vadd.f32 %v2140_v26, %v2139_v45  ;;  %v2041_v19 = vadd.f32 %v2040_v62, %v2039_v22 }
 0x2aa   : > { %v2143_v0 = vadd.f32 %v2142_v15, %v2141_v44 }
 0x2b4   : > { %v2416_v60 = vpop.f32.mrf.mxu0 }
 0x2b5   : > { %v1898_v30 = vadd.f32 %v2416_v60, %v4118_v37 }
 0x2b6   : > { %v1892_v50 = vpop.f32.mrf.mxu0 }
 0x2b7   : > { %1998 = vst.msk [vmem:[%s4128_s13 + $0x78] sm:$0xff] %vm1418_vm6, %v1898_v30  ;;  %v1893_v40 = vadd.f32 %v4118_v37, %v1892_v50  ;;  %v2100_v13 = vmul.f32 %v1898_v30, %v1898_v30  ;;  %v2044_v54 = vsel %vm1418_vm6, %v1898_v30, 0.0 }
 0x2b9   : > { %1997 = vst.msk [vmem:[%s4128_s13 + $0x70] sm:$0xff] %vm1418_vm6, %v1893_v40  ;;  %v2042_v42 = vsel %vm1418_vm6, %v1893_v40, 0.0  ;;  %v2099_v38 = vmul.f32 %v1893_v40, %v1893_v40  ;;  %v2146_v11 = vsel %vm1418_vm6, %v2100_v13, 0.0 }
 0x2ba   : > { %v2043_v24 = vadd.f32 %v2042_v42, %v2041_v19 }
 0x2bb   : > { %v2144_v35 = vsel %vm1418_vm6, %v2099_v38, 0.0 }
 0x2bc   : > { %v2145_v7 = vadd.f32 %v2144_v35, %v2143_v0  ;;  %v2045_v51 = vadd.f32 %v2044_v54, %v2043_v24 }
 0x2be   : > { %v2147_v4 = vadd.f32 %v2146_v11, %v2145_v7 }
 0x2c8   : > { %v2419_v52 = vpop.f32.mrf.mxu1 }
 0x2c9   : > { %v1908_v46 = vadd.f32 %v2419_v52, %v4118_v37 }
 0x2ca   : > { %v1902_v14 = vpop.f32.mrf.mxu1 }
 0x2cb   : > { %2000 = vst.msk [vmem:[%s4128_s13 + $0x88] sm:$0xff] %vm1418_vm6, %v1908_v46  ;;  %v1903_v58 = vadd.f32 %v4118_v37, %v1902_v14  ;;  %v2102_v43 = vmul.f32 %v1908_v46, %v1908_v46  ;;  %v2048_v34 = vsel %vm1418_vm6, %v1908_v46, 0.0 }
 0x2cd   : > { %1999 = vst.msk [vmem:[%s4128_s13 + $0x80] sm:$0xff] %vm1418_vm6, %v1903_v58  ;;  %v2046_v25 = vsel %vm1418_vm6, %v1903_v58, 0.0  ;;  %v2101_v53 = vmul.f32 %v1903_v58, %v1903_v58  ;;  %v2150_v6 = vsel %vm1418_vm6, %v2102_v43, 0.0 }
 0x2ce   : > { %v2047_v55 = vadd.f32 %v2046_v25, %v2045_v51 }
 0x2cf   : > { %v2148_v45 = vsel %vm1418_vm6, %v2101_v53, 0.0 }
 0x2d0   : > { %v2149_v28 = vadd.f32 %v2148_v45, %v2147_v4  ;;  %v2049_v61 = vadd.f32 %v2048_v34, %v2047_v55 }
 0x2d2   : > { %v2151_v63 = vadd.f32 %v2150_v6, %v2149_v28 }
 0x2dd   : > { %v2422_v49 = vpop.f32.mrf.mxu1 }
 0x2de   : > { %v1918_v8 = vadd.f32 %v2422_v49, %v4118_v37 }
 0x2df   : > { %v1912_v18 = vpop.f32.mrf.mxu1 }
 0x2e0   : > { %2002 = vst.msk [vmem:[%s4128_s13 + $0x98] sm:$0xff] %vm1418_vm6, %v1918_v8  ;;  %v1913_v3 = vadd.f32 %v4118_v37, %v1912_v18  ;;  %v2104_v21 = vmul.f32 %v1918_v8, %v1918_v8  ;;  %v2052_v32 = vsel %vm1418_vm6, %v1918_v8, 0.0 }
 0x2e2   : > { %2001 = vst.msk [vmem:[%s4128_s13 + $0x90] sm:$0xff] %vm1418_vm6, %v1913_v3  ;;  %v2050_v16 = vsel %vm1418_vm6, %v1913_v3, 0.0  ;;  %v2103_v47 = vmul.f32 %v1913_v3, %v1913_v3  ;;  %v2154_v23 = vsel %vm1418_vm6, %v2104_v21, 0.0 }
 0x2e3   : > { %v2051_v2 = vadd.f32 %v2050_v16, %v2049_v61 }
 0x2e4   : > { %v2152_v59 = vsel %vm1418_vm6, %v2103_v47, 0.0 }
 0x2e5   : > { %v2153_v39 = vadd.f32 %v2152_v59, %v2151_v63  ;;  %v2053_v20 = vadd.f32 %v2052_v32, %v2051_v2 }
 0x2e7   : > { %v2155_v56 = vadd.f32 %v2154_v23, %v2153_v39 }
 0x2f5   : > { %v2425_v10 = vpop.f32.mrf.mxu1 }
 0x2f6   : > { %v1928_v5 = vadd.f32 %v2425_v10, %v4118_v37 }
 0x2f7   : > { %v1922_v17 = vpop.f32.mrf.mxu1 }
 0x2f8   : > { %2004 = vst.msk [vmem:[%s4128_s13 + $0xa8] sm:$0xff] %vm1418_vm6, %v1928_v5  ;;  %v1923_v9 = vadd.f32 %v4118_v37, %v1922_v17  ;;  %v2106_v1 = vmul.f32 %v1928_v5, %v1928_v5  ;;  %v2056_v31 = vsel %vm1418_vm6, %v1928_v5, 0.0 }
 0x2fa   : > { %2003 = vst.msk [vmem:[%s4128_s13 + $0xa0] sm:$0xff] %vm1418_vm6, %v1923_v9  ;;  %v2054_v57 = vsel %vm1418_vm6, %v1923_v9, 0.0  ;;  %v2105_v33 = vmul.f32 %v1923_v9, %v1923_v9  ;;  %v2158_v41 = vsel %vm1418_vm6, %v2106_v1, 0.0 }
 0x2fb   : > { %v2055_v36 = vadd.f32 %v2054_v57, %v2053_v20 }
 0x2fc   : > { %v2156_v48 = vsel %vm1418_vm6, %v2105_v33, 0.0 }
 0x2fd   : > { %v2157_v12 = vadd.f32 %v2156_v48, %v2155_v56  ;;  %v2057_v29 = vadd.f32 %v2056_v31, %v2055_v36 }
 0x2ff   : > { %v2159_v27 = vadd.f32 %v2158_v41, %v2157_v12 }
 0x30d   : > { %v2428_v22 = vpop.f32.mrf.mxu1 }
 0x30e   : > { %v1938_v62 = vadd.f32 %v2428_v22, %v4118_v37 }
 0x30f   : > { %v1932_v26 = vpop.f32.mrf.mxu1 }
 0x310   : > { %2006 = vst.msk [vmem:[%s4128_s13 + $0xb8] sm:$0xff] %vm1418_vm6, %v1938_v62  ;;  %v1933_v44 = vadd.f32 %v4118_v37, %v1932_v26  ;;  %v2108_v19 = vmul.f32 %v1938_v62, %v1938_v62  ;;  %v2060_v30 = vsel %vm1418_vm6, %v1938_v62, 0.0 }
 0x312   : > { %2005 = vst.msk [vmem:[%s4128_s13 + $0xb0] sm:$0xff] %vm1418_vm6, %v1933_v44  ;;  %v2058_v15 = vsel %vm1418_vm6, %v1933_v44, 0.0  ;;  %v2107_v0 = vmul.f32 %v1933_v44, %v1933_v44  ;;  %v2162_v42 = vsel %vm1418_vm6, %v2108_v19, 0.0 }
 0x313   : > { %v2059_v60 = vadd.f32 %v2058_v15, %v2057_v29 }
 0x314   : > { %v2160_v50 = vsel %vm1418_vm6, %v2107_v0, 0.0 }
 0x315   : > { %v2161_v40 = vadd.f32 %v2160_v50, %v2159_v27  ;;  %v2061_v13 = vadd.f32 %v2060_v30, %v2059_v60 }
 0x317   : > { %v2163_v38 = vadd.f32 %v2162_v42, %v2161_v40 }
 0x325   : > { %v2431_v24 = vpop.f32.mrf.mxu1 }
 0x326   : > { %v1948_v54 = vadd.f32 %v2431_v24, %v4118_v37 }
 0x327   : > { %v1942_v35 = vpop.f32.mrf.mxu1 }
 0x328   : > { %2008 = vst.msk [vmem:[%s4128_s13 + $0xc8] sm:$0xff] %vm1418_vm6, %v1948_v54  ;;  %v1943_v7 = vadd.f32 %v4118_v37, %v1942_v35  ;;  %v2110_v45 = vmul.f32 %v1948_v54, %v1948_v54  ;;  %v2064_v6 = vsel %vm1418_vm6, %v1948_v54, 0.0 }
 0x32a   : > { %2007 = vst.msk [vmem:[%s4128_s13 + $0xc0] sm:$0xff] %vm1418_vm6, %v1943_v7  ;;  %v2109_v46 = vmul.f32 %v1943_v7, %v1943_v7  ;;  %v2062_v43 = vsel %vm1418_vm6, %v1943_v7, 0.0  ;;  %v2166_v8 = vsel %vm1418_vm6, %v2110_v45, 0.0 }
 0x32b   : > { %v2063_v34 = vadd.f32 %v2062_v43, %v2061_v13 }
 0x32c   : > { %v2164_v55 = vsel %vm1418_vm6, %v2109_v46, 0.0 }
 0x32d   : > { %v2165_v61 = vadd.f32 %v2164_v55, %v2163_v38  ;;  %v2065_v49 = vadd.f32 %v2064_v6, %v2063_v34 }
 0x32f   : > { %v2167_v21 = vadd.f32 %v2166_v8, %v2165_v61 }
 0x33d   : > { %v2434_v51 = vpop.f32.mrf.mxu1 }
 0x33e   : > { %v1958_v11 = vadd.f32 %v2434_v51, %v4118_v37 }
 0x33f   : > { %v1952_v4 = vpop.f32.mrf.mxu1 }
 0x340   : > { %2010 = vst.msk [vmem:[%s4128_s13 + $0xd8] sm:$0xff] %vm1418_vm6, %v1958_v11  ;;  %v1953_v52 = vadd.f32 %v4118_v37, %v1952_v4  ;;  %v2112_v16 = vmul.f32 %v1958_v11, %v1958_v11  ;;  %v2068_v32 = vsel %vm1418_vm6, %v1958_v11, 0.0 }
 0x342   : > { %2009 = vst.msk [vmem:[%s4128_s13 + $0xd0] sm:$0xff] %vm1418_vm6, %v1953_v52  ;;  %v2111_v28 = vmul.f32 %v1953_v52, %v1953_v52  ;;  %v2066_v63 = vsel %vm1418_vm6, %v1953_v52, 0.0  ;;  %v2170_v20 = vsel %vm1418_vm6, %v2112_v16, 0.0 }
 0x343   : > { %v2067_v3 = vadd.f32 %v2066_v63, %v2065_v49 }
 0x344   : > { %v2168_v18 = vsel %vm1418_vm6, %v2111_v28, 0.0 }
 0x345   : > { %v2169_v2 = vadd.f32 %v2168_v18, %v2167_v21  ;;  %v2069_v39 = vadd.f32 %v2068_v32, %v2067_v3 }
 0x347   : > { %v2171_v10 = vadd.f32 %v2170_v20, %v2169_v2 }
 0x355   : > { %v2437_v14 = vpop.f32.mrf.mxu1 }
 0x356   : > { %v1968_v58 = vadd.f32 %v2437_v14, %v4118_v37 }
 0x357   : > { %v1962_v25 = vpop.f32.mrf.mxu1 }
 0x358   : > { %2012 = vst.msk [vmem:[%s4128_s13 + $0xe8] sm:$0xff] %vm1418_vm6, %v1968_v58  ;;  %v1963_v53 = vadd.f32 %v4118_v37, %v1962_v25  ;;  %v2114_v17 = vmul.f32 %v1968_v58, %v1968_v58  ;;  %v2072_v33 = vsel %vm1418_vm6, %v1968_v58, 0.0 }
 0x35a   : > { %2011 = vst.msk [vmem:[%s4128_s13 + $0xe0] sm:$0xff] %vm1418_vm6, %v1963_v53  ;;  %v2113_v47 = vmul.f32 %v1963_v53, %v1963_v53  ;;  %v2070_v59 = vsel %vm1418_vm6, %v1963_v53, 0.0  ;;  %v2174_v48 = vsel %vm1418_vm6, %v2114_v17, 0.0 }
 0x35b   : > { %v2071_v56 = vadd.f32 %v2070_v59, %v2069_v39 }
 0x35c   : > { %v2172_v23 = vsel %vm1418_vm6, %v2113_v47, 0.0 }
 0x35d   : > { %v2173_v1 = vadd.f32 %v2172_v23, %v2171_v10  ;;  %v2073_v31 = vadd.f32 %v2072_v33, %v2071_v56 }
 0x35f   : > { %v2175_v22 = vadd.f32 %v2174_v48, %v2173_v1 }
 0x364   : > { %v2440_v5 = vpop.f32.mrf.mxu1 }
 0x365   : > { %v1978_v9 = vadd.f32 %v2440_v5, %v4118_v37 }
 0x366   : > { %v1972_v57 = vpop.f32.mrf.mxu1 }
 0x367   : > { %2014 = vst.msk [vmem:[%s4128_s13 + $0xf8] sm:$0xff] %vm1418_vm6, %v1978_v9  ;;  %v1973_v36 = vadd.f32 %v4118_v37, %v1972_v57  ;;  %v2116_v12 = vmul.f32 %v1978_v9, %v1978_v9  ;;  %v2076_v62 = vsel %vm1418_vm6, %v1978_v9, 0.0 }
 0x369   : > { %2013 = vst.msk [vmem:[%s4128_s13 + $0xf0] sm:$0xff] %vm1418_vm6, %v1973_v36  ;;  %v2074_v29 = vsel %vm1418_vm6, %v1973_v36, 0.0  ;;  %v2115_v41 = vmul.f32 %v1973_v36, %v1973_v36  ;;  %v2178_v37 = vsel %vm1418_vm6, %v2116_v12, 0.0 }
 0x36a   : > { %v2075_v27 = vadd.f32 %v2074_v29, %v2073_v31 }
 0x36b   : > { %v2176_v26 = vsel %vm1418_vm6, %v2115_v41, 0.0 }
 0x36c   : > { %v2077_v44 = vadd.f32 %v2076_v62, %v2075_v27  ;;  %v2177_v19 = vadd.f32 %v2176_v26, %v2175_v22 }
 0x36e   : > { %v2078_v15 = vrot.slane %v2077_v44, 4  ;;  %v2179_v0 = vadd.f32 %v2178_v37, %v2177_v19 }
 0x370   : > { %v2079_v60 = vadd.f32 %v2078_v15, %v2077_v44  ;;  %v2180_v30 = vrot.slane %v2179_v0, 4 }
 0x372   : > { %v2080_v50 = vrot.slane %v2079_v60, 2  ;;  %v2181_v40 = vadd.f32 %v2180_v30, %v2179_v0 }
 0x374   : > { %v2081_v13 = vadd.f32 %v2080_v50, %v2079_v60  ;;  %v2182_v42 = vrot.slane %v2181_v40, 2 }
 0x376   : > { %v2082_v38 = vrot.slane %v2081_v13, 1  ;;  %v2183_v24 = vadd.f32 %v2182_v42, %v2181_v40 }
 0x378   : > { %v2184_v54 = vrot.slane %v2183_v24, 1  ;;  %v2083_v35 = vadd.f32 %v2082_v38, %v2081_v13 }
 0x37a   : > { %v2185_v7 = vadd.f32 %v2184_v54, %v2183_v24 }
 0x37c   : > { %v2188_v51 = vsel %vm2187_vm14, %v2083_v35, %v2185_v7 }
 0x37d   : > { %2190 = vst.msk [vmem:[%s198_s20] sm:$0x3] %vm2189_vm15, %v2188_v51 }
 0x37e   : > { %2544 = shalt.err (!%p2541_p3)
}
 0x37f   : > { %s2545_s5 = scalar_lea.hbm %s4460_s30, 32  ;;  %s2549_s12 = scalar_lea.hbm %s4499_s4, 64 }
 0x380   : > { %p2546_p4 = scmp.ne.s32.totalorder %s4460_s30, %s2545_s5  ;;  %p2550_p9 = scmp.lt.s32.totalorder %s4460_s30, %s4499_s4 }
 0x381   : > { %p2551_p10 = scmp.lt.s32.totalorder %s2549_s12, %s2545_s5 }
 0x382   : > { %p2547_p7 = pnand %p2546_p4, %p2666_p5 }
 0x383   : > { %p2552_p11 = por %p2551_p10, %p2550_p9 }
 0x384   : > { %p2548_p8 = pneg %p2547_p7 }
 0x386   : > { %p2553_p12 = pnand %p2552_p11, %p2548_p8 }
 0x388   : > { %2556 = shalt.err (!%p2553_p12)
}
 0x389   : > { %2451 = dma.vmem_to_hbm [thread:$0]  (%p2666_p5), %s2214_s22, 32, %s4460_s30, %s2197_s6  }
 0x38a PF: > { %p2457_p13 = scmp.ge.s32.totalorder %s2591_s18, 2  ;;  %s2233_s28 = sand.u32 1, %s2579_s15  }
 0x38b   : > { %s2234_s14 = scalar_lea.sflag [#allocation4], %s2233_s28 }
 0x38c   : > { %p2454_p0 = pnand %p2457_p13, %p2670_p6 }
 0x38e   : > { %p2455_p1 = pneg %p2454_p0 }
 0x390   : > { %2574 = dma.done.wait (%p2455_p1), %s2234_s14, 32  }
 0x391   : > { %2576 = vsyncadd (%p2455_p1), %s2234_s14, 4294967264  ;;  %p15_p2 = scmp.ge.s32.totalorder %s2653_s21, 4   ;;  %s4744_s15 = smov %s2583_s16 }
 0x392   : > { %s4745_s16 = smov %s2587_s17  ;;  %s4746_s17 = smov %s2664_s24 }
 0x393   : > { %s4747_s18 = smov %s2653_s21  ;;  %17 = sbr.rel (!%p15_p2) target bundleno = 3 (0x3), region = 83 }
 0x398   :  { %2239 = vsyncpa [#allocation4], 1 }
 0x399   :  { %2241 = vsyncpa [#allocation4 + $0x1], 1 }

</bundles_post_ra>
